<compile_context>
chip_gen: v5e
topology: v5e:2x2
jax: 0.10.0
libtpu: 0.0.40
codegen_flags: <defaults>
</compile_context>

<pallas_src>
import functools

import jax
import jax.numpy as jnp
from jax.experimental import pallas as pl
from jax.experimental.pallas import tpu as pltpu

EPS = 1e-5
EXPANSION = 4
LANE = 128


def _hw_budget():
    """Per-generation (vmem_limit_bytes, tile_m_target)."""
    try:
        info = pltpu.get_tpu_info()
        vmem_cap = int(getattr(info, "vmem_capacity_bytes", 0))
    except Exception:  # pragma: no cover - conservative fallback off-TPU
        vmem_cap = 0
    if vmem_cap >= 128 * 1024 * 1024:      # v5e / v6e: 128 MiB VMEM
        return 64 * 1024 * 1024, 512
    if vmem_cap > 0:                       # v7x-class: 64 MiB VMEM
        return 40 * 1024 * 1024, 256
    return 32 * 1024 * 1024, 256           # unknown: stay conservative


VMEM_LIMIT, TILE_M_TARGET = _hw_budget()


# ------------------------------ small helpers ------------------------------ #

def _round_up(c, mult=LANE):
    return ((c + mult - 1) // mult) * mult


def _choose_m_tiling(m):
    """Return (padded_m, tile_m) with tile_m | padded_m and tile_m % 8 == 0."""
    if m >= TILE_M_TARGET:
        m_pad = _round_up(m, TILE_M_TARGET)
        return m_pad, TILE_M_TARGET
    m_pad = _round_up(m, 8)
    return m_pad, m_pad


def _pad_channels(x, c_p):
    c = x.shape[-1]
    if c == c_p:
        return x
    return jnp.pad(x, [(0, 0)] * (x.ndim - 1) + [(0, c_p - c)])


def _pad_rows(x2d, m_pad):
    m = x2d.shape[0]
    if m == m_pad:
        return x2d
    return jnp.pad(x2d, ((0, m_pad - m), (0, 0)))


def _pad_matrix(w, rows_p, cols_p):
    r, c = w.shape
    return jnp.pad(w, ((0, rows_p - r), (0, cols_p - c)))


def _pad_vec(v, c_p, fill):
    c = v.shape[0]
    v = v.astype(jnp.float32)
    if c == c_p:
        return v
    return jnp.concatenate([v, jnp.full((c_p - c,), fill, jnp.float32)])


def _pad_taps(w2, cin_p, cout_p):
    # (Cout, Cin, 3, 3) -> (9, Cin_p, Cout_p) per-tap matmul weights
    co, ci = w2.shape[0], w2.shape[1]
    t = jnp.transpose(w2, (2, 3, 1, 0)).reshape(9, ci, co)
    return jnp.pad(t, ((0, 0), (0, cin_p - ci), (0, cout_p - co)))


def _finalize_stats(partial_sums, m, gamma, beta):
    """(tiles, 2, C) per-tile (sum, sumsq) -> per-channel (1,C) scale / bias."""
    # TODO(synk): switch to a shifted-sum / Welford combination for very large
    # M to avoid E[x^2]-E[x]^2 cancellation on big-mean activations.
    tot = jnp.sum(partial_sums, axis=0)
    mean = tot[0] / m
    var = jnp.maximum(tot[1] / m - mean * mean, 0.0)   # biased var (BN fwd)
    scale = gamma * jax.lax.rsqrt(var + EPS)
    bias = beta - mean * scale
    return scale.reshape(1, -1), bias.reshape(1, -1)


def _mosaic_params(n_parallel_axes):
    return pltpu.CompilerParams(
        dimension_semantics=("parallel",) * n_parallel_axes,
        vmem_limit_bytes=VMEM_LIMIT)


# ------------------------------ Pallas kernels ------------------------------ #

def _matmul_stats_kernel(x_ref, w_ref, y_ref, ps_ref, *, compute_dtype):
    # 1x1 conv as a tiled matmul; BN partial sums from the f32 accumulator.
    acc = jnp.dot(x_ref[...].astype(compute_dtype), w_ref[...],
                  preferred_element_type=jnp.float32)
    s = jnp.sum(acc, axis=0, keepdims=True)
    ss = jnp.sum(acc * acc, axis=0, keepdims=True)
    ps_ref[...] = jnp.concatenate([s, ss], axis=0)[None]
    y_ref[...] = acc.astype(y_ref.dtype)     # bf16 store in bf16 mode


def _conv3x3_bn_relu_stats_kernel(y1_ref, s1_ref, b1_ref, w_ref, y2_ref, ps_ref,
                                  img_ref, *, h, w, ho, wo, stride,
                                  compute_dtype):
    # Fused: BN1 apply (f32) + ReLU -> in-VMEM halo pad -> 9 shifted-tap
    # matmuls accumulated in f32 -> BN2 partial sums.  No im2col / no padded
    # activation ever touches HBM.
    # TODO(synk): row-tile (halo via manual make_async_copy) for very large
    # H*W layers so the per-image block + scratch stay inside v7x's 64 MiB.
    cin = y1_ref.shape[-1]
    cout = w_ref.shape[-1]

    scale = s1_ref[...].reshape(1, 1, cin)
    shift = b1_ref[...].reshape(1, 1, cin)
    act = jnp.maximum(y1_ref[0].astype(jnp.float32) * scale + shift, 0.0)

    # Halo buffer: border must be exactly 0 (padding is applied AFTER the
    # activation in the reference), so zero-fill then write the interior.
    img_ref[...] = jnp.zeros(img_ref.shape, img_ref.dtype)
    img_ref[1:1 + h, 1:1 + w, :] = act.astype(img_ref.dtype)
    img = img_ref[...]

    acc = jnp.zeros((ho * wo, cout), jnp.float32)
    # TODO(synk): keep the per-tap patch 3-D (lax.dot_general over channels)
    # to avoid the in-VMEM retiling copy of the reshape on each tap.
    for kh in range(3):
        for kw in range(3):
            if stride == 1:
                patch = img[kh:kh + ho, kw:kw + wo, :]
            else:
                patch = img[kh:kh + stride * ho:stride,
                            kw:kw + stride * wo:stride, :]
            acc = acc + jnp.dot(patch.reshape(ho * wo, cin),
                                w_ref[kh * 3 + kw],
                                preferred_element_type=jnp.float32)

    s = jnp.sum(acc, axis=0, keepdims=True)
    ss = jnp.sum(acc * acc, axis=0, keepdims=True)
    ps_ref[...] = jnp.concatenate([s, ss], axis=0)[None]
    y2_ref[...] = acc.reshape(1, ho, wo, cout).astype(y2_ref.dtype)


def _bn_relu_matmul_stats_kernel(x_ref, s_ref, b_ref, w_ref, y_ref, ps_ref, *,
                                 compute_dtype, tile_m, valid_rows):
    # Fused: BN2 apply + ReLU (f32) -> conv3 1x1 matmul -> BN3 partial sums.
    h = jnp.maximum(x_ref[...].astype(jnp.float32) * s_ref[...] + b_ref[...],
                    0.0)
    if valid_rows is not None:
        # Zero-padded tail rows: relu(bn(0)) != 0, so mask them out of the
        # matmul / statistics (only compiled when M needed padding).
        rows = (pl.program_id(0) * tile_m
                + jax.lax.broadcasted_iota(jnp.int32, h.shape, 0))
        h = jnp.where(rows < valid_rows, h, 0.0)
    acc = jnp.dot(h.astype(compute_dtype), w_ref[...],
                  preferred_element_type=jnp.float32)
    s = jnp.sum(acc, axis=0, keepdims=True)
    ss = jnp.sum(acc * acc, axis=0, keepdims=True)
    ps_ref[...] = jnp.concatenate([s, ss], axis=0)[None]
    y_ref[...] = acc.astype(y_ref.dtype)


def _subsample_matmul_stats_kernel(x_ref, w_ref, y_ref, ps_ref, *, stride,
                                   ho, wo, compute_dtype):
    # Stride>1 projection shortcut: per-image spatial subsample done in VMEM
    # (no JAX-level strided-slice round trip through HBM), then 1x1 matmul.
    cin = x_ref.shape[-1]
    xs = x_ref[0][::stride, ::stride, :]
    acc = jnp.dot(xs.reshape(ho * wo, cin).astype(compute_dtype), w_ref[...],
                  preferred_element_type=jnp.float32)
    s = jnp.sum(acc, axis=0, keepdims=True)
    ss = jnp.sum(acc * acc, axis=0, keepdims=True)
    ps_ref[...] = jnp.concatenate([s, ss], axis=0)[None]
    y_ref[...] = acc.reshape(1, ho * wo, -1).astype(y_ref.dtype)


def _bn_add_relu_kernel(y_ref, sc_ref, sm_ref, bm_ref, ss_ref, bs_ref, o_ref):
    # Fused epilogue: BN3(main) + BN_sc(shortcut) + residual add + ReLU.
    main = y_ref[...].astype(jnp.float32) * sm_ref[...] + bm_ref[...]
    short = sc_ref[...].astype(jnp.float32) * ss_ref[...] + bs_ref[...]
    o_ref[...] = jnp.maximum(main + short, 0.0)


# ------------------------------ call wrappers ------------------------------- #

def matmul_stats(x2d, w, *, tile_m, compute_dtype, out_dtype):
    m, cin = x2d.shape
    cout = w.shape[1]
    nt = m // tile_m
    kern = functools.partial(_matmul_stats_kernel, compute_dtype=compute_dtype)
    return pl.pallas_call(
        kern,
        grid=(nt,),
        in_specs=[
            pl.BlockSpec((tile_m, cin), lambda i: (i, 0)),
            pl.BlockSpec((cin, cout), lambda i: (0, 0)),
        ],
        out_specs=[
            pl.BlockSpec((tile_m, cout), lambda i: (i, 0)),
            pl.BlockSpec((1, 2, cout), lambda i: (i, 0, 0)),
        ],
        out_shape=[
            jax.ShapeDtypeStruct((m, cout), out_dtype),
            jax.ShapeDtypeStruct((nt, 2, cout), jnp.float32),
        ],
        compiler_params=_mosaic_params(1),
        cost_estimate=pl.CostEstimate(
            flops=2 * m * cin * cout, transcendentals=0,
            bytes_accessed=4 * (m * cin + cin * cout + m * cout)),
    )(x2d, w.astype(compute_dtype))


def conv3x3_bn_relu_stats(y1_img, s1, b1, w_taps, ho, wo, stride, *,
                          compute_dtype, out_dtype):
    n, h, w_sp, cin = y1_img.shape
    cout = w_taps.shape[-1]
    kern = functools.partial(_conv3x3_bn_relu_stats_kernel, h=h, w=w_sp,
                             ho=ho, wo=wo, stride=stride,
                             compute_dtype=compute_dtype)
    return pl.pallas_call(
        kern,
        grid=(n,),
        in_specs=[
            pl.BlockSpec((1, h, w_sp, cin), lambda i: (i, 0, 0, 0)),
            pl.BlockSpec((1, cin), lambda i: (0, 0)),
            pl.BlockSpec((1, cin), lambda i: (0, 0)),
            pl.BlockSpec((9, cin, cout), lambda i: (0, 0, 0)),
        ],
        out_specs=[
            pl.BlockSpec((1, ho, wo, cout), lambda i: (i, 0, 0, 0)),
            pl.BlockSpec((1, 2, cout), lambda i: (i, 0, 0)),
        ],
        out_shape=[
            jax.ShapeDtypeStruct((n, ho, wo, cout), out_dtype),
            jax.ShapeDtypeStruct((n, 2, cout), jnp.float32),
        ],
        scratch_shapes=[pltpu.VMEM((h + 2, w_sp + 2, cin), compute_dtype)],
        compiler_params=_mosaic_params(1),
        cost_estimate=pl.CostEstimate(
            flops=2 * n * ho * wo * 9 * cin * cout, transcendentals=0,
            bytes_accessed=4 * (n * h * w_sp * cin + 9 * cin * cout
                                + n * ho * wo * cout)),
    )(y1_img, s1, b1, w_taps.astype(compute_dtype))


def bn_relu_matmul_stats(x2d, scale, bias, w, *, tile_m, compute_dtype,
                         out_dtype, valid_rows=None):
    m, cin = x2d.shape
    cout = w.shape[1]
    nt = m // tile_m
    kern = functools.partial(_bn_relu_matmul_stats_kernel,
                             compute_dtype=compute_dtype, tile_m=tile_m,
                             valid_rows=valid_rows)
    return pl.pallas_call(
        kern,
        grid=(nt,),
        in_specs=[
            pl.BlockSpec((tile_m, cin), lambda i: (i, 0)),
            pl.BlockSpec((1, cin), lambda i: (0, 0)),
            pl.BlockSpec((1, cin), lambda i: (0, 0)),
            pl.BlockSpec((cin, cout), lambda i: (0, 0)),
        ],
        out_specs=[
            pl.BlockSpec((tile_m, cout), lambda i: (i, 0)),
            pl.BlockSpec((1, 2, cout), lambda i: (i, 0, 0)),
        ],
        out_shape=[
            jax.ShapeDtypeStruct((m, cout), out_dtype),
            jax.ShapeDtypeStruct((nt, 2, cout), jnp.float32),
        ],
        compiler_params=_mosaic_params(1),
        cost_estimate=pl.CostEstimate(
            flops=2 * m * cin * cout + 3 * m * cin, transcendentals=0,
            bytes_accessed=4 * (m * cin + cin * cout + m * cout)),
    )(x2d, scale, bias, w.astype(compute_dtype))


def subsample_matmul_stats(x_img, w, ho, wo, stride, *, compute_dtype,
                           out_dtype):
    n, h, w_sp, cin = x_img.shape
    cout = w.shape[1]
    kern = functools.partial(_subsample_matmul_stats_kernel, stride=stride,
                             ho=ho, wo=wo, compute_dtype=compute_dtype)
    return pl.pallas_call(
        kern,
        grid=(n,),
        in_specs=[
            pl.BlockSpec((1, h, w_sp, cin), lambda i: (i, 0, 0, 0)),
            pl.BlockSpec((cin, cout), lambda i: (0, 0)),
        ],
        out_specs=[
            pl.BlockSpec((1, ho * wo, cout), lambda i: (i, 0, 0)),
            pl.BlockSpec((1, 2, cout), lambda i: (i, 0, 0)),
        ],
        out_shape=[
            jax.ShapeDtypeStruct((n, ho * wo, cout), out_dtype),
            jax.ShapeDtypeStruct((n, 2, cout), jnp.float32),
        ],
        compiler_params=_mosaic_params(1),
        cost_estimate=pl.CostEstimate(
            flops=2 * n * ho * wo * cin * cout, transcendentals=0,
            bytes_accessed=4 * (n * h * w_sp * cin + cin * cout
                                + n * ho * wo * cout)),
    )(x_img, w.astype(compute_dtype))


def bn_add_relu(y2d, sc2d, s_main, b_main, s_sc, b_sc, *, tile_m):
    m, c = y2d.shape
    nt = m // tile_m
    return pl.pallas_call(
        _bn_add_relu_kernel,
        grid=(nt,),
        in_specs=[
            pl.BlockSpec((tile_m, c), lambda i: (i, 0)),
            pl.BlockSpec((tile_m, c), lambda i: (i, 0)),
            pl.BlockSpec((1, c), lambda i: (0, 0)),
            pl.BlockSpec((1, c), lambda i: (0, 0)),
            pl.BlockSpec((1, c), lambda i: (0, 0)),
            pl.BlockSpec((1, c), lambda i: (0, 0)),
        ],
        out_specs=pl.BlockSpec((tile_m, c), lambda i: (i, 0)),
        out_shape=jax.ShapeDtypeStruct((m, c), jnp.float32),
        compiler_params=_mosaic_params(1),
        cost_estimate=pl.CostEstimate(
            flops=6 * m * c, transcendentals=0,
            bytes_accessed=4 * (3 * m * c + 4 * c)),
    )(y2d, sc2d, s_main, b_main, s_sc, b_sc)


# ------------------------------ forward pass -------------------------------- #

def init_params(key, in_planes, planes, stride):
    out_planes = EXPANSION * planes
    ks = jax.random.split(key, 12)
    p = {
        "w1": jax.random.normal(ks[0], (planes, in_planes, 1, 1), jnp.float32) * 0.2,
        "g1": 1.0 + 0.1 * jax.random.normal(ks[1], (planes,), jnp.float32),
        "b1": 0.1 * jax.random.normal(ks[2], (planes,), jnp.float32),
        "w2": jax.random.normal(ks[3], (planes, planes, 3, 3), jnp.float32) * 0.1,
        "g2": 1.0 + 0.1 * jax.random.normal(ks[4], (planes,), jnp.float32),
        "b2": 0.1 * jax.random.normal(ks[5], (planes,), jnp.float32),
        "w3": jax.random.normal(ks[6], (out_planes, planes, 1, 1), jnp.float32) * 0.2,
        "g3": 1.0 + 0.1 * jax.random.normal(ks[7], (out_planes,), jnp.float32),
        "b3": 0.1 * jax.random.normal(ks[8], (out_planes,), jnp.float32),
    }
    if stride != 1 or in_planes != out_planes:
        p["wsc"] = jax.random.normal(ks[9], (out_planes, in_planes, 1, 1), jnp.float32) * 0.2
        p["gsc"] = 1.0 + 0.1 * jax.random.normal(ks[10], (out_planes,), jnp.float32)
        p["bsc"] = 0.1 * jax.random.normal(ks[11], (out_planes,), jnp.float32)
    return p


def bottleneck_forward(params, x_nchw, stride, compute_dtype=jnp.float32):
    # Intermediate (inter-kernel) activations take the compute dtype: bf16 in
    # bf16 mode halves HBM traffic of every inter-stage tensor.
    inter_dtype = compute_dtype

    # TODO(synk): drop the NCHW<->NHWC transposes if the surrounding model
    # runs NHWC (saves two more full HBM passes done by XLA outside kernels).
    x = jnp.transpose(x_nchw, (0, 2, 3, 1)).astype(jnp.float32)    # NHWC
    n, h, w_sp, cin = x.shape
    planes = params["w1"].shape[0]
    cout = params["w3"].shape[0]

    cin_p, p_p, cout_p = _round_up(cin), _round_up(planes), _round_up(cout)

    xp = _pad_channels(x, cin_p)
    m1 = n * h * w_sp
    m1_pad, tm1 = _choose_m_tiling(m1)
    x2d = _pad_rows(xp.reshape(m1, cin_p), m1_pad)

    # conv1 (1x1) + BN1 statistics
    w1 = _pad_matrix(params["w1"][:, :, 0, 0].T, cin_p, p_p)
    y1, ps1 = matmul_stats(x2d, w1, tile_m=tm1, compute_dtype=compute_dtype,
                           out_dtype=inter_dtype)
    s1, b1 = _finalize_stats(ps1, m1, _pad_vec(params["g1"], p_p, 1.0),
                             _pad_vec(params["b1"], p_p, 0.0))

    # conv2 (3x3, stride, pad=1) with BN1 apply + ReLU fused in, + BN2 stats
    ho = (h + 2 - 3) // stride + 1
    wo = (w_sp + 2 - 3) // stride + 1
    y1_img = (y1[:m1] if m1_pad != m1 else y1).reshape(n, h, w_sp, p_p)
    w2 = _pad_taps(params["w2"], p_p, p_p)
    y2, ps2 = conv3x3_bn_relu_stats(y1_img, s1, b1, w2, ho, wo, stride,
                                    compute_dtype=compute_dtype,
                                    out_dtype=inter_dtype)
    m2 = n * ho * wo
    s2, b2 = _finalize_stats(ps2, m2, _pad_vec(params["g2"], p_p, 1.0),
                             _pad_vec(params["b2"], p_p, 0.0))

    # BN2 apply + ReLU fused into conv3 (1x1) + BN3 statistics
    m2_pad, tm2 = _choose_m_tiling(m2)
    y2_2d = _pad_rows(y2.reshape(m2, p_p), m2_pad)
    w3 = _pad_matrix(params["w3"][:, :, 0, 0].T, p_p, cout_p)
    y3, ps3 = bn_relu_matmul_stats(
        y2_2d, s2, b2, w3, tile_m=tm2, compute_dtype=compute_dtype,
        out_dtype=inter_dtype, valid_rows=(m2 if m2_pad != m2 else None))
    s3, b3 = _finalize_stats(ps3, m2, _pad_vec(params["g3"], cout_p, 1.0),
                             _pad_vec(params["b3"], cout_p, 0.0))

    # Shortcut path
    if "wsc" in params:
        wsc = _pad_matrix(params["wsc"][:, :, 0, 0].T, cin_p, cout_p)
        if stride == 1:
            ysc, pssc = matmul_stats(x2d, wsc, tile_m=tm2,
                                     compute_dtype=compute_dtype,
                                     out_dtype=inter_dtype)
        else:
            ysc3, pssc = subsample_matmul_stats(xp, wsc, ho, wo, stride,
                                                compute_dtype=compute_dtype,
                                                out_dtype=inter_dtype)
            ysc = _pad_rows(ysc3.reshape(m2, cout_p), m2_pad)
        ssc, bsc = _finalize_stats(pssc, m2,
                                   _pad_vec(params["gsc"], cout_p, 1.0),
                                   _pad_vec(params["bsc"], cout_p, 0.0))
        sc2d = ysc
    else:
        sc2d = x2d                       # identity: stride==1, cin == cout
        ssc = jnp.ones((1, cout_p), jnp.float32)
        bsc = jnp.zeros((1, cout_p), jnp.float32)

    # Fused: BN3(main) + BN_sc(shortcut) + residual add + final ReLU
    out = bn_add_relu(y3, sc2d, s3, b3, ssc, bsc, tile_m=tm2)
    if m2_pad != m2:
        out = out[:m2]
    out = out.reshape(n, ho, wo, cout_p)[..., :cout]
    return jnp.transpose(out, (0, 3, 1, 2))                        # NCHW


# ------------------------ pure-JAX reference (check) ------------------------ #

def _ref_conv(x, w, stride, pad):
    return jax.lax.conv_general_dilated(
        x, w, (stride, stride), [(pad, pad), (pad, pad)],
        dimension_numbers=("NCHW", "OIHW", "NCHW"))


def _ref_bn(y, g, b):
    mean = y.mean(axis=(0, 2, 3), keepdims=True)
    var = ((y - mean) ** 2).mean(axis=(0, 2, 3), keepdims=True)
    return (y - mean) * jax.lax.rsqrt(var + EPS) * g.reshape(1, -1, 1, 1) \
        + b.reshape(1, -1, 1, 1)


def bottleneck_reference(params, x, stride):
    out = jax.nn.relu(_ref_bn(_ref_conv(x, params["w1"], 1, 0), params["g1"], params["b1"]))
    out = jax.nn.relu(_ref_bn(_ref_conv(out, params["w2"], stride, 1), params["g2"], params["b2"]))
    out = _ref_bn(_ref_conv(out, params["w3"], 1, 0), params["g3"], params["b3"])
    if "wsc" in params:
        sc = _ref_bn(_ref_conv(x, params["wsc"], stride, 0), params["gsc"], params["bsc"])
    else:
        sc = x
    return jax.nn.relu(out + sc)


# ---------------------------------- main ------------------------------------ #

if __name__ == "__main__":
    key = jax.random.PRNGKey(0)
    k_x1, k_p1, k_x2, k_p2 = jax.random.split(key, 4)

    fwd = jax.jit(bottleneck_forward, static_argnums=(2, 3))

    # Case 1: projection shortcut (in_planes != 4*planes), stride=1.
    in_planes, planes, stride = 4, 4, 1
    x = jax.random.normal(k_x1, (2, in_planes, 16, 16), jnp.float32)   # NCHW
    params = init_params(k_p1, in_planes, planes, stride)

    y = jax.block_until_ready(fwd(params, x, stride))
    y_ref = jax.block_until_ready(bottleneck_reference(params, x, stride))
    assert y.shape == (2, EXPANSION * planes, 16, 16), y.shape
    assert jnp.allclose(y, y_ref, atol=5e-4, rtol=5e-4), \
        float(jnp.max(jnp.abs(y - y_ref)))

    # Same case with bf16 MXU operands + bf16 intermediates (f32 accumulation
    # and f32 BN statistics): relaxed tolerance.
    y_bf16 = jax.block_until_ready(fwd(params, x, stride, jnp.bfloat16))
    assert y_bf16.shape == y_ref.shape
    assert jnp.allclose(y_bf16, y_ref, atol=2e-1, rtol=2e-1), \
        float(jnp.max(jnp.abs(y_bf16 - y_ref)))

    # Case 2: identity shortcut (in_planes == 4*planes), stride=1, f32.
    in_planes2, planes2 = 16, 4
    x2 = jax.random.normal(k_x2, (2, in_planes2, 16, 16), jnp.float32)
    params2 = init_params(k_p2, in_planes2, planes2, 1)
    y2o = jax.block_until_ready(fwd(params2, x2, 1))
    y2r = jax.block_until_ready(bottleneck_reference(params2, x2, 1))
    assert y2o.shape == (2, EXPANSION * planes2, 16, 16), y2o.shape
    assert jnp.allclose(y2o, y2r, atol=5e-4, rtol=5e-4), \
        float(jnp.max(jnp.abs(y2o - y2r)))

    print("KERNEL_OK")
</pallas_src>

<mosaic_0001>
module attributes {stable_mosaic.version = 11 : i64} {
  func.func @_matmul_stats_kernel(%arg0: i32, %arg1: memref<256x128xf32, #tpu.memory_space<vmem>>, %arg2: memref<128x128xf32, #tpu.memory_space<vmem>>, %arg3: memref<256x128xf32, #tpu.memory_space<vmem>>, %arg4: memref<1x2x128xf32, #tpu.memory_space<vmem>>) attributes {dimension_semantics = [#tpu.dimension_semantics<parallel>], iteration_bounds = array<i64: 2>, scalar_prefetch = 0 : i64, scratch_operands = 0 : i64, tpu.core_type = #tpu.core_type<tc>, window_params = [{transform_indices = @transform_0, window_bounds = array<i64: 256, 128>}, {pipeline_mode = #tpu.pipeline_mode<synchronous>, transform_indices = @transform_1, window_bounds = array<i64: 128, 128>}, {transform_indices = @transform_2, window_bounds = array<i64: 256, 128>}, {transform_indices = @transform_3, window_bounds = array<i64: 1, 2, 128>}]} {
    %c0 = arith.constant 0 : index
    %c0_0 = arith.constant 0 : index
    %0 = vector.load %arg1[%c0, %c0_0] : memref<256x128xf32, #tpu.memory_space<vmem>>, vector<256x128xf32>
    %c0_1 = arith.constant 0 : index
    %c0_2 = arith.constant 0 : index
    %1 = vector.load %arg2[%c0_1, %c0_2] : memref<128x128xf32, #tpu.memory_space<vmem>>, vector<128x128xf32>
    %cst = arith.constant dense<0.000000e+00> : vector<256x128xf32>
    %2 = tpu.matmul %0, %1, %cst {dimension_numbers = #tpu.dot_dimension_numbers<[1], [0], [0], [1], [0, 0, 1, 1], [], []>} : vector<256x128xf32>, vector<128x128xf32>, vector<256x128xf32> -> vector<256x128xf32>
    %cst_3 = arith.constant dense<0.000000e+00> : vector<128xf32>
    %3 = vector.multi_reduction <add>, %2, %cst_3 [0] : vector<256x128xf32> to vector<128xf32>
    %4 = vector.shape_cast %3 : vector<128xf32> to vector<1x128xf32>
    %5 = arith.mulf %2, %2 : vector<256x128xf32>
    %cst_4 = arith.constant dense<0.000000e+00> : vector<128xf32>
    %6 = vector.multi_reduction <add>, %5, %cst_4 [0] : vector<256x128xf32> to vector<128xf32>
    %7 = vector.shape_cast %6 : vector<128xf32> to vector<1x128xf32>
    %8 = tpu.concatenate %4, %7 in 0 : vector<1x128xf32>, vector<1x128xf32> -> vector<2x128xf32>
    %9 = vector.shape_cast %8 : vector<2x128xf32> to vector<1x2x128xf32>
    %c0_5 = arith.constant 0 : index
    %c0_6 = arith.constant 0 : index
    %c0_7 = arith.constant 0 : index
    %10 = vector.load %arg4[%c0_5, %c0_6, %c0_7] : memref<1x2x128xf32, #tpu.memory_space<vmem>>, vector<1x2x128xf32>
    tpu.vector_store %arg4[%c0_5, %c0_6, %c0_7], %9 {strides = array<i32>} : memref<1x2x128xf32, #tpu.memory_space<vmem>>, vector<1x2x128xf32>,
    %c0_8 = arith.constant 0 : index
    %c0_9 = arith.constant 0 : index
    %11 = vector.load %arg3[%c0_8, %c0_9] : memref<256x128xf32, #tpu.memory_space<vmem>>, vector<256x128xf32>
    tpu.vector_store %arg3[%c0_8, %c0_9], %2 {strides = array<i32>} : memref<256x128xf32, #tpu.memory_space<vmem>>, vector<256x128xf32>,
    return
  }
  func.func @transform_0(%arg0: i32) -> (i32, i32) {
    %c0_i32 = arith.constant 0 : i32
    %c0_i32_0 = arith.constant 0 : i32
    return %arg0, %c0_i32 : i32, i32
  }
  func.func @transform_1(%arg0: i32) -> (i32, i32) {
    %c0_i32 = arith.constant 0 : i32
    %c0_i32_0 = arith.constant 0 : i32
    %c0_i32_1 = arith.constant 0 : i32
    return %c0_i32, %c0_i32_0 : i32, i32
  }
  func.func @transform_2(%arg0: i32) -> (i32, i32) {
    %c0_i32 = arith.constant 0 : i32
    %c0_i32_0 = arith.constant 0 : i32
    return %arg0, %c0_i32 : i32, i32
  }
  func.func @transform_3(%arg0: i32) -> (i32, i32, i32) {
    %c0_i32 = arith.constant 0 : i32
    %c0_i32_0 = arith.constant 0 : i32
    %c0_i32_1 = arith.constant 0 : i32
    return %arg0, %c0_i32, %c0_i32_0 : i32, i32, i32
  }
}

module attributes {stable_mosaic.version = 11 : i64} {
  func.func @_conv3x3_bn_relu_stats_kernel(%arg0: i32, %arg1: memref<1x16x16x128xf32, #tpu.memory_space<vmem>>, %arg2: memref<1x128xf32, #tpu.memory_space<vmem>>, %arg3: memref<1x128xf32, #tpu.memory_space<vmem>>, %arg4: memref<9x128x128xf32, #tpu.memory_space<vmem>>, %arg5: memref<1x16x16x128xf32, #tpu.memory_space<vmem>>, %arg6: memref<1x2x128xf32, #tpu.memory_space<vmem>>, %arg7: memref<18x18x128xf32, #tpu.memory_space<vmem>>) attributes {dimension_semantics = [#tpu.dimension_semantics<parallel>], iteration_bounds = array<i64: 2>, scalar_prefetch = 0 : i64, scratch_operands = 1 : i64, tpu.core_type = #tpu.core_type<tc>, window_params = [{transform_indices = @transform_0, window_bounds = array<i64: 1, 16, 16, 128>}, {pipeline_mode = #tpu.pipeline_mode<synchronous>, transform_indices = @transform_1, window_bounds = array<i64: 1, 128>}, {pipeline_mode = #tpu.pipeline_mode<synchronous>, transform_indices = @transform_2, window_bounds = array<i64: 1, 128>}, {pipeline_mode = #tpu.pipeline_mode<synchronous>, transform_indices = @transform_3, window_bounds = array<i64: 9, 128, 128>}, {transform_indices = @transform_4, window_bounds = array<i64: 1, 16, 16, 128>}, {transform_indices = @transform_5, window_bounds = array<i64: 1, 2, 128>}]} {
    %c0 = arith.constant 0 : index
    %c0_0 = arith.constant 0 : index
    %0 = vector.load %arg2[%c0, %c0_0] : memref<1x128xf32, #tpu.memory_space<vmem>>, vector<1x128xf32>
    %1 = vector.shape_cast %0 : vector<1x128xf32> to vector<1x1x128xf32>
    %c0_1 = arith.constant 0 : index
    %c0_2 = arith.constant 0 : index
    %2 = vector.load %arg3[%c0_1, %c0_2] : memref<1x128xf32, #tpu.memory_space<vmem>>, vector<1x128xf32>
    %3 = vector.shape_cast %2 : vector<1x128xf32> to vector<1x1x128xf32>
    %c0_3 = arith.constant 0 : index
    %c0_4 = arith.constant 0 : index
    %c0_5 = arith.constant 0 : index
    %c0_6 = arith.constant 0 : index
    %4 = vector.load %arg1[%c0_3, %c0_4, %c0_5, %c0_6] : memref<1x16x16x128xf32, #tpu.memory_space<vmem>>, vector<1x16x16x128xf32>
    %5 = vector.shape_cast %4 : vector<1x16x16x128xf32> to vector<16x16x128xf32>
    %6 = vector.broadcast %1 : vector<1x1x128xf32> to vector<16x16x128xf32>
    %7 = arith.mulf %5, %6 : vector<16x16x128xf32>
    %8 = vector.broadcast %3 : vector<1x1x128xf32> to vector<16x16x128xf32>
    %9 = arith.addf %7, %8 : vector<16x16x128xf32>
    %cst = arith.constant 0.000000e+00 : f32
    %10 = vector.broadcast %cst : f32 to vector<16x16x128xf32>
    %11 = arith.maximumf %9, %10 : vector<16x16x128xf32>
    %cst_7 = arith.constant 0.000000e+00 : f32
    %12 = vector.broadcast %cst_7 : f32 to vector<18x18x128xf32>
    %c0_8 = arith.constant 0 : index
    %c0_9 = arith.constant 0 : index
    %c0_10 = arith.constant 0 : index
    %13 = vector.load %arg7[%c0_8, %c0_9, %c0_10] : memref<18x18x128xf32, #tpu.memory_space<vmem>>, vector<18x18x128xf32>
    tpu.vector_store %arg7[%c0_8, %c0_9, %c0_10], %12 {strides = array<i32>} : memref<18x18x128xf32, #tpu.memory_space<vmem>>, vector<18x18x128xf32>,
    %c1 = arith.constant 1 : index
    %c1_11 = arith.constant 1 : index
    %c0_12 = arith.constant 0 : index
    %14 = vector.load %arg7[%c1, %c1_11, %c0_12] : memref<18x18x128xf32, #tpu.memory_space<vmem>>, vector<16x16x128xf32>
    tpu.vector_store %arg7[%c1, %c1_11, %c0_12], %11 {strides = array<i32>} : memref<18x18x128xf32, #tpu.memory_space<vmem>>, vector<16x16x128xf32>,
    %c0_13 = arith.constant 0 : index
    %c0_14 = arith.constant 0 : index
    %c0_15 = arith.constant 0 : index
    %15 = vector.load %arg7[%c0_13, %c0_14, %c0_15] : memref<18x18x128xf32, #tpu.memory_space<vmem>>, vector<18x18x128xf32>
    %cst_16 = arith.constant 0.000000e+00 : f32
    %16 = vector.broadcast %cst_16 : f32 to vector<256x128xf32>
    %17 = vector.extract_strided_slice %15 {offsets = [0, 0, 0], sizes = [16, 16, 128], strides = [1, 1, 1]} : vector<18x18x128xf32> to vector<16x16x128xf32>
    %18 = vector.shape_cast %17 : vector<16x16x128xf32> to vector<256x128xf32>
    %c0_17 = arith.constant 0 : index
    %c0_18 = arith.constant 0 : index
    %c0_19 = arith.constant 0 : index
    %19 = vector.load %arg4[%c0_17, %c0_18, %c0_19] : memref<9x128x128xf32, #tpu.memory_space<vmem>>, vector<1x128x128xf32>
    %20 = vector.shape_cast %19 : vector<1x128x128xf32> to vector<128x128xf32>
    %cst_20 = arith.constant dense<0.000000e+00> : vector<256x128xf32>
    %21 = tpu.matmul %18, %20, %cst_20 {dimension_numbers = #tpu.dot_dimension_numbers<[1], [0], [0], [1], [0, 0, 1, 1], [], []>} : vector<256x128xf32>, vector<128x128xf32>, vector<256x128xf32> -> vector<256x128xf32>
    %22 = arith.addf %16, %21 : vector<256x128xf32>
    %23 = vector.extract_strided_slice %15 {offsets = [0, 1, 0], sizes = [16, 16, 128], strides = [1, 1, 1]} : vector<18x18x128xf32> to vector<16x16x128xf32>
    %24 = vector.shape_cast %23 : vector<16x16x128xf32> to vector<256x128xf32>
    %c1_21 = arith.constant 1 : index
    %c0_22 = arith.constant 0 : index
    %c0_23 = arith.constant 0 : index
    %25 = vector.load %arg4[%c1_21, %c0_22, %c0_23] : memref<9x128x128xf32, #tpu.memory_space<vmem>>, vector<1x128x128xf32>
    %26 = vector.shape_cast %25 : vector<1x128x128xf32> to vector<128x128xf32>
    %cst_24 = arith.constant dense<0.000000e+00> : vector<256x128xf32>
    %27 = tpu.matmul %24, %26, %cst_24 {dimension_numbers = #tpu.dot_dimension_numbers<[1], [0], [0], [1], [0, 0, 1, 1], [], []>} : vector<256x128xf32>, vector<128x128xf32>, vector<256x128xf32> -> vector<256x128xf32>
    %28 = arith.addf %22, %27 : vector<256x128xf32>
    %29 = vector.extract_strided_slice %15 {offsets = [0, 2, 0], sizes = [16, 16, 128], strides = [1, 1, 1]} : vector<18x18x128xf32> to vector<16x16x128xf32>
    %30 = vector.shape_cast %29 : vector<16x16x128xf32> to vector<256x128xf32>
    %c2 = arith.constant 2 : index
    %c0_25 = arith.constant 0 : index
    %c0_26 = arith.constant 0 : index
    %31 = vector.load %arg4[%c2, %c0_25, %c0_26] : memref<9x128x128xf32, #tpu.memory_space<vmem>>, vector<1x128x128xf32>
    %32 = vector.shape_cast %31 : vector<1x128x128xf32> to vector<128x128xf32>
    %cst_27 = arith.constant dense<0.000000e+00> : vector<256x128xf32>
    %33 = tpu.matmul %30, %32, %cst_27 {dimension_numbers = #tpu.dot_dimension_numbers<[1], [0], [0], [1], [0, 0, 1, 1], [], []>} : vector<256x128xf32>, vector<128x128xf32>, vector<256x128xf32> -> vector<256x128xf32>
    %34 = arith.addf %28, %33 : vector<256x128xf32>
    %35 = vector.extract_strided_slice %15 {offsets = [1, 0, 0], sizes = [16, 16, 128], strides = [1, 1, 1]} : vector<18x18x128xf32> to vector<16x16x128xf32>
    %36 = vector.shape_cast %35 : vector<16x16x128xf32> to vector<256x128xf32>
    %c3 = arith.constant 3 : index
    %c0_28 = arith.constant 0 : index
    %c0_29 = arith.constant 0 : index
    %37 = vector.load %arg4[%c3, %c0_28, %c0_29] : memref<9x128x128xf32, #tpu.memory_space<vmem>>, vector<1x128x128xf32>
    %38 = vector.shape_cast %37 : vector<1x128x128xf32> to vector<128x128xf32>
    %cst_30 = arith.constant dense<0.000000e+00> : vector<256x128xf32>
    %39 = tpu.matmul %36, %38, %cst_30 {dimension_numbers = #tpu.dot_dimension_numbers<[1], [0], [0], [1], [0, 0, 1, 1], [], []>} : vector<256x128xf32>, vector<128x128xf32>, vector<256x128xf32> -> vector<256x128xf32>
    %40 = arith.addf %34, %39 : vector<256x128xf32>
    %41 = vector.extract_strided_slice %15 {offsets = [1, 1, 0], sizes = [16, 16, 128], strides = [1, 1, 1]} : vector<18x18x128xf32> to vector<16x16x128xf32>
    %42 = vector.shape_cast %41 : vector<16x16x128xf32> to vector<256x128xf32>
    %c4 = arith.constant 4 : index
    %c0_31 = arith.constant 0 : index
    %c0_32 = arith.constant 0 : index
    %43 = vector.load %arg4[%c4, %c0_31, %c0_32] : memref<9x128x128xf32, #tpu.memory_space<vmem>>, vector<1x128x128xf32>
    %44 = vector.shape_cast %43 : vector<1x128x128xf32> to vector<128x128xf32>
    %cst_33 = arith.constant dense<0.000000e+00> : vector<256x128xf32>
    %45 = tpu.matmul %42, %44, %cst_33 {dimension_numbers = #tpu.dot_dimension_numbers<[1], [0], [0], [1], [0, 0, 1, 1], [], []>} : vector<256x128xf32>, vector<128x128xf32>, vector<256x128xf32> -> vector<256x128xf32>
    %46 = arith.addf %40, %45 : vector<256x128xf32>
    %47 = vector.extract_strided_slice %15 {offsets = [1, 2, 0], sizes = [16, 16, 128], strides = [1, 1, 1]} : vector<18x18x128xf32> to vector<16x16x128xf32>
    %48 = vector.shape_cast %47 : vector<16x16x128xf32> to vector<256x128xf32>
    %c5 = arith.constant 5 : index
    %c0_34 = arith.constant 0 : index
    %c0_35 = arith.constant 0 : index
    %49 = vector.load %arg4[%c5, %c0_34, %c0_35] : memref<9x128x128xf32, #tpu.memory_space<vmem>>, vector<1x128x128xf32>
    %50 = vector.shape_cast %49 : vector<1x128x128xf32> to vector<128x128xf32>
    %cst_36 = arith.constant dense<0.000000e+00> : vector<256x128xf32>
    %51 = tpu.matmul %48, %50, %cst_36 {dimension_numbers = #tpu.dot_dimension_numbers<[1], [0], [0], [1], [0, 0, 1, 1], [], []>} : vector<256x128xf32>, vector<128x128xf32>, vector<256x128xf32> -> vector<256x128xf32>
    %52 = arith.addf %46, %51 : vector<256x128xf32>
    %53 = vector.extract_strided_slice %15 {offsets = [2, 0, 0], sizes = [16, 16, 128], strides = [1, 1, 1]} : vector<18x18x128xf32> to vector<16x16x128xf32>
    %54 = vector.shape_cast %53 : vector<16x16x128xf32> to vector<256x128xf32>
    %c6 = arith.constant 6 : index
    %c0_37 = arith.constant 0 : index
    %c0_38 = arith.constant 0 : index
    %55 = vector.load %arg4[%c6, %c0_37, %c0_38] : memref<9x128x128xf32, #tpu.memory_space<vmem>>, vector<1x128x128xf32>
    %56 = vector.shape_cast %55 : vector<1x128x128xf32> to vector<128x128xf32>
    %cst_39 = arith.constant dense<0.000000e+00> : vector<256x128xf32>
    %57 = tpu.matmul %54, %56, %cst_39 {dimension_numbers = #tpu.dot_dimension_numbers<[1], [0], [0], [1], [0, 0, 1, 1], [], []>} : vector<256x128xf32>, vector<128x128xf32>, vector<256x128xf32> -> vector<256x128xf32>
    %58 = arith.addf %52, %57 : vector<256x128xf32>
    %59 = vector.extract_strided_slice %15 {offsets = [2, 1, 0], sizes = [16, 16, 128], strides = [1, 1, 1]} : vector<18x18x128xf32> to vector<16x16x128xf32>
    %60 = vector.shape_cast %59 : vector<16x16x128xf32> to vector<256x128xf32>
    %c7 = arith.constant 7 : index
    %c0_40 = arith.constant 0 : index
    %c0_41 = arith.constant 0 : index
    %61 = vector.load %arg4[%c7, %c0_40, %c0_41] : memref<9x128x128xf32, #tpu.memory_space<vmem>>, vector<1x128x128xf32>
    %62 = vector.shape_cast %61 : vector<1x128x128xf32> to vector<128x128xf32>
    %cst_42 = arith.constant dense<0.000000e+00> : vector<256x128xf32>
    %63 = tpu.matmul %60, %62, %cst_42 {dimension_numbers = #tpu.dot_dimension_numbers<[1], [0], [0], [1], [0, 0, 1, 1], [], []>} : vector<256x128xf32>, vector<128x128xf32>, vector<256x128xf32> -> vector<256x128xf32>
    %64 = arith.addf %58, %63 : vector<256x128xf32>
    %65 = vector.extract_strided_slice %15 {offsets = [2, 2, 0], sizes = [16, 16, 128], strides = [1, 1, 1]} : vector<18x18x128xf32> to vector<16x16x128xf32>
    %66 = vector.shape_cast %65 : vector<16x16x128xf32> to vector<256x128xf32>
    %c8 = arith.constant 8 : index
    %c0_43 = arith.constant 0 : index
    %c0_44 = arith.constant 0 : index
    %67 = vector.load %arg4[%c8, %c0_43, %c0_44] : memref<9x128x128xf32, #tpu.memory_space<vmem>>, vector<1x128x128xf32>
    %68 = vector.shape_cast %67 : vector<1x128x128xf32> to vector<128x128xf32>
    %cst_45 = arith.constant dense<0.000000e+00> : vector<256x128xf32>
    %69 = tpu.matmul %66, %68, %cst_45 {dimension_numbers = #tpu.dot_dimension_numbers<[1], [0], [0], [1], [0, 0, 1, 1], [], []>} : vector<256x128xf32>, vector<128x128xf32>, vector<256x128xf32> -> vector<256x128xf32>
    %70 = arith.addf %64, %69 : vector<256x128xf32>
    %cst_46 = arith.constant dense<0.000000e+00> : vector<128xf32>
    %71 = vector.multi_reduction <add>, %70, %cst_46 [0] : vector<256x128xf32> to vector<128xf32>
    %72 = vector.shape_cast %71 : vector<128xf32> to vector<1x128xf32>
    %73 = arith.mulf %70, %70 : vector<256x128xf32>
    %cst_47 = arith.constant dense<0.000000e+00> : vector<128xf32>
    %74 = vector.multi_reduction <add>, %73, %cst_47 [0] : vector<256x128xf32> to vector<128xf32>
    %75 = vector.shape_cast %74 : vector<128xf32> to vector<1x128xf32>
    %76 = tpu.concatenate %72, %75 in 0 : vector<1x128xf32>, vector<1x128xf32> -> vector<2x128xf32>
    %77 = vector.shape_cast %76 : vector<2x128xf32> to vector<1x2x128xf32>
    %c0_48 = arith.constant 0 : index
    %c0_49 = arith.constant 0 : index
    %c0_50 = arith.constant 0 : index
    %78 = vector.load %arg6[%c0_48, %c0_49, %c0_50] : memref<1x2x128xf32, #tpu.memory_space<vmem>>, vector<1x2x128xf32>
    tpu.vector_store %arg6[%c0_48, %c0_49, %c0_50], %77 {strides = array<i32>} : memref<1x2x128xf32, #tpu.memory_space<vmem>>, vector<1x2x128xf32>,
    %79 = vector.shape_cast %70 : vector<256x128xf32> to vector<1x16x16x128xf32>
    %c0_51 = arith.constant 0 : index
    %c0_52 = arith.constant 0 : index
    %c0_53 = arith.constant 0 : index
    %c0_54 = arith.constant 0 : index
    %80 = vector.load %arg5[%c0_51, %c0_52, %c0_53, %c0_54] : memref<1x16x16x128xf32, #tpu.memory_space<vmem>>, vector<1x16x16x128xf32>
    tpu.vector_store %arg5[%c0_51, %c0_52, %c0_53, %c0_54], %79 {strides = array<i32>} : memref<1x16x16x128xf32, #tpu.memory_space<vmem>>, vector<1x16x16x128xf32>,
    return
  }
  func.func @transform_0(%arg0: i32) -> (i32, i32, i32, i32) {
    %c0_i32 = arith.constant 0 : i32
    %c0_i32_0 = arith.constant 0 : i32
    %c0_i32_1 = arith.constant 0 : i32
    %c0_i32_2 = arith.constant 0 : i32
    return %arg0, %c0_i32, %c0_i32_0, %c0_i32_1 : i32, i32, i32, i32
  }
  func.func @transform_1(%arg0: i32) -> (i32, i32) {
    %c0_i32 = arith.constant 0 : i32
    %c0_i32_0 = arith.constant 0 : i32
    %c0_i32_1 = arith.constant 0 : i32
    return %c0_i32, %c0_i32_0 : i32, i32
  }
  func.func @transform_2(%arg0: i32) -> (i32, i32) {
    %c0_i32 = arith.constant 0 : i32
    %c0_i32_0 = arith.constant 0 : i32
    %c0_i32_1 = arith.constant 0 : i32
    return %c0_i32, %c0_i32_0 : i32, i32
  }
  func.func @transform_3(%arg0: i32) -> (i32, i32, i32) {
    %c0_i32 = arith.constant 0 : i32
    %c0_i32_0 = arith.constant 0 : i32
    %c0_i32_1 = arith.constant 0 : i32
    %c0_i32_2 = arith.constant 0 : i32
    return %c0_i32, %c0_i32_0, %c0_i32_1 : i32, i32, i32
  }
  func.func @transform_4(%arg0: i32) -> (i32, i32, i32, i32) {
    %c0_i32 = arith.constant 0 : i32
    %c0_i32_0 = arith.constant 0 : i32
    %c0_i32_1 = arith.constant 0 : i32
    %c0_i32_2 = arith.constant 0 : i32
    return %arg0, %c0_i32, %c0_i32_0, %c0_i32_1 : i32, i32, i32, i32
  }
  func.func @transform_5(%arg0: i32) -> (i32, i32, i32) {
    %c0_i32 = arith.constant 0 : i32
    %c0_i32_0 = arith.constant 0 : i32
    %c0_i32_1 = arith.constant 0 : i32
    return %arg0, %c0_i32, %c0_i32_0 : i32, i32, i32
  }
}

module attributes {stable_mosaic.version = 11 : i64} {
  func.func @_bn_relu_matmul_stats_kernel(%arg0: i32, %arg1: memref<256x128xf32, #tpu.memory_space<vmem>>, %arg2: memref<1x128xf32, #tpu.memory_space<vmem>>, %arg3: memref<1x128xf32, #tpu.memory_space<vmem>>, %arg4: memref<128x128xf32, #tpu.memory_space<vmem>>, %arg5: memref<256x128xf32, #tpu.memory_space<vmem>>, %arg6: memref<1x2x128xf32, #tpu.memory_space<vmem>>) attributes {dimension_semantics = [#tpu.dimension_semantics<parallel>], iteration_bounds = array<i64: 2>, scalar_prefetch = 0 : i64, scratch_operands = 0 : i64, tpu.core_type = #tpu.core_type<tc>, window_params = [{transform_indices = @transform_0, window_bounds = array<i64: 256, 128>}, {pipeline_mode = #tpu.pipeline_mode<synchronous>, transform_indices = @transform_1, window_bounds = array<i64: 1, 128>}, {pipeline_mode = #tpu.pipeline_mode<synchronous>, transform_indices = @transform_2, window_bounds = array<i64: 1, 128>}, {pipeline_mode = #tpu.pipeline_mode<synchronous>, transform_indices = @transform_3, window_bounds = array<i64: 128, 128>}, {transform_indices = @transform_4, window_bounds = array<i64: 256, 128>}, {transform_indices = @transform_5, window_bounds = array<i64: 1, 2, 128>}]} {
    %c0 = arith.constant 0 : index
    %c0_0 = arith.constant 0 : index
    %0 = vector.load %arg1[%c0, %c0_0] : memref<256x128xf32, #tpu.memory_space<vmem>>, vector<256x128xf32>
    %c0_1 = arith.constant 0 : index
    %c0_2 = arith.constant 0 : index
    %1 = vector.load %arg2[%c0_1, %c0_2] : memref<1x128xf32, #tpu.memory_space<vmem>>, vector<1x128xf32>
    %2 = vector.broadcast %1 : vector<1x128xf32> to vector<256x128xf32>
    %3 = arith.mulf %0, %2 : vector<256x128xf32>
    %c0_3 = arith.constant 0 : index
    %c0_4 = arith.constant 0 : index
    %4 = vector.load %arg3[%c0_3, %c0_4] : memref<1x128xf32, #tpu.memory_space<vmem>>, vector<1x128xf32>
    %5 = vector.broadcast %4 : vector<1x128xf32> to vector<256x128xf32>
    %6 = arith.addf %3, %5 : vector<256x128xf32>
    %cst = arith.constant 0.000000e+00 : f32
    %7 = vector.broadcast %cst : f32 to vector<256x128xf32>
    %8 = arith.maximumf %6, %7 : vector<256x128xf32>
    %c0_5 = arith.constant 0 : index
    %c0_6 = arith.constant 0 : index
    %9 = vector.load %arg4[%c0_5, %c0_6] : memref<128x128xf32, #tpu.memory_space<vmem>>, vector<128x128xf32>
    %cst_7 = arith.constant dense<0.000000e+00> : vector<256x128xf32>
    %10 = tpu.matmul %8, %9, %cst_7 {dimension_numbers = #tpu.dot_dimension_numbers<[1], [0], [0], [1], [0, 0, 1, 1], [], []>} : vector<256x128xf32>, vector<128x128xf32>, vector<256x128xf32> -> vector<256x128xf32>
    %cst_8 = arith.constant dense<0.000000e+00> : vector<128xf32>
    %11 = vector.multi_reduction <add>, %10, %cst_8 [0] : vector<256x128xf32> to vector<128xf32>
    %12 = vector.shape_cast %11 : vector<128xf32> to vector<1x128xf32>
    %13 = arith.mulf %10, %10 : vector<256x128xf32>
    %cst_9 = arith.constant dense<0.000000e+00> : vector<128xf32>
    %14 = vector.multi_reduction <add>, %13, %cst_9 [0] : vector<256x128xf32> to vector<128xf32>
    %15 = vector.shape_cast %14 : vector<128xf32> to vector<1x128xf32>
    %16 = tpu.concatenate %12, %15 in 0 : vector<1x128xf32>, vector<1x128xf32> -> vector<2x128xf32>
    %17 = vector.shape_cast %16 : vector<2x128xf32> to vector<1x2x128xf32>
    %c0_10 = arith.constant 0 : index
    %c0_11 = arith.constant 0 : index
    %c0_12 = arith.constant 0 : index
    %18 = vector.load %arg6[%c0_10, %c0_11, %c0_12] : memref<1x2x128xf32, #tpu.memory_space<vmem>>, vector<1x2x128xf32>
    tpu.vector_store %arg6[%c0_10, %c0_11, %c0_12], %17 {strides = array<i32>} : memref<1x2x128xf32, #tpu.memory_space<vmem>>, vector<1x2x128xf32>,
    %c0_13 = arith.constant 0 : index
    %c0_14 = arith.constant 0 : index
    %19 = vector.load %arg5[%c0_13, %c0_14] : memref<256x128xf32, #tpu.memory_space<vmem>>, vector<256x128xf32>
    tpu.vector_store %arg5[%c0_13, %c0_14], %10 {strides = array<i32>} : memref<256x128xf32, #tpu.memory_space<vmem>>, vector<256x128xf32>,
    return
  }
  func.func @transform_0(%arg0: i32) -> (i32, i32) {
    %c0_i32 = arith.constant 0 : i32
    %c0_i32_0 = arith.constant 0 : i32
    return %arg0, %c0_i32 : i32, i32
  }
  func.func @transform_1(%arg0: i32) -> (i32, i32) {
    %c0_i32 = arith.constant 0 : i32
    %c0_i32_0 = arith.constant 0 : i32
    %c0_i32_1 = arith.constant 0 : i32
    return %c0_i32, %c0_i32_0 : i32, i32
  }
  func.func @transform_2(%arg0: i32) -> (i32, i32) {
    %c0_i32 = arith.constant 0 : i32
    %c0_i32_0 = arith.constant 0 : i32
    %c0_i32_1 = arith.constant 0 : i32
    return %c0_i32, %c0_i32_0 : i32, i32
  }
  func.func @transform_3(%arg0: i32) -> (i32, i32) {
    %c0_i32 = arith.constant 0 : i32
    %c0_i32_0 = arith.constant 0 : i32
    %c0_i32_1 = arith.constant 0 : i32
    return %c0_i32, %c0_i32_0 : i32, i32
  }
  func.func @transform_4(%arg0: i32) -> (i32, i32) {
    %c0_i32 = arith.constant 0 : i32
    %c0_i32_0 = arith.constant 0 : i32
    return %arg0, %c0_i32 : i32, i32
  }
  func.func @transform_5(%arg0: i32) -> (i32, i32, i32) {
    %c0_i32 = arith.constant 0 : i32
    %c0_i32_0 = arith.constant 0 : i32
    %c0_i32_1 = arith.constant 0 : i32
    return %arg0, %c0_i32, %c0_i32_0 : i32, i32, i32
  }
}

module attributes {stable_mosaic.version = 11 : i64} {
  func.func @_bn_add_relu_kernel(%arg0: i32, %arg1: memref<256x128xf32, #tpu.memory_space<vmem>>, %arg2: memref<256x128xf32, #tpu.memory_space<vmem>>, %arg3: memref<1x128xf32, #tpu.memory_space<vmem>>, %arg4: memref<1x128xf32, #tpu.memory_space<vmem>>, %arg5: memref<1x128xf32, #tpu.memory_space<vmem>>, %arg6: memref<1x128xf32, #tpu.memory_space<vmem>>, %arg7: memref<256x128xf32, #tpu.memory_space<vmem>>) attributes {dimension_semantics = [#tpu.dimension_semantics<parallel>], iteration_bounds = array<i64: 2>, scalar_prefetch = 0 : i64, scratch_operands = 0 : i64, tpu.core_type = #tpu.core_type<tc>, window_params = [{transform_indices = @transform_0, window_bounds = array<i64: 256, 128>}, {transform_indices = @transform_1, window_bounds = array<i64: 256, 128>}, {pipeline_mode = #tpu.pipeline_mode<synchronous>, transform_indices = @transform_2, window_bounds = array<i64: 1, 128>}, {pipeline_mode = #tpu.pipeline_mode<synchronous>, transform_indices = @transform_3, window_bounds = array<i64: 1, 128>}, {pipeline_mode = #tpu.pipeline_mode<synchronous>, transform_indices = @transform_4, window_bounds = array<i64: 1, 128>}, {pipeline_mode = #tpu.pipeline_mode<synchronous>, transform_indices = @transform_5, window_bounds = array<i64: 1, 128>}, {transform_indices = @transform_6, window_bounds = array<i64: 256, 128>}]} {
    %c0 = arith.constant 0 : index
    %c0_0 = arith.constant 0 : index
    %0 = vector.load %arg1[%c0, %c0_0] : memref<256x128xf32, #tpu.memory_space<vmem>>, vector<256x128xf32>
    %c0_1 = arith.constant 0 : index
    %c0_2 = arith.constant 0 : index
    %1 = vector.load %arg3[%c0_1, %c0_2] : memref<1x128xf32, #tpu.memory_space<vmem>>, vector<1x128xf32>
    %2 = vector.broadcast %1 : vector<1x128xf32> to vector<256x128xf32>
    %3 = arith.mulf %0, %2 : vector<256x128xf32>
    %c0_3 = arith.constant 0 : index
    %c0_4 = arith.constant 0 : index
    %4 = vector.load %arg4[%c0_3, %c0_4] : memref<1x128xf32, #tpu.memory_space<vmem>>, vector<1x128xf32>
    %5 = vector.broadcast %4 : vector<1x128xf32> to vector<256x128xf32>
    %6 = arith.addf %3, %5 : vector<256x128xf32>
    %c0_5 = arith.constant 0 : index
    %c0_6 = arith.constant 0 : index
    %7 = vector.load %arg2[%c0_5, %c0_6] : memref<256x128xf32, #tpu.memory_space<vmem>>, vector<256x128xf32>
    %c0_7 = arith.constant 0 : index
    %c0_8 = arith.constant 0 : index
    %8 = vector.load %arg5[%c0_7, %c0_8] : memref<1x128xf32, #tpu.memory_space<vmem>>, vector<1x128xf32>
    %9 = vector.broadcast %8 : vector<1x128xf32> to vector<256x128xf32>
    %10 = arith.mulf %7, %9 : vector<256x128xf32>
    %c0_9 = arith.constant 0 : index
    %c0_10 = arith.constant 0 : index
    %11 = vector.load %arg6[%c0_9, %c0_10] : memref<1x128xf32, #tpu.memory_space<vmem>>, vector<1x128xf32>
    %12 = vector.broadcast %11 : vector<1x128xf32> to vector<256x128xf32>
    %13 = arith.addf %10, %12 : vector<256x128xf32>
    %14 = arith.addf %6, %13 : vector<256x128xf32>
    %cst = arith.constant 0.000000e+00 : f32
    %15 = vector.broadcast %cst : f32 to vector<256x128xf32>
    %16 = arith.maximumf %14, %15 : vector<256x128xf32>
    %c0_11 = arith.constant 0 : index
    %c0_12 = arith.constant 0 : index
    %17 = vector.load %arg7[%c0_11, %c0_12] : memref<256x128xf32, #tpu.memory_space<vmem>>, vector<256x128xf32>
    tpu.vector_store %arg7[%c0_11, %c0_12], %16 {strides = array<i32>} : memref<256x128xf32, #tpu.memory_space<vmem>>, vector<256x128xf32>,
    return
  }
  func.func @transform_0(%arg0: i32) -> (i32, i32) {
    %c0_i32 = arith.constant 0 : i32
    %c0_i32_0 = arith.constant 0 : i32
    return %arg0, %c0_i32 : i32, i32
  }
  func.func @transform_1(%arg0: i32) -> (i32, i32) {
    %c0_i32 = arith.constant 0 : i32
    %c0_i32_0 = arith.constant 0 : i32
    return %arg0, %c0_i32 : i32, i32
  }
  func.func @transform_2(%arg0: i32) -> (i32, i32) {
    %c0_i32 = arith.constant 0 : i32
    %c0_i32_0 = arith.constant 0 : i32
    %c0_i32_1 = arith.constant 0 : i32
    return %c0_i32, %c0_i32_0 : i32, i32
  }
  func.func @transform_3(%arg0: i32) -> (i32, i32) {
    %c0_i32 = arith.constant 0 : i32
    %c0_i32_0 = arith.constant 0 : i32
    %c0_i32_1 = arith.constant 0 : i32
    return %c0_i32, %c0_i32_0 : i32, i32
  }
  func.func @transform_4(%arg0: i32) -> (i32, i32) {
    %c0_i32 = arith.constant 0 : i32
    %c0_i32_0 = arith.constant 0 : i32
    %c0_i32_1 = arith.constant 0 : i32
    return %c0_i32, %c0_i32_0 : i32, i32
  }
  func.func @transform_5(%arg0: i32) -> (i32, i32) {
    %c0_i32 = arith.constant 0 : i32
    %c0_i32_0 = arith.constant 0 : i32
    %c0_i32_1 = arith.constant 0 : i32
    return %c0_i32, %c0_i32_0 : i32, i32
  }
  func.func @transform_6(%arg0: i32) -> (i32, i32) {
    %c0_i32 = arith.constant 0 : i32
    %c0_i32_0 = arith.constant 0 : i32
    return %arg0, %c0_i32 : i32, i32
  }
}

</mosaic_0001>

<bundles_post_ra>
// kernel: bottleneck_forward.5
= control target key start
LH: loop header
LB: loop body
LE: loop exit
PB: predicated region body
PF: predicated region fallthrough
CT: control target
= control target key end

     0   :  { %s670_s12 = smov 0   ;;  %s926_s0 = inlined_call_operand.vmem [shape: f32[512,128], index: 0, kind: input, shape index: {}]   ;;  %s927_s1 = inlined_call_operand.vmem [shape: f32[128,128], index: 1, kind: input, shape index: {}]   ;;  %s928_s2 = inlined_call_operand.vmem [shape: f32[512,128], index: 2, kind: output, shape index: {0}]   ;;  %s929_s3 = inlined_call_operand.vmem [shape: f32[2,2,128], index: 3, kind: output, shape index: {1}]  }
   0x1 LB: > { %s676_s13 = sadd.s32 4294967295, %s648_s12   ;;  %p578_p0 = scmp.ge.s32.totalorder %s648_s12, 1  ;;  %s648_s12 = sphi %s670_s12, %s14_s12  }
   0x2   : > { %p141_p1 = scmp.lt.s32.totalorder %s648_s12, 3 }
   0x4   : > { %p142_p2 = pnand %p578_p0, %p141_p1 }
   0x5   : > { %s579_s30 = sshll.u32 (!%p142_p2), %s676_s13, 5  ;;  %p181_p4 = scmp.lt.s32.totalorder (!%p142_p2), %s676_s13, 1 }
   0x6   : > { %145 = sbr.rel (%p142_p2) target bundleno = 291 (0x123), region = 28  ;;  %p170_p3 = scmp.lt.s32.totalorder (!%p142_p2), %s579_s30, 63 }
   0xb   : > { %v232_v0 = vld [vmem:[%s927_s1 + $0x78] sm:$0xff]  ;;  %v231_v1 = vld [vmem:[%s927_s1 + $0x70] sm:$0xff]  ;;  %v230_v2 = vld [vmem:[%s927_s1 + $0x68] sm:$0xff]  ;;  %s931_s30 = smov (!%p170_p3, %s579_s30), 63  ;;  %s933_s13 = smov (!%p181_p4, %s676_s13), 1  ;;  %vm452_vm0 = vcmask 1040384  }
   0xc   : > { %233 = vmatpush.msra.mxu0 %v232_v0  ;;  %586 = vmatpush.msra.mxu1 %v232_v0  ;;  %v229_v3 = vld [vmem:[%s927_s1 + $0x60] sm:$0xff]  ;;  %v228_v4 = vld [vmem:[%s927_s1 + $0x58] sm:$0xff]  ;;  %v227_v5 = vld [vmem:[%s927_s1 + $0x50] sm:$0xff]  ;;  %s580_s16 = sshll.u32 %s931_s30, 3  ;;  %s583_s29 = sshll.u32 %s933_s13, 1 }
   0xd   : > { %587 = vmatpush.msra.mxu2 %v232_v0  ;;  %588 = vmatpush.msra.mxu3 %v232_v0  ;;  %v226_v6 = vld [vmem:[%s927_s1 + $0x48] sm:$0xff]  ;;  %v225_v7 = vld [vmem:[%s927_s1 + $0x40] sm:$0xff]  ;;  %v224_v8 = vld [vmem:[%s927_s1 + $0x38] sm:$0xff]  ;;  %s734_s23 = scalar_lea.vmem %s926_s0, %s580_s16  ;;  %s776_s28 = scalar_lea.vmem %s928_s2, %s580_s16 }
   0xe   : > { %234 = vmatpush.msra.mxu0 %v231_v1  ;;  %589 = vmatpush.msra.mxu1 %v231_v1  ;;  %v223_v9 = vld [vmem:[%s927_s1 + $0x30] sm:$0xff]  ;;  %v222_v10 = vld [vmem:[%s927_s1 + $0x28] sm:$0xff]  ;;  %v221_v11 = vld [vmem:[%s927_s1 + $0x20] sm:$0xff]  ;;  %s184_s5 = scalar_lea.vmem %s929_s3, %s583_s29 }
   0xf   : > { %590 = vmatpush.msra.mxu2 %v231_v1  ;;  %591 = vmatpush.msra.mxu3 %v231_v1  ;;  %v220_v12 = vld [vmem:[%s927_s1 + $0x18] sm:$0xff]  ;;  %v219_v13 = vld [vmem:[%s927_s1 + $0x10] sm:$0xff]  ;;  %v218_v14 = vld [vmem:[%s927_s1 + $0x8] sm:$0xff] }
  0x10   : > { %235 = vmatpush.msra.mxu0 %v230_v2  ;;  %592 = vmatpush.msra.mxu1 %v230_v2  ;;  %v217_v15 = vld [vmem:[%s927_s1] sm:$0xff]  ;;  %v186_v19 = vld [vmem:[%s734_s23 + $0x8] sm:$0xff]  ;;  %v187_v23 = vld [vmem:[%s734_s23 + $0x10] sm:$0xff] }
  0x11   : > { %593 = vmatpush.msra.mxu2 %v230_v2  ;;  %594 = vmatpush.msra.mxu3 %v230_v2  ;;  %v185_v16 = vld [vmem:[%s734_s23] sm:$0xff]  ;;  %v194_v20 = vld [vmem:[%s734_s23 + $0x48] sm:$0xff]  ;;  %v195_v24 = vld [vmem:[%s734_s23 + $0x50] sm:$0xff] }
  0x12   : > { %236 = vmatpush.msra.mxu0 %v229_v3  ;;  %595 = vmatpush.msra.mxu1 %v229_v3  ;;  %v193_v17 = vld [vmem:[%s734_s23 + $0x40] sm:$0xff]  ;;  %v202_v21 = vld [vmem:[%s734_s23 + $0x88] sm:$0xff]  ;;  %v203_v25 = vld [vmem:[%s734_s23 + $0x90] sm:$0xff] }
  0x13   : > { %596 = vmatpush.msra.mxu2 %v229_v3  ;;  %597 = vmatpush.msra.mxu3 %v229_v3  ;;  %v201_v18 = vld [vmem:[%s734_s23 + $0x80] sm:$0xff]  ;;  %v210_v26 = vld [vmem:[%s734_s23 + $0xc8] sm:$0xff]  ;;  %v188_v27 = vld [vmem:[%s734_s23 + $0x18] sm:$0xff] }
  0x14   : > { %237 = vmatpush.msra.mxu0 %v228_v4  ;;  %598 = vmatpush.msra.mxu1 %v228_v4  ;;  %v209_v22 = vld [vmem:[%s734_s23 + $0xc0] sm:$0xff]  ;;  %v196_v28 = vld [vmem:[%s734_s23 + $0x58] sm:$0xff]  ;;  %v211_v30 = vld [vmem:[%s734_s23 + $0xd0] sm:$0xff] }
  0x15   : > { %599 = vmatpush.msra.mxu2 %v228_v4  ;;  %600 = vmatpush.msra.mxu3 %v228_v4  ;;  %v204_v29 = vld [vmem:[%s734_s23 + $0x98] sm:$0xff]  ;;  %v189_v31 = vld [vmem:[%s734_s23 + $0x20] sm:$0xff]  ;;  %v190_v35 = vld [vmem:[%s734_s23 + $0x28] sm:$0xff] }
  0x16   : > { %238 = vmatpush.msra.mxu0 %v227_v5  ;;  %601 = vmatpush.msra.mxu1 %v227_v5  ;;  %v197_v32 = vld [vmem:[%s734_s23 + $0x60] sm:$0xff]  ;;  %v212_v33 = vld [vmem:[%s734_s23 + $0xd8] sm:$0xff]  ;;  %v198_v36 = vld [vmem:[%s734_s23 + $0x68] sm:$0xff] }
  0x17   : > { %602 = vmatpush.msra.mxu2 %v227_v5  ;;  %603 = vmatpush.msra.mxu3 %v227_v5  ;;  %v205_v34 = vld [vmem:[%s734_s23 + $0xa0] sm:$0xff]  ;;  %v206_v38 = vld [vmem:[%s734_s23 + $0xa8] sm:$0xff]  ;;  %v191_v39 = vld [vmem:[%s734_s23 + $0x30] sm:$0xff] }
  0x18   : > { %239 = vmatpush.msra.mxu0 %v226_v6  ;;  %604 = vmatpush.msra.mxu1 %v226_v6  ;;  %v213_v37 = vld [vmem:[%s734_s23 + $0xe0] sm:$0xff]  ;;  %v199_v40 = vld [vmem:[%s734_s23 + $0x70] sm:$0xff]  ;;  %v214_v41 = vld [vmem:[%s734_s23 + $0xe8] sm:$0xff] }
  0x19   : > { %605 = vmatpush.msra.mxu2 %v226_v6  ;;  %606 = vmatpush.msra.mxu3 %v226_v6  ;;  %v207_v42 = vld [vmem:[%s734_s23 + $0xb0] sm:$0xff]  ;;  %v192_v43 = vld [vmem:[%s734_s23 + $0x38] sm:$0xff] }
  0x1a   : > { %240 = vmatpush.msra.mxu0 %v225_v7  ;;  %607 = vmatpush.msra.mxu1 %v225_v7  ;;  %v200_v44 = vld [vmem:[%s734_s23 + $0x78] sm:$0xff]  ;;  %v215_v45 = vld [vmem:[%s734_s23 + $0xf0] sm:$0xff] }
  0x1b   : > { %608 = vmatpush.msra.mxu2 %v225_v7  ;;  %609 = vmatpush.msra.mxu3 %v225_v7  ;;  %v208_v46 = vld [vmem:[%s734_s23 + $0xb8] sm:$0xff] }
  0x1c   : > { %241 = vmatpush.msra.mxu0 %v224_v8  ;;  %610 = vmatpush.msra.mxu1 %v224_v8  ;;  %v216_v47 = vld [vmem:[%s734_s23 + $0xf8] sm:$0xff] }
  0x1d   : > { %611 = vmatpush.msra.mxu2 %v224_v8  ;;  %612 = vmatpush.msra.mxu3 %v224_v8 }
  0x1e   : > { %242 = vmatpush.msra.mxu0 %v223_v9  ;;  %613 = vmatpush.msra.mxu1 %v223_v9 }
  0x1f   : > { %614 = vmatpush.msra.mxu2 %v223_v9  ;;  %615 = vmatpush.msra.mxu3 %v223_v9 }
  0x20   : > { %243 = vmatpush.msra.mxu0 %v222_v10  ;;  %616 = vmatpush.msra.mxu1 %v222_v10 }
  0x21   : > { %617 = vmatpush.msra.mxu2 %v222_v10  ;;  %618 = vmatpush.msra.mxu3 %v222_v10 }
  0x22   : > { %244 = vmatpush.msra.mxu0 %v221_v11  ;;  %619 = vmatpush.msra.mxu1 %v221_v11 }
  0x23   : > { %620 = vmatpush.msra.mxu2 %v221_v11  ;;  %621 = vmatpush.msra.mxu3 %v221_v11 }
  0x24   : > { %245 = vmatpush.msra.mxu0 %v220_v12  ;;  %622 = vmatpush.msra.mxu1 %v220_v12 }
  0x25   : > { %623 = vmatpush.msra.mxu2 %v220_v12  ;;  %624 = vmatpush.msra.mxu3 %v220_v12 }
  0x26   : > { %246 = vmatpush.msra.mxu0 %v219_v13  ;;  %625 = vmatpush.msra.mxu1 %v219_v13 }
  0x27   : > { %626 = vmatpush.msra.mxu2 %v219_v13  ;;  %627 = vmatpush.msra.mxu3 %v219_v13 }
  0x28   : > { %247 = vmatpush.msra.mxu0 %v218_v14  ;;  %628 = vmatpush.msra.mxu1 %v218_v14 }
  0x29   : > { %629 = vmatpush.msra.mxu2 %v218_v14  ;;  %630 = vmatpush.msra.mxu3 %v218_v14 }
  0x2a   : > { %248 = vmatpush.msra.mxu0 %v217_v15  ;;  %631 = vmatpush.msra.mxu1 %v217_v15 }
  0x2b   : > { %249 = vmatmul.f32.vlgmr.msra.gmra.mxu0 %v185_v16  ;;  %273 = vmatmul.f32.vlgmr.msra.gmra.mxu1 %v193_v17 }
  0x2c   : > { %632 = vmatpush.msra.mxu2 %v217_v15  ;;  %633 = vmatpush.msra.mxu3 %v217_v15 }
  0x2d   : > { %297 = vmatmul.f32.vlgmr.msra.gmra.mxu2 %v201_v18  ;;  %321 = vmatmul.f32.vlgmr.msra.gmra.mxu3 %v209_v22 }
  0x33   : > { %252 = vmatmul.f32.gmra.mxu0 %v186_v19  ;;  %276 = vmatmul.f32.gmra.mxu1 %v194_v20 }
  0x35   : > { %300 = vmatmul.f32.gmra.mxu2 %v202_v21  ;;  %324 = vmatmul.f32.gmra.mxu3 %v210_v26 }
  0x3b   : > { %255 = vmatmul.f32.gmra.mxu0 %v187_v23  ;;  %279 = vmatmul.f32.gmra.mxu1 %v195_v24 }
  0x3d   : > { %303 = vmatmul.f32.gmra.mxu2 %v203_v25  ;;  %327 = vmatmul.f32.gmra.mxu3 %v211_v30 }
  0x43   : > { %258 = vmatmul.f32.gmra.mxu0 %v188_v27  ;;  %282 = vmatmul.f32.gmra.mxu1 %v196_v28 }
  0x45   : > { %306 = vmatmul.f32.gmra.mxu2 %v204_v29  ;;  %330 = vmatmul.f32.gmra.mxu3 %v212_v33 }
  0x4b   : > { %261 = vmatmul.f32.gmra.mxu0 %v189_v31  ;;  %285 = vmatmul.f32.gmra.mxu1 %v197_v32 }
  0x4d   : > { %309 = vmatmul.f32.gmra.mxu2 %v205_v34  ;;  %333 = vmatmul.f32.gmra.mxu3 %v213_v37 }
  0x53   : > { %264 = vmatmul.f32.gmra.mxu0 %v190_v35  ;;  %288 = vmatmul.f32.gmra.mxu1 %v198_v36 }
  0x55   : > { %312 = vmatmul.f32.gmra.mxu2 %v206_v38  ;;  %336 = vmatmul.f32.gmra.mxu3 %v214_v41 }
  0x5b   : > { %267 = vmatmul.f32.gmra.mxu0 %v191_v39  ;;  %291 = vmatmul.f32.gmra.mxu1 %v199_v40 }
  0x5d   : > { %315 = vmatmul.f32.gmra.mxu2 %v207_v42  ;;  %339 = vmatmul.f32.gmra.mxu3 %v215_v45 }
  0x63   : > { %270 = vmatmul.f32.gmra.mxu0 %v192_v43  ;;  %294 = vmatmul.f32.gmra.mxu1 %v200_v44 }
  0x65   : > { %318 = vmatmul.f32.gmra.mxu2 %v208_v46  ;;  %342 = vmatmul.f32.gmra.mxu3 %v216_v47 }
  0xa8   : > { %v250_v48 = vpop.f32.mrf.mxu0  ;;  %v778_v49 = vpop.f32.mrf.mxu1 }
  0xa9   : > { %455 = vst [vmem:[%s776_s28] sm:$0xff] %v250_v48  ;;  %v383_v6 = vmul.f32 %v250_v48, %v250_v48  ;;  %v391_v34 = vmul.f32 %v778_v49, %v778_v49 }
  0xaa   : > { %463 = vst [vmem:[%s776_s28 + $0x40] sm:$0xff] %v778_v49 }
  0xb0   : > { %v253_v50 = vpop.f32.mrf.mxu0  ;;  %v783_v51 = vpop.f32.mrf.mxu1 }
  0xb1   : > { %456 = vst [vmem:[%s776_s28 + $0x8] sm:$0xff] %v253_v50  ;;  %v786_v52 = vpop.f32.mrf.mxu2  ;;  %v797_v56 = vpop.f32.mrf.mxu3  ;;  %v384_v5 = vmul.f32 %v253_v50, %v253_v50  ;;  %v346_v7 = vadd.f32 %v253_v50, %v250_v48  ;;  %v392_v37 = vmul.f32 %v783_v51, %v783_v51 }
  0xb2   : > { %464 = vst [vmem:[%s776_s28 + $0x48] sm:$0xff] %v783_v51 }
  0xb3   : > { %471 = vst [vmem:[%s776_s28 + $0x80] sm:$0xff] %v786_v52  ;;  %v415_v9 = vadd.f32 %v384_v5, %v383_v6 }
  0xb4   : > { %479 = vst [vmem:[%s776_s28 + $0xc0] sm:$0xff] %v797_v56 }
  0xb8   : > { %v256_v53 = vpop.f32.mrf.mxu0  ;;  %v792_v54 = vpop.f32.mrf.mxu1 }
  0xb9   : > { %457 = vst [vmem:[%s776_s28 + $0x10] sm:$0xff] %v256_v53  ;;  %v795_v55 = vpop.f32.mrf.mxu2  ;;  %v810_v60 = vpop.f32.mrf.mxu3  ;;  %v385_v8 = vmul.f32 %v256_v53, %v256_v53  ;;  %v347_v10 = vadd.f32 %v346_v7, %v256_v53  ;;  %v393_v40 = vmul.f32 %v792_v54, %v792_v54 }
  0xba   : > { %465 = vst [vmem:[%s776_s28 + $0x50] sm:$0xff] %v792_v54 }
  0xbb   : > { %472 = vst [vmem:[%s776_s28 + $0x88] sm:$0xff] %v795_v55  ;;  %v416_v14 = vadd.f32 %v415_v9, %v385_v8  ;;  %v399_v8 = vmul.f32 %v786_v52, %v786_v52 }
  0xbc   : > { %480 = vst [vmem:[%s776_s28 + $0xc8] sm:$0xff] %v810_v60 }
  0xc0   : > { %v259_v57 = vpop.f32.mrf.mxu0  ;;  %v805_v58 = vpop.f32.mrf.mxu1 }
  0xc1   : > { %458 = vst [vmem:[%s776_s28 + $0x18] sm:$0xff] %v259_v57  ;;  %v808_v59 = vpop.f32.mrf.mxu2  ;;  %v823_v0 = vpop.f32.mrf.mxu3  ;;  %v386_v11 = vmul.f32 %v259_v57, %v259_v57  ;;  %v348_v15 = vadd.f32 %v347_v10, %v259_v57  ;;  %v394_v43 = vmul.f32 %v805_v58, %v805_v58  ;;  %v400_v10 = vmul.f32 %v795_v55, %v795_v55 }
  0xc2   : > { %466 = vst [vmem:[%s776_s28 + $0x58] sm:$0xff] %v805_v58 }
  0xc3   : > { %473 = vst [vmem:[%s776_s28 + $0x90] sm:$0xff] %v808_v59  ;;  %v417_v19 = vadd.f32 %v416_v14, %v386_v11 }
  0xc4   : > { %481 = vst [vmem:[%s776_s28 + $0xd0] sm:$0xff] %v823_v0 }
  0xc8   : > { %v262_v61 = vpop.f32.mrf.mxu0  ;;  %v818_v62 = vpop.f32.mrf.mxu1 }
  0xc9   : > { %459 = vst [vmem:[%s776_s28 + $0x20] sm:$0xff] %v262_v61  ;;  %v821_v63 = vpop.f32.mrf.mxu2  ;;  %v836_v4 = vpop.f32.mrf.mxu3  ;;  %v387_v16 = vmul.f32 %v262_v61, %v262_v61  ;;  %v349_v20 = vadd.f32 %v348_v15, %v262_v61  ;;  %v395_v48 = vmul.f32 %v818_v62, %v818_v62 }
  0xca   : > { %467 = vst [vmem:[%s776_s28 + $0x60] sm:$0xff] %v818_v62  ;;  %v402_v15 = vmul.f32 %v821_v63, %v821_v63 }
  0xcb   : > { %474 = vst [vmem:[%s776_s28 + $0x98] sm:$0xff] %v821_v63  ;;  %v418_v22 = vadd.f32 %v417_v19, %v387_v16 }
  0xcc   : > { %482 = vst [vmem:[%s776_s28 + $0xd8] sm:$0xff] %v836_v4 }
  0xd0   : > { %v265_v1 = vpop.f32.mrf.mxu0  ;;  %v831_v2 = vpop.f32.mrf.mxu1 }
  0xd1   : > { %460 = vst [vmem:[%s776_s28 + $0x28] sm:$0xff] %v265_v1  ;;  %v834_v3 = vpop.f32.mrf.mxu2  ;;  %v847_v18 = vpop.f32.mrf.mxu3  ;;  %v388_v21 = vmul.f32 %v265_v1, %v265_v1  ;;  %v350_v23 = vadd.f32 %v349_v20, %v265_v1  ;;  %v396_v53 = vmul.f32 %v831_v2, %v831_v2 }
  0xd2   : > { %468 = vst [vmem:[%s776_s28 + $0x68] sm:$0xff] %v831_v2 }
  0xd3   : > { %475 = vst [vmem:[%s776_s28 + $0xa0] sm:$0xff] %v834_v3  ;;  %v419_v25 = vadd.f32 %v418_v22, %v388_v21 }
  0xd4   : > { %483 = vst [vmem:[%s776_s28 + $0xe0] sm:$0xff] %v847_v18 }
  0xd8   : > { %v268_v12 = vpop.f32.mrf.mxu0  ;;  %v292_v13 = vpop.f32.mrf.mxu1 }
  0xd9   : > { %461 = vst [vmem:[%s776_s28 + $0x30] sm:$0xff] %v268_v12  ;;  %v845_v17 = vpop.f32.mrf.mxu2  ;;  %v389_v24 = vmul.f32 %v268_v12, %v268_v12  ;;  %v351_v26 = vadd.f32 %v350_v23, %v268_v12  ;;  %v855_v33 = vpop.f32.mrf.mxu3  ;;  %v401_v12 = vmul.f32 %v808_v59, %v808_v59 }
  0xda   : > { %469 = vst [vmem:[%s776_s28 + $0x70] sm:$0xff] %v292_v13  ;;  %v404_v22 = vmul.f32 %v845_v17, %v845_v17 }
  0xdb   : > { %476 = vst [vmem:[%s776_s28 + $0xa8] sm:$0xff] %v845_v17  ;;  %v420_v29 = vadd.f32 %v419_v25, %v389_v24 }
  0xdc   : > { %484 = vst [vmem:[%s776_s28 + $0xe8] sm:$0xff] %v855_v33 }
  0xe0   : > { %v271_v27 = vpop.f32.mrf.mxu0  ;;  %v295_v28 = vpop.f32.mrf.mxu1 }
  0xe1   : > { %v352_v30 = vadd.f32 %v351_v26, %v271_v27  ;;  %v390_v31 = vmul.f32 %v271_v27, %v271_v27  ;;  %462 = vst [vmem:[%s776_s28 + $0x38] sm:$0xff] %v271_v27  ;;  %v316_v32 = vpop.f32.mrf.mxu2  ;;  %v340_v47 = vpop.f32.mrf.mxu3  ;;  %v398_v1 = vmul.f32 %v295_v28, %v295_v28 }
  0xe2   : > { %470 = vst [vmem:[%s776_s28 + $0x78] sm:$0xff] %v295_v28  ;;  %v405_v25 = vmul.f32 %v316_v32, %v316_v32 }
  0xe3   : > { %v353_v35 = vadd.f32 %v352_v30, %v778_v49  ;;  %v421_v36 = vadd.f32 %v420_v29, %v390_v31  ;;  %477 = vst [vmem:[%s776_s28 + $0xb0] sm:$0xff] %v316_v32 }
  0xe4   : > { %485 = vst [vmem:[%s776_s28 + $0xf0] sm:$0xff] %v340_v47 }
  0xe5   : > { %v354_v38 = vadd.f32 %v353_v35, %v783_v51  ;;  %v422_v39 = vadd.f32 %v421_v36, %v391_v34  ;;  %v410_v36 = vmul.f32 %v836_v4, %v836_v4 }
  0xe7   : > { %v355_v41 = vadd.f32 %v354_v38, %v792_v54  ;;  %v423_v42 = vadd.f32 %v422_v39, %v392_v37  ;;  %v411_v38 = vmul.f32 %v847_v18, %v847_v18 }
  0xe9   : > { %v424_v44 = vadd.f32 %v423_v42, %v393_v40  ;;  %v356_v45 = vadd.f32 %v355_v41, %v805_v58  ;;  %v319_v46 = vpop.f32.mrf.mxu2  ;;  %v397_v58 = vmul.f32 %v292_v13, %v292_v13  ;;  %v343_v7 = vpop.f32.mrf.mxu3 }
  0xea   : > { %478 = vst [vmem:[%s776_s28 + $0xb8] sm:$0xff] %v319_v46  ;;  %v406_v26 = vmul.f32 %v319_v46, %v319_v46 }
  0xeb   : > { %v357_v49 = vadd.f32 %v356_v45, %v818_v62  ;;  %v425_v50 = vadd.f32 %v424_v44, %v394_v43  ;;  %486 = vst [vmem:[%s776_s28 + $0xf8] sm:$0xff] %v343_v7  ;;  %v413_v44 = vmul.f32 %v340_v47, %v340_v47  ;;  %v414_v45 = vmul.f32 %v343_v7, %v343_v7 }
  0xed   : > { %v358_v51 = vadd.f32 %v357_v49, %v831_v2  ;;  %v426_v54 = vadd.f32 %v425_v50, %v395_v48 }
  0xef   : > { %v427_v57 = vadd.f32 %v426_v54, %v396_v53  ;;  %v359_v61 = vadd.f32 %v358_v51, %v292_v13 }
  0xf1   : > { %v428_v5 = vadd.f32 %v427_v57, %v397_v58  ;;  %v360_v6 = vadd.f32 %v359_v61, %v295_v28 }
  0xf3   : > { %v361_v62 = vadd.f32 %v360_v6, %v786_v52  ;;  %v429_v9 = vadd.f32 %v428_v5, %v398_v1  ;;  %v403_v52 = vmul.f32 %v834_v3, %v834_v3 }
  0xf5   : > { %v362_v2 = vadd.f32 %v361_v62, %v795_v55  ;;  %v430_v11 = vadd.f32 %v429_v9, %v399_v8 }
  0xf7   : > { %v363_v13 = vadd.f32 %v362_v2, %v808_v59  ;;  %v431_v14 = vadd.f32 %v430_v11, %v400_v10 }
  0xf9   : > { %v432_v16 = vadd.f32 %v431_v14, %v401_v12  ;;  %v364_v19 = vadd.f32 %v363_v13, %v821_v63  ;;  %v407_v63 = vmul.f32 %v797_v56, %v797_v56 }
  0xfb   : > { %v365_v20 = vadd.f32 %v364_v19, %v834_v3  ;;  %v433_v21 = vadd.f32 %v432_v16, %v402_v15  ;;  %v408_v3 = vmul.f32 %v810_v60, %v810_v60 }
  0xfd   : > { %v366_v55 = vadd.f32 %v365_v20, %v845_v17  ;;  %v434_v23 = vadd.f32 %v433_v21, %v403_v52  ;;  %v409_v17 = vmul.f32 %v823_v0, %v823_v0 }
  0xff   : > { %v435_v59 = vadd.f32 %v434_v23, %v404_v22  ;;  %v367_v24 = vadd.f32 %v366_v55, %v316_v32 }
 0x101   : > { %v436_v27 = vadd.f32 %v435_v59, %v405_v25  ;;  %v368_v28 = vadd.f32 %v367_v24, %v319_v46 }
 0x103   : > { %v369_v29 = vadd.f32 %v368_v28, %v797_v56  ;;  %v437_v30 = vadd.f32 %v436_v27, %v406_v26 }
 0x105   : > { %v370_v31 = vadd.f32 %v369_v29, %v810_v60  ;;  %v438_v34 = vadd.f32 %v437_v30, %v407_v63 }
 0x107   : > { %v371_v32 = vadd.f32 %v370_v31, %v823_v0  ;;  %v439_v35 = vadd.f32 %v438_v34, %v408_v3  ;;  %v412_v0 = vmul.f32 %v855_v33, %v855_v33 }
 0x109   : > { %v440_v37 = vadd.f32 %v439_v35, %v409_v17  ;;  %v372_v56 = vadd.f32 %v371_v32, %v836_v4 }
 0x10b   : > { %v373_v39 = vadd.f32 %v372_v56, %v847_v18  ;;  %v441_v60 = vadd.f32 %v440_v37, %v410_v36 }
 0x10d   : > { %v374_v40 = vadd.f32 %v373_v39, %v855_v33  ;;  %v442_v41 = vadd.f32 %v441_v60, %v411_v38 }
 0x10f   : > { %v443_v42 = vadd.f32 %v442_v41, %v412_v0  ;;  %v375_v43 = vadd.f32 %v374_v40, %v340_v47 }
 0x111   : > { %v444_v46 = vadd.f32 %v443_v42, %v413_v44  ;;  %v376_v48 = vadd.f32 %v375_v43, %v343_v7 }
 0x113   : > { %v377_v4 = vrot.slane %v376_v48, 4  ;;  %v445_v49 = vadd.f32 %v444_v46, %v414_v45 }
 0x115   : > { %v378_v50 = vadd.f32 %v377_v4, %v376_v48  ;;  %v446_v51 = vrot.slane %v445_v49, 4 }
 0x117   : > { %v379_v18 = vrot.slane %v378_v50, 2  ;;  %v447_v53 = vadd.f32 %v446_v51, %v445_v49 }
 0x119   : > { %v380_v54 = vadd.f32 %v379_v18, %v378_v50  ;;  %v448_v57 = vrot.slane %v447_v53, 2 }
 0x11b   : > { %v381_v61 = vrot.slane %v380_v54, 1  ;;  %v449_v58 = vadd.f32 %v448_v57, %v447_v53 }
 0x11d   : > { %v450_v33 = vrot.slane %v449_v58, 1  ;;  %v382_v47 = vadd.f32 %v381_v61, %v380_v54 }
 0x11f   : > { %v451_v1 = vadd.f32 %v450_v33, %v449_v58 }
 0x121   : > { %v453_v5 = vsel %vm452_vm0, %v382_v47, %v451_v1 }
 0x122   : > { %454 = vst [vmem:[%s184_s5] sm:$0x3] %v453_v5 }
 0x123 PF: > { %s14_s12 = sadd.s32 1, %s648_s12  }
 0x124   : > { %p11_p5 = scmp.ge.s32.totalorder %s14_s12, 4  }
 0x126   :  { %13 = sbr.rel (!%p11_p5) target bundleno = 1 (0x1), region = 70 }

// kernel: bottleneck_forward.9
= control target key start
LH: loop header
LB: loop body
LE: loop exit
PB: predicated region body
PF: predicated region fallthrough
CT: control target
= control target key end

     0   :  { %s717_s21 = smov 0   ;;  %s992_s0 = inlined_call_operand.vmem [shape: f32[512,128], index: 0, kind: input, shape index: {}]   ;;  %s993_s1 = inlined_call_operand.vmem [shape: f32[512,128], index: 1, kind: input, shape index: {}]   ;;  %s994_s2 = inlined_call_operand.vmem [shape: f32[1,128], index: 2, kind: input, shape index: {}]   ;;  %s995_s3 = inlined_call_operand.vmem [shape: f32[1,128], index: 3, kind: input, shape index: {}]   ;;  %s996_s4 = inlined_call_operand.vmem [shape: f32[1,128], index: 4, kind: input, shape index: {}]   ;;  %s997_s5 = inlined_call_operand.vmem [shape: f32[1,128], index: 5, kind: input, shape index: {}]   ;;  %s998_s6 = inlined_call_operand.vmem [shape: f32[512,128], index: 6, kind: output, shape index: {}]  }
   0x1 LB: > { %s649_s22 = sadd.s32 4294967295, %s680_s21   ;;  %p653_p0 = scmp.ge.s32.totalorder %s680_s21, 1  ;;  %s680_s21 = sphi %s717_s21, %s16_s21  }
   0x2   : > { %p224_p1 = scmp.lt.s32.totalorder %s680_s21, 3 }
   0x4   : > { %p225_p2 = pnand %p653_p0, %p224_p1 }
   0x5   : > { %s654_s23 = sshll.u32 (!%p225_p2), %s649_s22, 5 }
   0x6   : > { %228 = sbr.rel (%p225_p2) target bundleno = 69 (0x45), region = 44  ;;  %p260_p3 = scmp.lt.s32.totalorder (!%p225_p2), %s654_s23, 63 }
   0xb   : > { %s1000_s23 = smov (!%p260_p3, %s654_s23), 63  ;;  %v728_v0 = vld [vmem:[%s994_s2] ss:$0 sm:$0xff] }
   0xc   : > { %v733_v1 = vld [vmem:[%s996_s4] ss:$0 sm:$0xff]  ;;  %s735_s28 = sshll.u32 %s1000_s23, 3 }
   0xd   : > { %s741_s7 = scalar_lea.vmem %s992_s0, %s735_s28  ;;  %s747_s10 = scalar_lea.vmem %s993_s1, %s735_s28  ;;  %v752_v2 = vld [vmem:[%s995_s3] ss:$0 sm:$0xff] }
   0xe   : > { %v757_v3 = vld [vmem:[%s997_s5] ss:$0 sm:$0xff]  ;;  %v278_v6 = vld [vmem:[%s741_s7 + $0x8] sm:$0xff]  ;;  %v279_v11 = vld [vmem:[%s741_s7 + $0x10] sm:$0xff]  ;;  %s792_s17 = scalar_lea.vmem %s998_s6, %s735_s28 }
   0xf   : > { %v277_v4 = vld [vmem:[%s741_s7] sm:$0xff]  ;;  %v314_v9 = vmul.f32 %v728_v0, %v278_v6  ;;  %v382_v10 = vld [vmem:[%s747_s10 + $0x8] sm:$0xff]  ;;  %v383_v12 = vld [vmem:[%s747_s10 + $0x10] sm:$0xff]  ;;  %v315_v14 = vmul.f32 %v728_v0, %v279_v11 }
  0x10   : > { %v381_v5 = vld [vmem:[%s747_s10] sm:$0xff]  ;;  %v313_v7 = vmul.f32 %v728_v0, %v277_v4  ;;  %v418_v13 = vmul.f32 %v733_v1, %v382_v10  ;;  %v419_v15 = vmul.f32 %v733_v1, %v383_v12  ;;  %v280_v16 = vld [vmem:[%s741_s7 + $0x18] sm:$0xff]  ;;  %v282_v24 = vld [vmem:[%s741_s7 + $0x28] sm:$0xff] }
  0x11   : > { %v417_v8 = vmul.f32 %v733_v1, %v381_v5  ;;  %v384_v17 = vld [vmem:[%s747_s10 + $0x18] sm:$0xff]  ;;  %v281_v18 = vld [vmem:[%s741_s7 + $0x20] sm:$0xff]  ;;  %v350_v21 = vadd.f32 %v752_v2, %v314_v9  ;;  %v316_v22 = vmul.f32 %v728_v0, %v280_v16  ;;  %v351_v26 = vadd.f32 %v752_v2, %v315_v14  ;;  %v386_v29 = vld [vmem:[%s747_s10 + $0x28] sm:$0xff] }
  0x12   : > { %v349_v19 = vadd.f32 %v752_v2, %v313_v7  ;;  %v385_v23 = vld [vmem:[%s747_s10 + $0x20] sm:$0xff]  ;;  %v454_v25 = vadd.f32 %v757_v3, %v418_v13  ;;  %v455_v27 = vadd.f32 %v757_v3, %v419_v15  ;;  %v420_v28 = vmul.f32 %v733_v1, %v384_v17  ;;  %v283_v38 = vld [vmem:[%s741_s7 + $0x30] sm:$0xff]  ;;  %v284_v44 = vld [vmem:[%s741_s7 + $0x38] sm:$0xff] }
  0x13   : > { %v453_v20 = vadd.f32 %v757_v3, %v417_v8  ;;  %v352_v31 = vadd.f32 %v752_v2, %v316_v22  ;;  %v317_v32 = vmul.f32 %v728_v0, %v281_v18  ;;  %v421_v33 = vmul.f32 %v733_v1, %v385_v23  ;;  %v387_v39 = vld [vmem:[%s747_s10 + $0x30] sm:$0xff]  ;;  %v388_v45 = vld [vmem:[%s747_s10 + $0x38] sm:$0xff]  ;;  %v285_v46 = vld [vmem:[%s741_s7 + $0x40] sm:$0xff] }
  0x14   : > { %v486_v34 = vadd.f32 %v454_v25, %v350_v21  ;;  %v487_v35 = vadd.f32 %v455_v27, %v351_v26  ;;  %v456_v36 = vadd.f32 %v757_v3, %v420_v28  ;;  %v318_v37 = vmul.f32 %v728_v0, %v282_v24  ;;  %v389_v55 = vld [vmem:[%s747_s10 + $0x40] sm:$0xff]  ;;  %v286_v60 = vld [vmem:[%s741_s7 + $0x48] sm:$0xff]  ;;  %v287_v6 = vld [vmem:[%s741_s7 + $0x50] sm:$0xff] }
  0x15   : > { %v485_v30 = vadd.f32 %v453_v20, %v349_v19  ;;  %v353_v41 = vadd.f32 %v752_v2, %v317_v32  ;;  %v457_v42 = vadd.f32 %v757_v3, %v421_v33  ;;  %v422_v43 = vmul.f32 %v733_v1, %v386_v29  ;;  %v390_v61 = vld [vmem:[%s747_s10 + $0x48] sm:$0xff]  ;;  %v391_v7 = vld [vmem:[%s747_s10 + $0x50] sm:$0xff]  ;;  %v288_v12 = vld [vmem:[%s741_s7 + $0x58] sm:$0xff] }
  0x16   : > { %v518_v47 = vmax.f32 %v486_v34, 0.0  ;;  %v519_v48 = vmax.f32 %v487_v35, 0.0  ;;  %v488_v49 = vadd.f32 %v456_v36, %v352_v31  ;;  %v354_v50 = vadd.f32 %v752_v2, %v318_v37  ;;  %v392_v21 = vld [vmem:[%s747_s10 + $0x58] sm:$0xff]  ;;  %v289_v22 = vld [vmem:[%s741_s7 + $0x60] sm:$0xff]  ;;  %v290_v28 = vld [vmem:[%s741_s7 + $0x68] sm:$0xff] }
  0x17   : > { %v517_v40 = vmax.f32 %v485_v30, 0.0  ;;  %v489_v51 = vadd.f32 %v457_v42, %v353_v41  ;;  %v458_v52 = vadd.f32 %v757_v3, %v422_v43  ;;  %v319_v53 = vmul.f32 %v728_v0, %v283_v38  ;;  %v393_v27 = vld [vmem:[%s747_s10 + $0x60] sm:$0xff]  ;;  %v394_v33 = vld [vmem:[%s747_s10 + $0x68] sm:$0xff]  ;;  %v291_v38 = vld [vmem:[%s741_s7 + $0x70] sm:$0xff] }
  0x18   : > { %v423_v54 = vmul.f32 %v733_v1, %v387_v39  ;;  %550 = vst [vmem:[%s792_s17 + $0x8] sm:$0xff] %v518_v47  ;;  %v520_v56 = vmax.f32 %v488_v49, 0.0  ;;  %v320_v57 = vmul.f32 %v728_v0, %v284_v44  ;;  %v424_v58 = vmul.f32 %v733_v1, %v388_v45  ;;  %v395_v43 = vld [vmem:[%s747_s10 + $0x70] sm:$0xff]  ;;  %v292_v44 = vld [vmem:[%s741_s7 + $0x78] sm:$0xff] }
  0x19   : > { %549 = vst [vmem:[%s792_s17] sm:$0xff] %v517_v40  ;;  %v321_v59 = vmul.f32 %v728_v0, %v285_v46  ;;  %v521_v62 = vmax.f32 %v489_v51, 0.0  ;;  %v490_v63 = vadd.f32 %v458_v52, %v354_v50  ;;  %v355_v4 = vadd.f32 %v752_v2, %v319_v53  ;;  %v396_v49 = vld [vmem:[%s747_s10 + $0x78] sm:$0xff]  ;;  %v293_v50 = vld [vmem:[%s741_s7 + $0x80] sm:$0xff] }
  0x1a   : > { %551 = vst [vmem:[%s792_s17 + $0x10] sm:$0xff] %v519_v48  ;;  %v459_v5 = vadd.f32 %v757_v3, %v423_v54  ;;  %v356_v8 = vadd.f32 %v752_v2, %v320_v57  ;;  %v460_v9 = vadd.f32 %v757_v3, %v424_v58  ;;  %v425_v11 = vmul.f32 %v733_v1, %v389_v55 }
  0x1b   : > { %552 = vst [vmem:[%s792_s17 + $0x18] sm:$0xff] %v520_v56  ;;  %v357_v10 = vadd.f32 %v752_v2, %v321_v59  ;;  %v522_v13 = vmax.f32 %v490_v63, 0.0  ;;  %v322_v15 = vmul.f32 %v728_v0, %v286_v60  ;;  %v426_v16 = vmul.f32 %v733_v1, %v390_v61  ;;  %v397_v59 = vld [vmem:[%s747_s10 + $0x80] sm:$0xff] }
  0x1c   : > { %553 = vst [vmem:[%s792_s17 + $0x20] sm:$0xff] %v521_v62  ;;  %v491_v14 = vadd.f32 %v459_v5, %v355_v4  ;;  %v492_v17 = vadd.f32 %v460_v9, %v356_v8  ;;  %v461_v18 = vadd.f32 %v757_v3, %v425_v11  ;;  %v323_v19 = vmul.f32 %v728_v0, %v287_v6  ;;  %v294_v4 = vld [vmem:[%s741_s7 + $0x88] sm:$0xff]  ;;  %v399_v11 = vld [vmem:[%s747_s10 + $0x90] sm:$0xff] }
  0x1d   : > { %v427_v20 = vmul.f32 %v733_v1, %v391_v7  ;;  %554 = vst [vmem:[%s792_s17 + $0x28] sm:$0xff] %v522_v13  ;;  %v358_v24 = vadd.f32 %v752_v2, %v322_v15  ;;  %v462_v25 = vadd.f32 %v757_v3, %v426_v16  ;;  %v324_v26 = vmul.f32 %v728_v0, %v288_v12  ;;  %v398_v5 = vld [vmem:[%s747_s10 + $0x88] sm:$0xff]  ;;  %v296_v16 = vld [vmem:[%s741_s7 + $0x98] sm:$0xff] }
  0x1e   : > { %v523_v23 = vmax.f32 %v491_v14, 0.0  ;;  %v524_v29 = vmax.f32 %v492_v17, 0.0  ;;  %v493_v30 = vadd.f32 %v461_v18, %v357_v10  ;;  %v359_v31 = vadd.f32 %v752_v2, %v323_v19  ;;  %v295_v10 = vld [vmem:[%s741_s7 + $0x90] sm:$0xff] }
  0x1f   : > { %v463_v32 = vadd.f32 %v757_v3, %v427_v20  ;;  %v494_v34 = vadd.f32 %v462_v25, %v358_v24  ;;  %v360_v35 = vadd.f32 %v752_v2, %v324_v26  ;;  %v428_v36 = vmul.f32 %v733_v1, %v392_v21  ;;  %v400_v25 = vld [vmem:[%s747_s10 + $0x98] sm:$0xff]  ;;  %v297_v26 = vld [vmem:[%s741_s7 + $0xa0] sm:$0xff] }
  0x20   : > { %555 = vst [vmem:[%s792_s17 + $0x30] sm:$0xff] %v523_v23  ;;  %v325_v37 = vmul.f32 %v728_v0, %v289_v22  ;;  %v525_v39 = vmax.f32 %v493_v30, 0.0  ;;  %v429_v41 = vmul.f32 %v733_v1, %v393_v27  ;;  %v326_v42 = vmul.f32 %v728_v0, %v290_v28 }
  0x21   : > { %556 = vst [vmem:[%s792_s17 + $0x38] sm:$0xff] %v524_v29  ;;  %v495_v40 = vadd.f32 %v463_v32, %v359_v31  ;;  %v526_v45 = vmax.f32 %v494_v34, 0.0  ;;  %v464_v46 = vadd.f32 %v757_v3, %v428_v36  ;;  %v430_v48 = vmul.f32 %v733_v1, %v394_v33  ;;  %v401_v31 = vld [vmem:[%s747_s10 + $0xa0] sm:$0xff]  ;;  %v298_v32 = vld [vmem:[%s741_s7 + $0xa8] sm:$0xff] }
  0x22   : > { %v361_v47 = vadd.f32 %v752_v2, %v325_v37  ;;  %557 = vst [vmem:[%s792_s17 + $0x40] sm:$0xff] %v525_v39  ;;  %v465_v52 = vadd.f32 %v757_v3, %v429_v41  ;;  %v362_v53 = vadd.f32 %v752_v2, %v326_v42  ;;  %v327_v54 = vmul.f32 %v728_v0, %v291_v38  ;;  %v402_v37 = vld [vmem:[%s747_s10 + $0xa8] sm:$0xff]  ;;  %v299_v42 = vld [vmem:[%s741_s7 + $0xb0] sm:$0xff] }
  0x23   : > { %v527_v51 = vmax.f32 %v495_v40, 0.0  ;;  %558 = vst [vmem:[%s792_s17 + $0x48] sm:$0xff] %v526_v45  ;;  %v496_v55 = vadd.f32 %v464_v46, %v360_v35  ;;  %v466_v56 = vadd.f32 %v757_v3, %v430_v48  ;;  %v431_v57 = vmul.f32 %v733_v1, %v395_v43  ;;  %v300_v48 = vld [vmem:[%s741_s7 + $0xb8] sm:$0xff] }
  0x24   : > { %v328_v58 = vmul.f32 %v728_v0, %v292_v44  ;;  %v497_v60 = vadd.f32 %v465_v52, %v361_v47  ;;  %v363_v61 = vadd.f32 %v752_v2, %v327_v54  ;;  %v432_v62 = vmul.f32 %v733_v1, %v396_v49  ;;  %v403_v47 = vld [vmem:[%s747_s10 + $0xb0] sm:$0xff]  ;;  %v301_v54 = vld [vmem:[%s741_s7 + $0xc0] sm:$0xff] }
  0x25   : > { %559 = vst [vmem:[%s792_s17 + $0x50] sm:$0xff] %v527_v51  ;;  %v329_v63 = vmul.f32 %v728_v0, %v293_v50  ;;  %v528_v6 = vmax.f32 %v496_v55, 0.0  ;;  %v498_v7 = vadd.f32 %v466_v56, %v362_v53  ;;  %v467_v8 = vadd.f32 %v757_v3, %v431_v57  ;;  %v404_v53 = vld [vmem:[%s747_s10 + $0xb8] sm:$0xff] }
  0x26   : > { %v364_v9 = vadd.f32 %v752_v2, %v328_v58  ;;  %v529_v12 = vmax.f32 %v497_v60, 0.0  ;;  %v468_v13 = vadd.f32 %v757_v3, %v432_v62  ;;  %v433_v15 = vmul.f32 %v733_v1, %v397_v59 }
  0x27   : > { %v365_v14 = vadd.f32 %v752_v2, %v329_v63  ;;  %560 = vst [vmem:[%s792_s17 + $0x58] sm:$0xff] %v528_v6  ;;  %v530_v17 = vmax.f32 %v498_v7, 0.0  ;;  %v499_v18 = vadd.f32 %v467_v8, %v363_v61  ;;  %v330_v19 = vmul.f32 %v728_v0, %v294_v4  ;;  %v405_v63 = vld [vmem:[%s747_s10 + $0xc0] sm:$0xff]  ;;  %v302_v8 = vld [vmem:[%s741_s7 + $0xc8] sm:$0xff] }
  0x28   : > { %v434_v20 = vmul.f32 %v733_v1, %v398_v5  ;;  %561 = vst [vmem:[%s792_s17 + $0x60] sm:$0xff] %v529_v12  ;;  %v500_v21 = vadd.f32 %v468_v13, %v364_v9  ;;  %v469_v22 = vadd.f32 %v757_v3, %v433_v15  ;;  %v331_v23 = vmul.f32 %v728_v0, %v295_v10  ;;  %v406_v9 = vld [vmem:[%s747_s10 + $0xc8] sm:$0xff]  ;;  %v407_v15 = vld [vmem:[%s747_s10 + $0xd0] sm:$0xff] }
  0x29   : > { %v435_v24 = vmul.f32 %v733_v1, %v399_v11  ;;  %562 = vst [vmem:[%s792_s17 + $0x68] sm:$0xff] %v530_v17  ;;  %v531_v27 = vmax.f32 %v499_v18, 0.0  ;;  %v366_v28 = vadd.f32 %v752_v2, %v330_v19  ;;  %v332_v30 = vmul.f32 %v728_v0, %v296_v16 }
  0x2a   : > { %v470_v29 = vadd.f32 %v757_v3, %v434_v20  ;;  %v532_v33 = vmax.f32 %v500_v21, 0.0  ;;  %v501_v34 = vadd.f32 %v469_v22, %v365_v14  ;;  %v367_v35 = vadd.f32 %v752_v2, %v331_v23  ;;  %v303_v14 = vld [vmem:[%s741_s7 + $0xd0] sm:$0xff]  ;;  %v304_v20 = vld [vmem:[%s741_s7 + $0xd8] sm:$0xff] }
  0x2b   : > { %v471_v36 = vadd.f32 %v757_v3, %v435_v24  ;;  %563 = vst [vmem:[%s792_s17 + $0x70] sm:$0xff] %v531_v27  ;;  %v368_v39 = vadd.f32 %v752_v2, %v332_v30  ;;  %v436_v40 = vmul.f32 %v733_v1, %v400_v25  ;;  %v333_v41 = vmul.f32 %v728_v0, %v297_v26  ;;  %v305_v30 = vld [vmem:[%s741_s7 + $0xe0] sm:$0xff] }
  0x2c   : > { %v502_v38 = vadd.f32 %v470_v29, %v366_v28  ;;  %564 = vst [vmem:[%s792_s17 + $0x78] sm:$0xff] %v532_v33  ;;  %v533_v43 = vmax.f32 %v501_v34, 0.0  ;;  %v437_v45 = vmul.f32 %v733_v1, %v401_v31  ;;  %v334_v46 = vmul.f32 %v728_v0, %v298_v32  ;;  %v408_v29 = vld [vmem:[%s747_s10 + $0xd8] sm:$0xff] }
  0x2d   : > { %v503_v44 = vadd.f32 %v471_v36, %v367_v35  ;;  %v472_v50 = vadd.f32 %v757_v3, %v436_v40  ;;  %v369_v51 = vadd.f32 %v752_v2, %v333_v41  ;;  %v438_v52 = vmul.f32 %v733_v1, %v402_v37  ;;  %v409_v35 = vld [vmem:[%s747_s10 + $0xe0] sm:$0xff]  ;;  %v306_v36 = vld [vmem:[%s741_s7 + $0xe8] sm:$0xff] }
  0x2e   : > { %v534_v49 = vmax.f32 %v502_v38, 0.0  ;;  %565 = vst [vmem:[%s792_s17 + $0x80] sm:$0xff] %v533_v43  ;;  %v473_v56 = vadd.f32 %v757_v3, %v437_v45  ;;  %v370_v57 = vadd.f32 %v752_v2, %v334_v46  ;;  %v335_v58 = vmul.f32 %v728_v0, %v299_v42  ;;  %v410_v41 = vld [vmem:[%s747_s10 + $0xe8] sm:$0xff]  ;;  %v307_v46 = vld [vmem:[%s741_s7 + $0xf0] sm:$0xff] }
  0x2f   : > { %v535_v55 = vmax.f32 %v503_v44, 0.0  ;;  %v504_v59 = vadd.f32 %v472_v50, %v368_v39  ;;  %v474_v60 = vadd.f32 %v757_v3, %v438_v52  ;;  %v439_v61 = vmul.f32 %v733_v1, %v403_v47  ;;  %v308_v52 = vld [vmem:[%s741_s7 + $0xf8] sm:$0xff] }
  0x30   : > { %566 = vst [vmem:[%s792_s17 + $0x88] sm:$0xff] %v534_v49  ;;  %v336_v62 = vmul.f32 %v728_v0, %v300_v48  ;;  %v505_v4 = vadd.f32 %v473_v56, %v369_v51  ;;  %v371_v5 = vadd.f32 %v752_v2, %v335_v58  ;;  %v440_v6 = vmul.f32 %v733_v1, %v404_v53  ;;  %v411_v51 = vld [vmem:[%s747_s10 + $0xf0] sm:$0xff] }
  0x31   : > { %567 = vst [vmem:[%s792_s17 + $0x90] sm:$0xff] %v535_v55  ;;  %v337_v7 = vmul.f32 %v728_v0, %v301_v54  ;;  %v536_v10 = vmax.f32 %v504_v59, 0.0  ;;  %v506_v11 = vadd.f32 %v474_v60, %v370_v57  ;;  %v475_v12 = vadd.f32 %v757_v3, %v439_v61  ;;  %v412_v57 = vld [vmem:[%s747_s10 + $0xf8] sm:$0xff] }
  0x32   : > { %v372_v13 = vadd.f32 %v752_v2, %v336_v62  ;;  %v537_v16 = vmax.f32 %v505_v4, 0.0  ;;  %v476_v17 = vadd.f32 %v757_v3, %v440_v6  ;;  %v441_v19 = vmul.f32 %v733_v1, %v405_v63 }
  0x33   : > { %v373_v18 = vadd.f32 %v752_v2, %v337_v7  ;;  %568 = vst [vmem:[%s792_s17 + $0x98] sm:$0xff] %v536_v10  ;;  %v538_v21 = vmax.f32 %v506_v11, 0.0  ;;  %v507_v22 = vadd.f32 %v475_v12, %v371_v5  ;;  %v338_v23 = vmul.f32 %v728_v0, %v302_v8 }
  0x34   : > { %v442_v24 = vmul.f32 %v733_v1, %v406_v9  ;;  %569 = vst [vmem:[%s792_s17 + $0xa0] sm:$0xff] %v537_v16  ;;  %v508_v25 = vadd.f32 %v476_v17, %v372_v13  ;;  %v477_v26 = vadd.f32 %v757_v3, %v441_v19  ;;  %v339_v27 = vmul.f32 %v728_v0, %v303_v14 }
  0x35   : > { %v443_v28 = vmul.f32 %v733_v1, %v407_v15  ;;  %570 = vst [vmem:[%s792_s17 + $0xa8] sm:$0xff] %v538_v21  ;;  %v539_v31 = vmax.f32 %v507_v22, 0.0  ;;  %v374_v32 = vadd.f32 %v752_v2, %v338_v23  ;;  %v340_v34 = vmul.f32 %v728_v0, %v304_v20 }
  0x36   : > { %v478_v33 = vadd.f32 %v757_v3, %v442_v24  ;;  %v540_v37 = vmax.f32 %v508_v25, 0.0  ;;  %v509_v38 = vadd.f32 %v477_v26, %v373_v18  ;;  %v375_v39 = vadd.f32 %v752_v2, %v339_v27 }
  0x37   : > { %v479_v40 = vadd.f32 %v757_v3, %v443_v28  ;;  %571 = vst [vmem:[%s792_s17 + $0xb0] sm:$0xff] %v539_v31  ;;  %v376_v43 = vadd.f32 %v752_v2, %v340_v34  ;;  %v444_v44 = vmul.f32 %v733_v1, %v408_v29  ;;  %v341_v45 = vmul.f32 %v728_v0, %v305_v30 }
  0x38   : > { %v510_v42 = vadd.f32 %v478_v33, %v374_v32  ;;  %572 = vst [vmem:[%s792_s17 + $0xb8] sm:$0xff] %v540_v37  ;;  %v541_v47 = vmax.f32 %v509_v38, 0.0  ;;  %v445_v49 = vmul.f32 %v733_v1, %v409_v35  ;;  %v342_v50 = vmul.f32 %v728_v0, %v306_v36 }
  0x39   : > { %v511_v48 = vadd.f32 %v479_v40, %v375_v39  ;;  %v480_v54 = vadd.f32 %v757_v3, %v444_v44  ;;  %v377_v55 = vadd.f32 %v752_v2, %v341_v45  ;;  %v446_v56 = vmul.f32 %v733_v1, %v410_v41 }
  0x3a   : > { %v542_v53 = vmax.f32 %v510_v42, 0.0  ;;  %573 = vst [vmem:[%s792_s17 + $0xc0] sm:$0xff] %v541_v47  ;;  %v481_v59 = vadd.f32 %v757_v3, %v445_v49  ;;  %v378_v60 = vadd.f32 %v752_v2, %v342_v50  ;;  %v343_v61 = vmul.f32 %v728_v0, %v307_v46 }
  0x3b   : > { %v543_v58 = vmax.f32 %v511_v48, 0.0  ;;  %v512_v62 = vadd.f32 %v480_v54, %v376_v43  ;;  %v482_v63 = vadd.f32 %v757_v3, %v446_v56  ;;  %v447_v4 = vmul.f32 %v733_v1, %v411_v51 }
  0x3c   : > { %574 = vst [vmem:[%s792_s17 + $0xc8] sm:$0xff] %v542_v53  ;;  %v344_v5 = vmul.f32 %v728_v0, %v308_v52  ;;  %v513_v6 = vadd.f32 %v481_v59, %v377_v55  ;;  %v379_v7 = vadd.f32 %v752_v2, %v343_v61  ;;  %v448_v8 = vmul.f32 %v733_v1, %v412_v57 }
  0x3d   : > { %575 = vst [vmem:[%s792_s17 + $0xd0] sm:$0xff] %v543_v58  ;;  %v544_v9 = vmax.f32 %v512_v62, 0.0  ;;  %v514_v10 = vadd.f32 %v482_v63, %v378_v60  ;;  %v483_v11 = vadd.f32 %v757_v3, %v447_v4 }
  0x3e   : > { %v380_v12 = vadd.f32 %v752_v2, %v344_v5  ;;  %v545_v13 = vmax.f32 %v513_v6, 0.0  ;;  %v484_v14 = vadd.f32 %v757_v3, %v448_v8 }
  0x3f   : > { %576 = vst [vmem:[%s792_s17 + $0xd8] sm:$0xff] %v544_v9  ;;  %v546_v0 = vmax.f32 %v514_v10, 0.0  ;;  %v515_v15 = vadd.f32 %v483_v11, %v379_v7 }
  0x40   : > { %577 = vst [vmem:[%s792_s17 + $0xe0] sm:$0xff] %v545_v13  ;;  %v516_v16 = vadd.f32 %v484_v14, %v380_v12 }
  0x41   : > { %578 = vst [vmem:[%s792_s17 + $0xe8] sm:$0xff] %v546_v0  ;;  %v547_v17 = vmax.f32 %v515_v15, 0.0 }
  0x42   : > { %v548_v18 = vmax.f32 %v516_v16, 0.0 }
  0x43   : > { %579 = vst [vmem:[%s792_s17 + $0xf0] sm:$0xff] %v547_v17 }
  0x44   : > { %580 = vst [vmem:[%s792_s17 + $0xf8] sm:$0xff] %v548_v18 }
  0x45 PF: > { %s16_s21 = sadd.s32 1, %s680_s21  }
  0x46   : > { %p13_p4 = scmp.ge.s32.totalorder %s16_s21, 4  }
  0x48   :  { %15 = sbr.rel (!%p13_p4) target bundleno = 1 (0x1), region = 77 }

// kernel: bottleneck_forward.7
= control target key start
LH: loop header
LB: loop body
LE: loop exit
PB: predicated region body
PF: predicated region fallthrough
CT: control target
= control target key end

     0   :  { %s840_s18 = smov 0   ;;  %s1170_s0 = inlined_call_operand.vmem [shape: f32[512,128], index: 0, kind: input, shape index: {}]   ;;  %s1171_s1 = inlined_call_operand.vmem [shape: f32[1,128], index: 1, kind: input, shape index: {}]   ;;  %s1172_s2 = inlined_call_operand.vmem [shape: f32[1,128], index: 2, kind: input, shape index: {}]   ;;  %s1173_s3 = inlined_call_operand.vmem [shape: f32[128,128], index: 3, kind: input, shape index: {}]   ;;  %s1174_s4 = inlined_call_operand.vmem [shape: f32[512,128], index: 4, kind: output, shape index: {0}]   ;;  %s1175_s5 = inlined_call_operand.vmem [shape: f32[2,2,128], index: 5, kind: output, shape index: {1}]  }
   0x1 LB: > { %s846_s19 = sadd.s32 4294967295, %s808_s18   ;;  %p736_p0 = scmp.ge.s32.totalorder %s808_s18, 1  ;;  %s808_s18 = sphi %s840_s18, %s16_s18  }
   0x2   : > { %p191_p1 = scmp.lt.s32.totalorder %s808_s18, 3 }
   0x4   : > { %p192_p2 = pnand %p736_p0, %p191_p1 }
   0x5   : > { %s737_s24 = sshll.u32 (!%p192_p2), %s846_s19, 5  ;;  %p235_p4 = scmp.lt.s32.totalorder (!%p192_p2), %s846_s19, 1 }
   0x6   : > { %195 = sbr.rel (%p192_p2) target bundleno = 291 (0x123), region = 36  ;;  %p224_p3 = scmp.lt.s32.totalorder (!%p192_p2), %s737_s24, 63 }
   0xb   : > { %v390_v0 = vld [vmem:[%s1173_s3 + $0x78] sm:$0xff]  ;;  %v389_v1 = vld [vmem:[%s1173_s3 + $0x70] sm:$0xff]  ;;  %v388_v2 = vld [vmem:[%s1173_s3 + $0x68] sm:$0xff]  ;;  %s1177_s24 = smov (!%p224_p3, %s737_s24), 63  ;;  %s1179_s19 = smov (!%p235_p4, %s846_s19), 1  ;;  %vm610_vm0 = vcmask 1040384  }
   0xc   : > { %391 = vmatpush.msra.mxu0 %v390_v0  ;;  %744 = vmatpush.msra.mxu1 %v390_v0  ;;  %v387_v3 = vld [vmem:[%s1173_s3 + $0x60] sm:$0xff]  ;;  %v386_v4 = vld [vmem:[%s1173_s3 + $0x58] sm:$0xff]  ;;  %v385_v5 = vld [vmem:[%s1173_s3 + $0x50] sm:$0xff]  ;;  %s738_s10 = sshll.u32 %s1177_s24, 3  ;;  %s741_s24 = sshll.u32 %s1179_s19, 1 }
   0xd   : > { %745 = vmatpush.msra.mxu2 %v390_v0  ;;  %746 = vmatpush.msra.mxu3 %v390_v0  ;;  %v384_v6 = vld [vmem:[%s1173_s3 + $0x48] sm:$0xff]  ;;  %v383_v7 = vld [vmem:[%s1173_s3 + $0x40] sm:$0xff]  ;;  %v382_v8 = vld [vmem:[%s1173_s3 + $0x38] sm:$0xff]  ;;  %s886_s17 = scalar_lea.vmem %s1170_s0, %s738_s10  ;;  %s238_s21 = scalar_lea.vmem %s1175_s5, %s741_s24 }
   0xe   : > { %392 = vmatpush.msra.mxu0 %v389_v1  ;;  %747 = vmatpush.msra.mxu1 %v389_v1  ;;  %v381_v9 = vld [vmem:[%s1173_s3 + $0x30] sm:$0xff]  ;;  %v894_v10 = vld [vmem:[%s1171_s1] ss:$0 sm:$0xff]  ;;  %v380_v13 = vld [vmem:[%s1173_s3 + $0x28] sm:$0xff] }
   0xf   : > { %748 = vmatpush.msra.mxu2 %v389_v1  ;;  %749 = vmatpush.msra.mxu3 %v389_v1  ;;  %v239_v11 = vld [vmem:[%s886_s17] sm:$0xff]  ;;  %v378_v19 = vld [vmem:[%s1173_s3 + $0x18] sm:$0xff]  ;;  %v377_v21 = vld [vmem:[%s1173_s3 + $0x10] sm:$0xff] }
  0x10   : > { %393 = vmatpush.msra.mxu0 %v388_v2  ;;  %750 = vmatpush.msra.mxu1 %v388_v2  ;;  %v247_v12 = vld [vmem:[%s886_s17 + $0x40] sm:$0xff]  ;;  %v275_v16 = vmul.f32 %v894_v10, %v239_v11  ;;  %v240_v24 = vld [vmem:[%s886_s17 + $0x8] sm:$0xff]  ;;  %v241_v37 = vld [vmem:[%s886_s17 + $0x10] sm:$0xff] }
  0x11   : > { %751 = vmatpush.msra.mxu2 %v388_v2  ;;  %752 = vmatpush.msra.mxu3 %v388_v2  ;;  %v255_v14 = vld [vmem:[%s886_s17 + $0x80] sm:$0xff]  ;;  %v283_v18 = vmul.f32 %v894_v10, %v247_v12  ;;  %v248_v25 = vld [vmem:[%s886_s17 + $0x48] sm:$0xff]  ;;  %v276_v31 = vmul.f32 %v894_v10, %v240_v24  ;;  %v249_v39 = vld [vmem:[%s886_s17 + $0x50] sm:$0xff]  ;;  %v277_v41 = vmul.f32 %v894_v10, %v241_v37 }
  0x12   : > { %394 = vmatpush.msra.mxu0 %v387_v3  ;;  %753 = vmatpush.msra.mxu1 %v387_v3  ;;  %v379_v15 = vld [vmem:[%s1173_s3 + $0x20] sm:$0xff]  ;;  %v291_v20 = vmul.f32 %v894_v10, %v255_v14  ;;  %v376_v26 = vld [vmem:[%s1173_s3 + $0x8] sm:$0xff]  ;;  %v284_v33 = vmul.f32 %v894_v10, %v248_v25  ;;  %v257_v42 = vld [vmem:[%s886_s17 + $0x90] sm:$0xff]  ;;  %v285_v46 = vmul.f32 %v894_v10, %v249_v39 }
  0x13   : > { %754 = vmatpush.msra.mxu2 %v387_v3  ;;  %755 = vmatpush.msra.mxu3 %v387_v3  ;;  %v909_v17 = vld [vmem:[%s1172_s2] ss:$0 sm:$0xff]  ;;  %v256_v28 = vld [vmem:[%s886_s17 + $0x88] sm:$0xff]  ;;  %v293_v49 = vmul.f32 %v894_v10, %v257_v42  ;;  %v242_v52 = vld [vmem:[%s886_s17 + $0x18] sm:$0xff] }
  0x14   : > { %395 = vmatpush.msra.mxu0 %v386_v4  ;;  %756 = vmatpush.msra.mxu1 %v386_v4  ;;  %v311_v22 = vadd.f32 %v909_v17, %v275_v16  ;;  %v319_v23 = vadd.f32 %v909_v17, %v283_v18  ;;  %v327_v27 = vadd.f32 %v909_v17, %v291_v20  ;;  %v375_v29 = vld [vmem:[%s1173_s3] sm:$0xff]  ;;  %v250_v55 = vld [vmem:[%s886_s17 + $0x58] sm:$0xff]  ;;  %v264_v59 = vld [vmem:[%s886_s17 + $0xc8] sm:$0xff] }
  0x15   : > { %757 = vmatpush.msra.mxu2 %v386_v4  ;;  %758 = vmatpush.msra.mxu3 %v386_v4  ;;  %v292_v35 = vmul.f32 %v894_v10, %v256_v28  ;;  %v312_v36 = vadd.f32 %v909_v17, %v276_v31  ;;  %v320_v38 = vadd.f32 %v909_v17, %v284_v33  ;;  %v263_v43 = vld [vmem:[%s886_s17 + $0xc0] sm:$0xff]  ;;  %v258_v58 = vld [vmem:[%s886_s17 + $0x98] sm:$0xff]  ;;  %v265_v12 = vld [vmem:[%s886_s17 + $0xd0] sm:$0xff] }
  0x16   : > { %396 = vmatpush.msra.mxu0 %v385_v5  ;;  %759 = vmatpush.msra.mxu1 %v385_v5  ;;  %v343_v30 = vmax.f32 %v311_v22, 0.0  ;;  %v351_v32 = vmax.f32 %v319_v23, 0.0  ;;  %v359_v34 = vmax.f32 %v327_v27, 0.0  ;;  %v299_v47 = vmul.f32 %v894_v10, %v263_v43  ;;  %v259_v11 = vld [vmem:[%s886_s17 + $0xa0] sm:$0xff]  ;;  %v266_v24 = vld [vmem:[%s886_s17 + $0xd8] sm:$0xff]  ;;  %v244_v25 = vld [vmem:[%s886_s17 + $0x28] sm:$0xff] }
  0x17   : > { %760 = vmatpush.msra.mxu2 %v385_v5  ;;  %761 = vmatpush.msra.mxu3 %v385_v5  ;;  %v328_v40 = vadd.f32 %v909_v17, %v292_v35  ;;  %v344_v44 = vmax.f32 %v312_v36, 0.0  ;;  %v352_v45 = vmax.f32 %v320_v38, 0.0  ;;  %v313_v51 = vadd.f32 %v909_v17, %v277_v41  ;;  %v267_v31 = vld [vmem:[%s886_s17 + $0xe0] sm:$0xff]  ;;  %v270_v36 = vld [vmem:[%s886_s17 + $0xf8] sm:$0xff] }
  0x18   : > { %397 = vmatpush.msra.mxu0 %v384_v6  ;;  %762 = vmatpush.msra.mxu1 %v384_v6  ;;  %v335_v50 = vadd.f32 %v909_v17, %v299_v47  ;;  %v321_v53 = vadd.f32 %v909_v17, %v285_v46  ;;  %v329_v56 = vadd.f32 %v909_v17, %v293_v49  ;;  %v261_v49 = vld [vmem:[%s886_s17 + $0xb0] sm:$0xff] }
  0x19   : > { %763 = vmatpush.msra.mxu2 %v384_v6  ;;  %764 = vmatpush.msra.mxu3 %v384_v6  ;;  %v360_v48 = vmax.f32 %v328_v40, 0.0  ;;  %v278_v57 = vmul.f32 %v894_v10, %v242_v52  ;;  %v345_v60 = vmax.f32 %v313_v51, 0.0  ;;  %v286_v62 = vmul.f32 %v894_v10, %v250_v55  ;;  %v243_v6 = vld [vmem:[%s886_s17 + $0x20] sm:$0xff] }
  0x1a   : > { %398 = vmatpush.msra.mxu0 %v383_v7  ;;  %765 = vmatpush.msra.mxu1 %v383_v7  ;;  %v367_v54 = vmax.f32 %v335_v50, 0.0  ;;  %v353_v61 = vmax.f32 %v321_v53, 0.0  ;;  %v300_v63 = vmul.f32 %v894_v10, %v264_v59  ;;  %v361_v0 = vmax.f32 %v329_v56, 0.0  ;;  %v268_v50 = vld [vmem:[%s886_s17 + $0xe8] sm:$0xff] }
  0x1b   : > { %766 = vmatpush.msra.mxu2 %v383_v7  ;;  %767 = vmatpush.msra.mxu3 %v383_v7  ;;  %v294_v1 = vmul.f32 %v894_v10, %v258_v58  ;;  %v314_v3 = vadd.f32 %v909_v17, %v278_v57  ;;  %v322_v4 = vadd.f32 %v909_v17, %v286_v62  ;;  %v251_v7 = vld [vmem:[%s886_s17 + $0x60] sm:$0xff]  ;;  %v254_v62 = vld [vmem:[%s886_s17 + $0x78] sm:$0xff] }
  0x1c   : > { %399 = vmatpush.msra.mxu0 %v382_v8  ;;  %768 = vmatpush.msra.mxu1 %v382_v8  ;;  %v336_v2 = vadd.f32 %v909_v17, %v300_v63  ;;  %v301_v16 = vmul.f32 %v894_v10, %v265_v12  ;;  %v302_v27 = vmul.f32 %v894_v10, %v266_v24 }
  0x1d   : > { %769 = vmatpush.msra.mxu2 %v382_v8  ;;  %770 = vmatpush.msra.mxu3 %v382_v8  ;;  %v330_v8 = vadd.f32 %v909_v17, %v294_v1  ;;  %v354_v14 = vmax.f32 %v322_v4, 0.0  ;;  %v280_v33 = vmul.f32 %v894_v10, %v244_v25  ;;  %v303_v40 = vmul.f32 %v894_v10, %v267_v31  ;;  %v262_v1 = vld [vmem:[%s886_s17 + $0xb8] sm:$0xff] }
  0x1e   : > { %400 = vmatpush.msra.mxu0 %v381_v9  ;;  %771 = vmatpush.msra.mxu1 %v381_v9  ;;  %v368_v5 = vmax.f32 %v336_v2, 0.0  ;;  %v337_v20 = vadd.f32 %v909_v17, %v301_v16  ;;  %v306_v41 = vmul.f32 %v894_v10, %v270_v36  ;;  %v297_v56 = vmul.f32 %v894_v10, %v261_v49  ;;  %v269_v2 = vld [vmem:[%s886_s17 + $0xf0] sm:$0xff] }
  0x1f   : > { %772 = vmatpush.msra.mxu2 %v381_v9  ;;  %773 = vmatpush.msra.mxu3 %v381_v9  ;;  %v346_v9 = vmax.f32 %v314_v3, 0.0  ;;  %v362_v18 = vmax.f32 %v330_v8, 0.0  ;;  %v316_v42 = vadd.f32 %v909_v17, %v280_v33  ;;  %v304_v58 = vmul.f32 %v894_v10, %v268_v50 }
  0x20   : > { %401 = vmatpush.msra.mxu0 %v380_v13  ;;  %774 = vmatpush.msra.mxu1 %v380_v13  ;;  %v369_v23 = vmax.f32 %v337_v20, 0.0  ;;  %v342_v46 = vadd.f32 %v909_v17, %v306_v41  ;;  %v333_v63 = vadd.f32 %v909_v17, %v297_v56  ;;  %v298_v8 = vmul.f32 %v894_v10, %v262_v1 }
  0x21   : > { %775 = vmatpush.msra.mxu2 %v380_v13  ;;  %776 = vmatpush.msra.mxu3 %v380_v13  ;;  %v279_v13 = vmul.f32 %v894_v10, %v243_v6  ;;  %v348_v51 = vmax.f32 %v316_v42, 0.0  ;;  %v290_v6 = vmul.f32 %v894_v10, %v254_v62 }
  0x22   : > { %402 = vmatpush.msra.mxu0 %v379_v15  ;;  %777 = vmatpush.msra.mxu1 %v379_v15 }
  0x23   : > { %778 = vmatpush.msra.mxu2 %v379_v15  ;;  %779 = vmatpush.msra.mxu3 %v379_v15  ;;  %v287_v15 = vmul.f32 %v894_v10, %v251_v7  ;;  %v365_v7 = vmax.f32 %v333_v63, 0.0 }
  0x24   : > { %403 = vmatpush.msra.mxu0 %v378_v19  ;;  %780 = vmatpush.msra.mxu1 %v378_v19 }
  0x25   : > { %781 = vmatpush.msra.mxu2 %v378_v19  ;;  %782 = vmatpush.msra.mxu3 %v378_v19  ;;  %v295_v19 = vmul.f32 %v894_v10, %v259_v11  ;;  %v323_v22 = vadd.f32 %v909_v17, %v287_v15  ;;  %v305_v11 = vmul.f32 %v894_v10, %v269_v2 }
  0x26   : > { %404 = vmatpush.msra.mxu0 %v377_v21  ;;  %783 = vmatpush.msra.mxu1 %v377_v21 }
  0x27   : > { %784 = vmatpush.msra.mxu2 %v377_v21  ;;  %785 = vmatpush.msra.mxu3 %v377_v21  ;;  %v315_v21 = vadd.f32 %v909_v17, %v279_v13  ;;  %v331_v28 = vadd.f32 %v909_v17, %v295_v19  ;;  %v326_v13 = vadd.f32 %v909_v17, %v290_v6 }
  0x28   : > { %405 = vmatpush.msra.mxu0 %v376_v26  ;;  %786 = vmatpush.msra.mxu1 %v376_v26  ;;  %v341_v15 = vadd.f32 %v909_v17, %v305_v11 }
  0x29   : > { %787 = vmatpush.msra.mxu2 %v376_v26  ;;  %788 = vmatpush.msra.mxu3 %v376_v26  ;;  %v252_v26 = vld [vmem:[%s886_s17 + $0x68] sm:$0xff]  ;;  %v363_v37 = vmax.f32 %v331_v28, 0.0 }
  0x2a   : > { %406 = vmatpush.msra.mxu0 %v375_v29  ;;  %789 = vmatpush.msra.mxu1 %v375_v29  ;;  %v288_v35 = vmul.f32 %v894_v10, %v252_v26  ;;  %v373_v20 = vmax.f32 %v341_v15, 0.0 }
  0x2b   : > { %407 = vmatmul.f32.vlgmr.msra.gmra.mxu0 %v343_v30  ;;  %431 = vmatmul.f32.vlgmr.msra.gmra.mxu1 %v351_v32  ;;  %v338_v30 = vadd.f32 %v909_v17, %v302_v27  ;;  %v347_v32 = vmax.f32 %v315_v21, 0.0 }
  0x2c   : > { %790 = vmatpush.msra.mxu2 %v375_v29  ;;  %791 = vmatpush.msra.mxu3 %v375_v29  ;;  %v260_v29 = vld [vmem:[%s886_s17 + $0xa8] sm:$0xff]  ;;  %v324_v43 = vadd.f32 %v909_v17, %v288_v35 }
  0x2d   : > { %455 = vmatmul.f32.vlgmr.msra.gmra.mxu2 %v359_v34  ;;  %479 = vmatmul.f32.vlgmr.msra.gmra.mxu3 %v367_v54  ;;  %v355_v34 = vmax.f32 %v323_v22, 0.0  ;;  %v296_v38 = vmul.f32 %v894_v10, %v260_v29  ;;  %v370_v39 = vmax.f32 %v338_v30, 0.0 }
  0x2e   : > { %v356_v53 = vmax.f32 %v324_v43, 0.0 }
  0x2f   : > { %v332_v47 = vadd.f32 %v909_v17, %v296_v38 }
  0x31   : > { %v364_v55 = vmax.f32 %v332_v47, 0.0 }
  0x33   : > { %410 = vmatmul.f32.gmra.mxu0 %v344_v44  ;;  %434 = vmatmul.f32.gmra.mxu1 %v352_v45  ;;  %v245_v44 = vld [vmem:[%s886_s17 + $0x30] sm:$0xff] }
  0x34   : > { %v253_v45 = vld [vmem:[%s886_s17 + $0x70] sm:$0xff]  ;;  %v281_v52 = vmul.f32 %v894_v10, %v245_v44 }
  0x35   : > { %458 = vmatmul.f32.gmra.mxu2 %v360_v48  ;;  %482 = vmatmul.f32.gmra.mxu3 %v368_v5  ;;  %v339_v48 = vadd.f32 %v909_v17, %v303_v40  ;;  %v289_v54 = vmul.f32 %v894_v10, %v253_v45 }
  0x36   : > { %v317_v59 = vadd.f32 %v909_v17, %v281_v52 }
  0x37   : > { %v371_v57 = vmax.f32 %v339_v48, 0.0 }
  0x38   : > { %v349_v3 = vmax.f32 %v317_v59, 0.0 }
  0x3b   : > { %413 = vmatmul.f32.gmra.mxu0 %v345_v60  ;;  %437 = vmatmul.f32.gmra.mxu1 %v353_v61  ;;  %v325_v60 = vadd.f32 %v909_v17, %v289_v54  ;;  %v246_v61 = vld [vmem:[%s886_s17 + $0x38] sm:$0xff]  ;;  %s1020_s17 = scalar_lea.vmem %s1174_s4, %s738_s10 }
  0x3c   : > { %v282_v4 = vmul.f32 %v894_v10, %v246_v61  ;;  %v374_v10 = vmax.f32 %v342_v46, 0.0 }
  0x3d   : > { %461 = vmatmul.f32.gmra.mxu2 %v361_v0  ;;  %485 = vmatmul.f32.gmra.mxu3 %v369_v23  ;;  %v340_v0 = vadd.f32 %v909_v17, %v304_v58  ;;  %v357_v5 = vmax.f32 %v325_v60, 0.0 }
  0x3e   : > { %v318_v12 = vadd.f32 %v909_v17, %v282_v4 }
  0x40   : > { %v350_v16 = vmax.f32 %v318_v12, 0.0 }
  0x43   : > { %416 = vmatmul.f32.gmra.mxu0 %v346_v9  ;;  %440 = vmatmul.f32.gmra.mxu1 %v354_v14  ;;  %v372_v9 = vmax.f32 %v340_v0, 0.0  ;;  %v334_v14 = vadd.f32 %v909_v17, %v298_v8 }
  0x45   : > { %464 = vmatmul.f32.gmra.mxu2 %v362_v18  ;;  %488 = vmatmul.f32.gmra.mxu3 %v370_v39  ;;  %v358_v18 = vmax.f32 %v326_v13, 0.0  ;;  %v366_v19 = vmax.f32 %v334_v14, 0.0 }
  0x4b   : > { %419 = vmatmul.f32.gmra.mxu0 %v347_v32  ;;  %443 = vmatmul.f32.gmra.mxu1 %v355_v34 }
  0x4d   : > { %467 = vmatmul.f32.gmra.mxu2 %v363_v37  ;;  %491 = vmatmul.f32.gmra.mxu3 %v371_v57 }
  0x53   : > { %422 = vmatmul.f32.gmra.mxu0 %v348_v51  ;;  %446 = vmatmul.f32.gmra.mxu1 %v356_v53 }
  0x55   : > { %470 = vmatmul.f32.gmra.mxu2 %v364_v55  ;;  %494 = vmatmul.f32.gmra.mxu3 %v372_v9 }
  0x5b   : > { %425 = vmatmul.f32.gmra.mxu0 %v349_v3  ;;  %449 = vmatmul.f32.gmra.mxu1 %v357_v5 }
  0x5d   : > { %473 = vmatmul.f32.gmra.mxu2 %v365_v7  ;;  %497 = vmatmul.f32.gmra.mxu3 %v373_v20 }
  0x63   : > { %428 = vmatmul.f32.gmra.mxu0 %v350_v16  ;;  %452 = vmatmul.f32.gmra.mxu1 %v358_v18 }
  0x65   : > { %476 = vmatmul.f32.gmra.mxu2 %v366_v19  ;;  %500 = vmatmul.f32.gmra.mxu3 %v374_v10 }
  0xa8   : > { %v408_v17 = vpop.f32.mrf.mxu0  ;;  %v1022_v21 = vpop.f32.mrf.mxu1 }
  0xa9   : > { %613 = vst [vmem:[%s1020_s17] sm:$0xff] %v408_v17  ;;  %v541_v42 = vmul.f32 %v408_v17, %v408_v17  ;;  %v549_v6 = vmul.f32 %v1022_v21, %v1022_v21 }
  0xaa   : > { %621 = vst [vmem:[%s1020_s17 + $0x40] sm:$0xff] %v1022_v21 }
  0xb0   : > { %v411_v22 = vpop.f32.mrf.mxu0  ;;  %v1027_v23 = vpop.f32.mrf.mxu1 }
  0xb1   : > { %614 = vst [vmem:[%s1020_s17 + $0x8] sm:$0xff] %v411_v22  ;;  %v1030_v24 = vpop.f32.mrf.mxu2  ;;  %v1041_v28 = vpop.f32.mrf.mxu3  ;;  %v542_v41 = vmul.f32 %v411_v22, %v411_v22  ;;  %v504_v43 = vadd.f32 %v411_v22, %v408_v17  ;;  %v550_v9 = vmul.f32 %v1027_v23, %v1027_v23 }
  0xb2   : > { %622 = vst [vmem:[%s1020_s17 + $0x48] sm:$0xff] %v1027_v23 }
  0xb3   : > { %629 = vst [vmem:[%s1020_s17 + $0x80] sm:$0xff] %v1030_v24  ;;  %v573_v45 = vadd.f32 %v542_v41, %v541_v42 }
  0xb4   : > { %637 = vst [vmem:[%s1020_s17 + $0xc0] sm:$0xff] %v1041_v28 }
  0xb8   : > { %v414_v25 = vpop.f32.mrf.mxu0  ;;  %v1036_v26 = vpop.f32.mrf.mxu1 }
  0xb9   : > { %615 = vst [vmem:[%s1020_s17 + $0x10] sm:$0xff] %v414_v25  ;;  %v1039_v27 = vpop.f32.mrf.mxu2  ;;  %v1054_v32 = vpop.f32.mrf.mxu3  ;;  %v543_v44 = vmul.f32 %v414_v25, %v414_v25  ;;  %v505_v46 = vadd.f32 %v504_v43, %v414_v25  ;;  %v551_v13 = vmul.f32 %v1036_v26, %v1036_v26 }
  0xba   : > { %623 = vst [vmem:[%s1020_s17 + $0x50] sm:$0xff] %v1036_v26 }
  0xbb   : > { %630 = vst [vmem:[%s1020_s17 + $0x88] sm:$0xff] %v1039_v27  ;;  %v574_v50 = vadd.f32 %v573_v45, %v543_v44  ;;  %v557_v44 = vmul.f32 %v1030_v24, %v1030_v24 }
  0xbc   : > { %638 = vst [vmem:[%s1020_s17 + $0xc8] sm:$0xff] %v1054_v32 }
  0xc0   : > { %v417_v29 = vpop.f32.mrf.mxu0  ;;  %v1049_v30 = vpop.f32.mrf.mxu1 }
  0xc1   : > { %616 = vst [vmem:[%s1020_s17 + $0x18] sm:$0xff] %v417_v29  ;;  %v1052_v31 = vpop.f32.mrf.mxu2  ;;  %v1067_v36 = vpop.f32.mrf.mxu3  ;;  %v544_v47 = vmul.f32 %v417_v29, %v417_v29  ;;  %v506_v51 = vadd.f32 %v505_v46, %v417_v29  ;;  %v552_v16 = vmul.f32 %v1049_v30, %v1049_v30  ;;  %v558_v46 = vmul.f32 %v1039_v27, %v1039_v27 }
  0xc2   : > { %624 = vst [vmem:[%s1020_s17 + $0x58] sm:$0xff] %v1049_v30 }
  0xc3   : > { %631 = vst [vmem:[%s1020_s17 + $0x90] sm:$0xff] %v1052_v31  ;;  %v575_v55 = vadd.f32 %v574_v50, %v544_v47 }
  0xc4   : > { %639 = vst [vmem:[%s1020_s17 + $0xd0] sm:$0xff] %v1067_v36 }
  0xc8   : > { %v420_v33 = vpop.f32.mrf.mxu0  ;;  %v1062_v34 = vpop.f32.mrf.mxu1 }
  0xc9   : > { %617 = vst [vmem:[%s1020_s17 + $0x20] sm:$0xff] %v420_v33  ;;  %v1065_v35 = vpop.f32.mrf.mxu2  ;;  %v1080_v40 = vpop.f32.mrf.mxu3  ;;  %v545_v52 = vmul.f32 %v420_v33, %v420_v33  ;;  %v507_v56 = vadd.f32 %v506_v51, %v420_v33  ;;  %v553_v17 = vmul.f32 %v1062_v34, %v1062_v34 }
  0xca   : > { %625 = vst [vmem:[%s1020_s17 + $0x60] sm:$0xff] %v1062_v34  ;;  %v560_v51 = vmul.f32 %v1065_v35, %v1065_v35 }
  0xcb   : > { %632 = vst [vmem:[%s1020_s17 + $0x98] sm:$0xff] %v1065_v35  ;;  %v576_v58 = vadd.f32 %v575_v55, %v545_v52 }
  0xcc   : > { %640 = vst [vmem:[%s1020_s17 + $0xd8] sm:$0xff] %v1080_v40 }
  0xd0   : > { %v423_v37 = vpop.f32.mrf.mxu0  ;;  %v1075_v38 = vpop.f32.mrf.mxu1 }
  0xd1   : > { %618 = vst [vmem:[%s1020_s17 + $0x28] sm:$0xff] %v423_v37  ;;  %v1078_v39 = vpop.f32.mrf.mxu2  ;;  %v1091_v54 = vpop.f32.mrf.mxu3  ;;  %v546_v57 = vmul.f32 %v423_v37, %v423_v37  ;;  %v508_v59 = vadd.f32 %v507_v56, %v423_v37  ;;  %v554_v25 = vmul.f32 %v1075_v38, %v1075_v38 }
  0xd2   : > { %626 = vst [vmem:[%s1020_s17 + $0x68] sm:$0xff] %v1075_v38 }
  0xd3   : > { %633 = vst [vmem:[%s1020_s17 + $0xa0] sm:$0xff] %v1078_v39  ;;  %v577_v61 = vadd.f32 %v576_v58, %v546_v57 }
  0xd4   : > { %641 = vst [vmem:[%s1020_s17 + $0xe0] sm:$0xff] %v1091_v54 }
  0xd8   : > { %v426_v48 = vpop.f32.mrf.mxu0  ;;  %v450_v49 = vpop.f32.mrf.mxu1 }
  0xd9   : > { %619 = vst [vmem:[%s1020_s17 + $0x30] sm:$0xff] %v426_v48  ;;  %v1089_v53 = vpop.f32.mrf.mxu2  ;;  %v547_v60 = vmul.f32 %v426_v48, %v426_v48  ;;  %v509_v62 = vadd.f32 %v508_v59, %v426_v48  ;;  %v1099_v5 = vpop.f32.mrf.mxu3  ;;  %v559_v48 = vmul.f32 %v1052_v31, %v1052_v31 }
  0xda   : > { %627 = vst [vmem:[%s1020_s17 + $0x70] sm:$0xff] %v450_v49  ;;  %v562_v58 = vmul.f32 %v1089_v53, %v1089_v53 }
  0xdb   : > { %634 = vst [vmem:[%s1020_s17 + $0xa8] sm:$0xff] %v1089_v53  ;;  %v578_v1 = vadd.f32 %v577_v61, %v547_v60 }
  0xdc   : > { %642 = vst [vmem:[%s1020_s17 + $0xe8] sm:$0xff] %v1099_v5 }
  0xe0   : > { %v429_v63 = vpop.f32.mrf.mxu0  ;;  %v453_v0 = vpop.f32.mrf.mxu1 }
  0xe1   : > { %v510_v2 = vadd.f32 %v509_v62, %v429_v63  ;;  %v548_v3 = vmul.f32 %v429_v63, %v429_v63  ;;  %620 = vst [vmem:[%s1020_s17 + $0x38] sm:$0xff] %v429_v63  ;;  %v474_v4 = vpop.f32.mrf.mxu2  ;;  %v498_v10 = vpop.f32.mrf.mxu3  ;;  %v556_v37 = vmul.f32 %v453_v0, %v453_v0 }
  0xe2   : > { %628 = vst [vmem:[%s1020_s17 + $0x78] sm:$0xff] %v453_v0  ;;  %v563_v61 = vmul.f32 %v474_v4, %v474_v4 }
  0xe3   : > { %v511_v7 = vadd.f32 %v510_v2, %v1022_v21  ;;  %v579_v8 = vadd.f32 %v578_v1, %v548_v3  ;;  %635 = vst [vmem:[%s1020_s17 + $0xb0] sm:$0xff] %v474_v4 }
  0xe4   : > { %643 = vst [vmem:[%s1020_s17 + $0xf0] sm:$0xff] %v498_v10 }
  0xe5   : > { %v512_v11 = vadd.f32 %v511_v7, %v1027_v23  ;;  %v580_v12 = vadd.f32 %v579_v8, %v549_v6  ;;  %v568_v8 = vmul.f32 %v1080_v40, %v1080_v40 }
  0xe7   : > { %v513_v14 = vadd.f32 %v512_v11, %v1036_v26  ;;  %v581_v15 = vadd.f32 %v580_v12, %v550_v9  ;;  %v569_v11 = vmul.f32 %v1091_v54, %v1091_v54 }
  0xe9   : > { %v582_v18 = vadd.f32 %v581_v15, %v551_v13  ;;  %v514_v19 = vadd.f32 %v513_v14, %v1049_v30  ;;  %v477_v20 = vpop.f32.mrf.mxu2  ;;  %v555_v30 = vmul.f32 %v450_v49, %v450_v49  ;;  %v501_v43 = vpop.f32.mrf.mxu3 }
  0xea   : > { %636 = vst [vmem:[%s1020_s17 + $0xb8] sm:$0xff] %v477_v20  ;;  %v564_v62 = vmul.f32 %v477_v20, %v477_v20 }
  0xeb   : > { %v515_v21 = vadd.f32 %v514_v19, %v1062_v34  ;;  %v583_v22 = vadd.f32 %v582_v18, %v552_v16  ;;  %644 = vst [vmem:[%s1020_s17 + $0xf8] sm:$0xff] %v501_v43  ;;  %v571_v18 = vmul.f32 %v498_v10, %v498_v10  ;;  %v572_v19 = vmul.f32 %v501_v43, %v501_v43 }
  0xed   : > { %v516_v23 = vadd.f32 %v515_v21, %v1075_v38  ;;  %v584_v26 = vadd.f32 %v583_v22, %v553_v17 }
  0xef   : > { %v585_v29 = vadd.f32 %v584_v26, %v554_v25  ;;  %v517_v33 = vadd.f32 %v516_v23, %v450_v49 }
  0xf1   : > { %v586_v41 = vadd.f32 %v585_v29, %v555_v30  ;;  %v518_v42 = vadd.f32 %v517_v33, %v453_v0 }
  0xf3   : > { %v519_v34 = vadd.f32 %v518_v42, %v1030_v24  ;;  %v587_v45 = vadd.f32 %v586_v41, %v556_v37  ;;  %v561_v24 = vmul.f32 %v1078_v39, %v1078_v39 }
  0xf5   : > { %v520_v38 = vadd.f32 %v519_v34, %v1039_v27  ;;  %v588_v47 = vadd.f32 %v587_v45, %v557_v44 }
  0xf7   : > { %v521_v49 = vadd.f32 %v520_v38, %v1052_v31  ;;  %v589_v50 = vadd.f32 %v588_v47, %v558_v46 }
  0xf9   : > { %v590_v52 = vadd.f32 %v589_v50, %v559_v48  ;;  %v522_v55 = vadd.f32 %v521_v49, %v1065_v35  ;;  %v565_v35 = vmul.f32 %v1041_v28, %v1041_v28 }
  0xfb   : > { %v523_v56 = vadd.f32 %v522_v55, %v1078_v39  ;;  %v591_v57 = vadd.f32 %v590_v52, %v560_v51  ;;  %v566_v39 = vmul.f32 %v1054_v32, %v1054_v32 }
  0xfd   : > { %v524_v27 = vadd.f32 %v523_v56, %v1089_v53  ;;  %v592_v59 = vadd.f32 %v591_v57, %v561_v24  ;;  %v567_v53 = vmul.f32 %v1067_v36, %v1067_v36 }
  0xff   : > { %v593_v31 = vadd.f32 %v592_v59, %v562_v58  ;;  %v525_v60 = vadd.f32 %v524_v27, %v474_v4 }
 0x101   : > { %v594_v63 = vadd.f32 %v593_v31, %v563_v61  ;;  %v526_v0 = vadd.f32 %v525_v60, %v477_v20 }
 0x103   : > { %v527_v1 = vadd.f32 %v526_v0, %v1041_v28  ;;  %v595_v2 = vadd.f32 %v594_v63, %v564_v62 }
 0x105   : > { %v528_v3 = vadd.f32 %v527_v1, %v1054_v32  ;;  %v596_v6 = vadd.f32 %v595_v2, %v565_v35 }
 0x107   : > { %v529_v4 = vadd.f32 %v528_v3, %v1067_v36  ;;  %v597_v7 = vadd.f32 %v596_v6, %v566_v39  ;;  %v570_v36 = vmul.f32 %v1099_v5, %v1099_v5 }
 0x109   : > { %v598_v9 = vadd.f32 %v597_v7, %v567_v53  ;;  %v530_v28 = vadd.f32 %v529_v4, %v1080_v40 }
 0x10b   : > { %v531_v12 = vadd.f32 %v530_v28, %v1091_v54  ;;  %v599_v32 = vadd.f32 %v598_v9, %v568_v8 }
 0x10d   : > { %v532_v13 = vadd.f32 %v531_v12, %v1099_v5  ;;  %v600_v14 = vadd.f32 %v599_v32, %v569_v11 }
 0x10f   : > { %v601_v15 = vadd.f32 %v600_v14, %v570_v36  ;;  %v533_v16 = vadd.f32 %v532_v13, %v498_v10 }
 0x111   : > { %v602_v20 = vadd.f32 %v601_v15, %v571_v18  ;;  %v534_v17 = vadd.f32 %v533_v16, %v501_v43 }
 0x113   : > { %v535_v40 = vrot.slane %v534_v17, 4  ;;  %v603_v21 = vadd.f32 %v602_v20, %v572_v19 }
 0x115   : > { %v536_v22 = vadd.f32 %v535_v40, %v534_v17  ;;  %v604_v23 = vrot.slane %v603_v21, 4 }
 0x117   : > { %v537_v54 = vrot.slane %v536_v22, 2  ;;  %v605_v25 = vadd.f32 %v604_v23, %v603_v21 }
 0x119   : > { %v538_v26 = vadd.f32 %v537_v54, %v536_v22  ;;  %v606_v29 = vrot.slane %v605_v25, 2 }
 0x11b   : > { %v539_v33 = vrot.slane %v538_v26, 1  ;;  %v607_v30 = vadd.f32 %v606_v29, %v605_v25 }
 0x11d   : > { %v608_v5 = vrot.slane %v607_v30, 1  ;;  %v540_v10 = vadd.f32 %v539_v33, %v538_v26 }
 0x11f   : > { %v609_v37 = vadd.f32 %v608_v5, %v607_v30 }
 0x121   : > { %v611_v41 = vsel %vm610_vm0, %v540_v10, %v609_v37 }
 0x122   : > { %612 = vst [vmem:[%s238_s21] sm:$0x3] %v611_v41 }
 0x123 PF: > { %s16_s18 = sadd.s32 1, %s808_s18  }
 0x124   : > { %p13_p5 = scmp.ge.s32.totalorder %s16_s18, 4  }
 0x126   :  { %15 = sbr.rel (!%p13_p5) target bundleno = 1 (0x1), region = 78 }

// kernel: bottleneck_forward.6
= control target key start
LH: loop header
LB: loop body
LE: loop exit
PB: predicated region body
PF: predicated region fallthrough
CT: control target
= control target key end

     0   :  { %s2717_s18 = smov 0   ;;  %s4211_s0 = inlined_call_operand.vmem [shape: f32[2,16,16,128], index: 0, kind: input, shape index: {}]   ;;  %s4212_s1 = inlined_call_operand.vmem [shape: f32[1,128], index: 1, kind: input, shape index: {}]   ;;  %s4213_s2 = inlined_call_operand.vmem [shape: f32[1,128], index: 2, kind: input, shape index: {}]   ;;  %s4214_s3 = inlined_call_operand.vmem [shape: f32[9,128,128], index: 3, kind: input, shape index: {}]   ;;  %s4215_s4 = inlined_call_operand.vmem [shape: f32[2,16,16,128], index: 4, kind: output, shape index: {0}]   ;;  %s4216_s5 = inlined_call_operand.vmem [shape: f32[2,2,128], index: 5, kind: output, shape index: {1}]  }
   0x1 LB: > { %s2441_s19 = sadd.s32 4294967295, %s2684_s18   ;;  %p2445_p0 = scmp.ge.s32.totalorder %s2684_s18, 1  ;;  %s2684_s18 = sphi %s2717_s18, %s16_s18  }
   0x2   : > { %p190_p1 = scmp.lt.s32.totalorder %s2684_s18, 3 }
   0x4   : > { %p191_p2 = pnand %p2445_p0, %p190_p1 }
   0x6   : > { %194 = sbr.rel (%p191_p2) target bundleno = 803 (0x323), region = 36 }
   0xb   : > { %v2466_v0 = vld [vmem:[%s4214_s3 + $0xf8] sm:$0xff]  ;;  %v2465_v1 = vld [vmem:[%s4214_s3 + $0xf0] sm:$0xff]  ;;  %p222_p3 = scmp.lt.s32.totalorder %s2441_s19, 1  ;;  %v2686_v2 = vmov 0.0   ;;  %v2464_v3 = vld [vmem:[%s4214_s3 + $0xe8] sm:$0xff]  ;;  %vm577_vm0 = vcmask 1046528  }
   0xc   : > { %2583 = vmatpush.msra.mxu1 %v2466_v0  ;;  %2584 = vmatpush.msra.mxu2 %v2466_v0  ;;  %384 = vst [vmem:[#allocation2 + $0x60] sm:$0xff] %v2686_v2  ;;  %v2463_v4 = vld [vmem:[%s4214_s3 + $0xe0] sm:$0xff]  ;;  %v2462_v5 = vld [vmem:[%s4214_s3 + $0xd8] sm:$0xff]  ;;  %v2461_v10 = vld [vmem:[%s4214_s3 + $0xd0] sm:$0xff]  ;;  %v578_v44 = vrot.slane %v2686_v2, 1  ;;  %vm933_vm1 = vcmask 1045504  }
   0xd   : > { %2585 = vmatpush.msra.mxu3 %v2466_v0  ;;  %707 = vmatpush.msra.mxu0 %v2466_v0  ;;  %s4397_s19 = smov (!%p222_p3, %s2441_s19), 1  ;;  %385 = vst [vmem:[#allocation2 + $0x68] sm:$0xff] %v2686_v2  ;;  %v2759_v8 = vld [vmem:[%s4212_s1] ss:$0 sm:$0xff]  ;;  %v2460_v13 = vld [vmem:[%s4214_s3 + $0xc8] sm:$0xff]  ;;  %v2458_v19 = vld [vmem:[%s4214_s3 + $0xb8] sm:$0xff] }
   0xe   : > { %2586 = vmatpush.msra.mxu1 %v2465_v1  ;;  %2587 = vmatpush.msra.mxu2 %v2465_v1  ;;  %386 = vst [vmem:[#allocation2 + $0x70] sm:$0x3] %v2686_v2  ;;  %s2581_s28 = sshll.u32 %s4397_s19, 8  ;;  %v2765_v9 = vld [vmem:[%s4213_s2] ss:$0 sm:$0xff]  ;;  %v2457_v20 = vld [vmem:[%s4214_s3 + $0xb0] sm:$0xff] }
   0xf   : > { %2588 = vmatpush.msra.mxu3 %v2465_v1  ;;  %708 = vmatpush.msra.mxu0 %v2465_v1  ;;  %372 = vst [vmem:[#allocation2] sm:$0xff] %v2686_v2  ;;  %s2752_s8 = scalar_lea.vmem %s4211_s0, %s2581_s28  ;;  %v2459_v16 = vld [vmem:[%s4214_s3 + $0xc0] sm:$0xff]  ;;  %v2456_v21 = vld [vmem:[%s4214_s3 + $0xa8] sm:$0xff]  ;;  %v2454_v23 = vld [vmem:[%s4214_s3 + $0x98] sm:$0xff]  ;;  %s4090_s25 = scalar_lea.vmem %s4215_s4, %s2581_s28  ;;  %vm2320_vm2 = vcmask 1040384  }
  0x10   : > { %2589 = vmatpush.msra.mxu1 %v2464_v3  ;;  %2590 = vmatpush.msra.mxu2 %v2464_v3  ;;  %v244_v6 = vld [vmem:[%s2752_s8 + $0x30] sm:$0xff]  ;;  %v245_v7 = vld [vmem:[%s2752_s8 + $0x38] sm:$0xff]  ;;  %374 = vst [vmem:[#allocation2 + $0x10] sm:$0x3] %v2686_v2  ;;  %v2455_v22 = vld [vmem:[%s4214_s3 + $0xa0] sm:$0xff]  ;;  %s2450_s28 = sshll.u32 %s4397_s19, 1 }
  0x11   : > { %2591 = vmatpush.msra.mxu3 %v2464_v3  ;;  %709 = vmatpush.msra.mxu0 %v2464_v3  ;;  %375 = vst [vmem:[#allocation2 + $0x18] sm:$0xff] %v2686_v2  ;;  %v279_v11 = vmul.f32 %v2759_v8, %v244_v6  ;;  %v280_v12 = vmul.f32 %v2759_v8, %v245_v7  ;;  %v2453_v26 = vld [vmem:[%s4214_s3 + $0x90] sm:$0xff]  ;;  %v2452_v29 = vld [vmem:[%s4214_s3 + $0x88] sm:$0xff]  ;;  %v2451_v30 = vld [vmem:[%s4214_s3 + $0x80] sm:$0xff]  ;;  %s235_s29 = scalar_lea.vmem %s4216_s5, %s2450_s28 }
  0x12   : > { %2592 = vmatpush.msra.mxu1 %v2463_v4  ;;  %2593 = vmatpush.msra.mxu2 %v2463_v4  ;;  %376 = vst [vmem:[#allocation2 + $0x20] sm:$0xff] %v2686_v2  ;;  %v2482_v32 = vld [vmem:[%s4214_s3 + $0x178] sm:$0xff]  ;;  %v2481_v35 = vld [vmem:[%s4214_s3 + $0x170] sm:$0xff]  ;;  %v2480_v47 = vld [vmem:[%s4214_s3 + $0x168] sm:$0xff] }
  0x13   : > { %2594 = vmatpush.msra.mxu3 %v2463_v4  ;;  %710 = vmatpush.msra.mxu0 %v2463_v4  ;;  %377 = vst [vmem:[#allocation2 + $0x28] sm:$0x3] %v2686_v2  ;;  %v314_v14 = vadd.f32 %v2765_v9, %v279_v11  ;;  %v315_v15 = vadd.f32 %v2765_v9, %v280_v12  ;;  %v2498_v33 = vld [vmem:[%s4214_s3 + $0x1f8] sm:$0xff]  ;;  %v2497_v36 = vld [vmem:[%s4214_s3 + $0x1f0] sm:$0xff]  ;;  %v246_v48 = vld [vmem:[%s2752_s8 + $0x40] sm:$0xff] }
  0x14   : > { %2595 = vmatpush.msra.mxu1 %v2462_v5  ;;  %2596 = vmatpush.msra.mxu2 %v2462_v5  ;;  %378 = vst [vmem:[#allocation2 + $0x30] sm:$0xff] %v2686_v2  ;;  %v528_v34 = vld [vmem:[%s4214_s3 + $0x78] sm:$0xff]  ;;  %v252_v39 = vld [vmem:[%s2752_s8 + $0x70] sm:$0xff]  ;;  %v247_v50 = vld [vmem:[%s2752_s8 + $0x48] sm:$0xff]  ;;  %v281_v60 = vmul.f32 %v2759_v8, %v246_v48 }
  0x15   : > { %2597 = vmatpush.msra.mxu3 %v2462_v5  ;;  %711 = vmatpush.msra.mxu0 %v2462_v5  ;;  %379 = vst [vmem:[#allocation2 + $0x38] sm:$0xff] %v2686_v2  ;;  %v346_v17 = vmax.f32 %v314_v14, 0.0  ;;  %v347_v18 = vmax.f32 %v315_v15, 0.0  ;;  %v253_v40 = vld [vmem:[%s2752_s8 + $0x78] sm:$0xff]  ;;  %v260_v42 = vld [vmem:[%s2752_s8 + $0xb0] sm:$0xff]  ;;  %v287_v45 = vmul.f32 %v2759_v8, %v252_v39  ;;  %v254_v51 = vld [vmem:[%s2752_s8 + $0x80] sm:$0xff]  ;;  %v282_v0 = vmul.f32 %v2759_v8, %v247_v50 }
  0x16   : > { %2598 = vmatpush.msra.mxu1 %v2461_v10  ;;  %2599 = vmatpush.msra.mxu2 %v2461_v10  ;;  %380 = vst [vmem:[#allocation2 + $0x40] sm:$0x3] %v2686_v2  ;;  %v261_v43 = vld [vmem:[%s2752_s8 + $0xb8] sm:$0xff]  ;;  %v527_v46 = vld [vmem:[%s4214_s3 + $0x70] sm:$0xff]  ;;  %v288_v49 = vmul.f32 %v2759_v8, %v253_v40  ;;  %v295_v52 = vmul.f32 %v2759_v8, %v260_v42  ;;  %v2496_v54 = vld [vmem:[%s4214_s3 + $0x1e8] sm:$0xff] }
  0x17   : > { %2600 = vmatpush.msra.mxu3 %v2461_v10  ;;  %712 = vmatpush.msra.mxu0 %v2461_v10  ;;  %381 = vst [vmem:[#allocation2 + $0x48] sm:$0xff] %v2686_v2  ;;  %v296_v53 = vmul.f32 %v2759_v8, %v261_v43  ;;  %v2514_v55 = vld [vmem:[%s4214_s3 + $0x278] sm:$0xff]  ;;  %v526_v56 = vld [vmem:[%s4214_s3 + $0x68] sm:$0xff]  ;;  %v2479_v57 = vld [vmem:[%s4214_s3 + $0x160] sm:$0xff]  ;;  %v322_v61 = vadd.f32 %v2765_v9, %v287_v45 }
  0x18   : > { %2601 = vmatpush.msra.mxu1 %v2460_v13  ;;  %2602 = vmatpush.msra.mxu2 %v2460_v13  ;;  %433 = vst [vmem:[#allocation2 + $0x61] sm:$0xff] %v346_v17  ;;  %v2495_v58 = vld [vmem:[%s4214_s3 + $0x1e0] sm:$0xff]  ;;  %v2513_v59 = vld [vmem:[%s4214_s3 + $0x270] sm:$0xff]  ;;  %v255_v62 = vld [vmem:[%s2752_s8 + $0x88] sm:$0xff]  ;;  %v323_v63 = vadd.f32 %v2765_v9, %v288_v49  ;;  %v330_v4 = vadd.f32 %v2765_v9, %v295_v52 }
  0x19   : > { %2603 = vmatpush.msra.mxu3 %v2460_v13  ;;  %713 = vmatpush.msra.mxu0 %v2460_v13  ;;  %434 = vst [vmem:[#allocation2 + $0x69] sm:$0xff] %v347_v18  ;;  %v262_v1 = vld [vmem:[%s2752_s8 + $0xc0] sm:$0xff]  ;;  %v263_v3 = vld [vmem:[%s2752_s8 + $0xc8] sm:$0xff]  ;;  %v331_v5 = vadd.f32 %v2765_v9, %v296_v53  ;;  %v289_v6 = vmul.f32 %v2759_v8, %v254_v51  ;;  %v2919_v7 = vld [vmem:[#allocation2 + $0x10] sm:$0x3]  ;;  %v354_v15 = vmax.f32 %v322_v61, 0.0 }
  0x1a   : > { %2604 = vmatpush.msra.mxu1 %v2459_v16  ;;  %2605 = vmatpush.msra.mxu2 %v2459_v16  ;;  %382 = vst [vmem:[#allocation2 + $0x50] sm:$0xff] %v2686_v2  ;;  %v316_v10 = vadd.f32 %v2765_v9, %v281_v60  ;;  %v290_v11 = vmul.f32 %v2759_v8, %v255_v62  ;;  %v581_v12 = vrot.slane %v2919_v7, 1  ;;  %v238_v13 = vld [vmem:[%s2752_s8] sm:$0xff]  ;;  %v239_v14 = vld [vmem:[%s2752_s8 + $0x8] sm:$0xff]  ;;  %v2478_v17 = vld [vmem:[%s4214_s3 + $0x158] sm:$0xff] }
  0x1b   : > { %2606 = vmatpush.msra.mxu3 %v2459_v16  ;;  %714 = vmatpush.msra.mxu0 %v2459_v16  ;;  %383 = vst [vmem:[#allocation2 + $0x58] sm:$0x3] %v2686_v2  ;;  %v525_v16 = vld [vmem:[%s4214_s3 + $0x60] sm:$0xff]  ;;  %v297_v18 = vmul.f32 %v2759_v8, %v262_v1  ;;  %v274_v40 = vmul.f32 %v2759_v8, %v239_v14  ;;  %v265_v51 = vld [vmem:[%s2752_s8 + $0xd8] sm:$0xff]  ;;  %v240_v60 = vld [vmem:[%s2752_s8 + $0x10] sm:$0xff] }
  0x1c   : > { %2607 = vmatpush.msra.mxu1 %v2458_v19  ;;  %2608 = vmatpush.msra.mxu2 %v2458_v19  ;;  %387 = vst [vmem:[#allocation2 + $0x78] sm:$0xff] %v2686_v2  ;;  %v2511_v39 = vld [vmem:[%s4214_s3 + $0x260] sm:$0xff] }
  0x1d   : > { %2609 = vmatpush.msra.mxu3 %v2458_v19  ;;  %715 = vmatpush.msra.mxu0 %v2458_v19  ;;  %388 = vst [vmem:[#allocation2 + $0x80] sm:$0xff] %v2686_v2  ;;  %v298_v19 = vmul.f32 %v2759_v8, %v263_v3  ;;  %v309_v53 = vadd.f32 %v2765_v9, %v274_v40  ;;  %v2492_v3 = vld [vmem:[%s4214_s3 + $0x1c8] sm:$0xff]  ;;  %v2491_v14 = vld [vmem:[%s4214_s3 + $0x1c0] sm:$0xff] }
  0x1e   : > { %2610 = vmatpush.msra.mxu1 %v2457_v20  ;;  %2611 = vmatpush.msra.mxu2 %v2457_v20  ;;  %389 = vst [vmem:[#allocation2 + $0x88] sm:$0x3] %v2686_v2 }
  0x1f   : > { %2612 = vmatpush.msra.mxu3 %v2457_v20  ;;  %716 = vmatpush.msra.mxu0 %v2457_v20  ;;  %390 = vst [vmem:[#allocation2 + $0x90] sm:$0xff] %v2686_v2  ;;  %v471_v24 = vld [vmem:[#allocation2 + $0x60] sm:$0xff]  ;;  %v248_v20 = vld [vmem:[%s2752_s8 + $0x50] sm:$0xff]  ;;  %v333_v42 = vadd.f32 %v2765_v9, %v298_v19 }
  0x20   : > { %2613 = vmatpush.msra.mxu1 %v2456_v21  ;;  %2614 = vmatpush.msra.mxu2 %v2456_v21  ;;  %v2808_v25 = vld [vmem:[#allocation2 + $0x68] sm:$0xff]  ;;  %391 = vst [vmem:[#allocation2 + $0x98] sm:$0xff] %v2686_v2  ;;  %v598_v27 = vrot.slane %v471_v24, 1  ;;  %v473_v37 = vld [vmem:[#allocation2 + $0x70] sm:$0x3]  ;;  %v249_v24 = vld [vmem:[%s2752_s8 + $0x58] sm:$0xff]  ;;  %v283_v43 = vmul.f32 %v2759_v8, %v248_v20 }
  0x21   : > { %2615 = vmatpush.msra.mxu3 %v2456_v21  ;;  %717 = vmatpush.msra.mxu0 %v2456_v21  ;;  %392 = vst [vmem:[#allocation2 + $0xa0] sm:$0x3] %v2686_v2  ;;  %v599_v28 = vrot.slane %v2808_v25, 1  ;;  %v601_v38 = vrot.slane %v473_v37, 1  ;;  %v355_v21 = vmax.f32 %v323_v63, 0.0  ;;  %v256_v25 = vld [vmem:[%s2752_s8 + $0x90] sm:$0xff]  ;;  %v300_v63 = vmul.f32 %v2759_v8, %v265_v51 }
  0x22   : > { %2616 = vmatpush.msra.mxu1 %v2455_v22  ;;  %2617 = vmatpush.msra.mxu2 %v2455_v22  ;;  %393 = vst [vmem:[#allocation2 + $0xa8] sm:$0xff] %v2686_v2  ;;  %v2477_v37 = vld [vmem:[%s4214_s3 + $0x150] sm:$0xff] }
  0x23   : > { %2618 = vmatpush.msra.mxu3 %v2455_v22  ;;  %718 = vmatpush.msra.mxu0 %v2455_v22  ;;  %394 = vst [vmem:[#allocation2 + $0xb0] sm:$0xff] %v2686_v2  ;;  %v2828_v31 = vsel %vm577_vm0, %v598_v27, %v599_v28  ;;  %v2864_v41 = vsel %vm577_vm0, %v599_v28, %v601_v38  ;;  %v362_v27 = vmax.f32 %v330_v4, 0.0  ;;  %v363_v28 = vmax.f32 %v331_v5, 0.0  ;;  %v2493_v38 = vld [vmem:[%s4214_s3 + $0x1d0] sm:$0xff]  ;;  %v2510_v4 = vld [vmem:[%s4214_s3 + $0x258] sm:$0xff]  ;;  %v522_v5 = vld [vmem:[%s4214_s3 + $0x48] sm:$0xff] }
  0x24   : > { %2619 = vmatpush.msra.mxu1 %v2454_v23  ;;  %2620 = vmatpush.msra.mxu2 %v2454_v23  ;;  %395 = vst [vmem:[#allocation2 + $0xb8] sm:$0x3] %v2686_v2  ;;  %v317_v22 = vadd.f32 %v2765_v9, %v282_v0  ;;  %v241_v0 = vld [vmem:[%s2752_s8 + $0x18] sm:$0xff]  ;;  %v2509_v19 = vld [vmem:[%s4214_s3 + $0x250] sm:$0xff] }
  0x25   : > { %2621 = vmatpush.msra.mxu3 %v2454_v23  ;;  %719 = vmatpush.msra.mxu0 %v2454_v23  ;;  %396 = vst [vmem:[#allocation2 + $0xc0] sm:$0xff] %v2686_v2  ;;  %v582_v23 = vsel %vm577_vm0, %v578_v44, %v581_v12  ;;  %v341_v12 = vmax.f32 %v309_v53, 0.0 }
  0x26   : > { %2622 = vmatpush.msra.mxu1 %v2453_v26  ;;  %2623 = vmatpush.msra.mxu2 %v2453_v26  ;;  %397 = vst [vmem:[#allocation2 + $0xc8] sm:$0xff] %v2686_v2  ;;  %v349_v45 = vmax.f32 %v317_v22, 0.0 }
  0x27   : > { %2624 = vmatpush.msra.mxu3 %v2453_v26  ;;  %720 = vmatpush.msra.mxu0 %v2453_v26  ;;  %4274 = vst [vmem:[#allocation3_spill] sm:$0xff] %v2828_v31  ;;  %v257_v26 = vld [vmem:[%s2752_s8 + $0x98] sm:$0xff] }
  0x28   : > { %2625 = vmatpush.msra.mxu1 %v2452_v29  ;;  %2626 = vmatpush.msra.mxu2 %v2452_v29  ;;  %398 = vst [vmem:[#allocation2 + $0xd0] sm:$0x3] %v2686_v2  ;;  %v292_v50 = vmul.f32 %v2759_v8, %v257_v26 }
  0x29   : > { %2627 = vmatpush.msra.mxu3 %v2452_v29  ;;  %399 = vst [vmem:[#allocation2 + $0xd8] sm:$0xff] %v2686_v2  ;;  %721 = vmatpush.msra.mxu0 %v2452_v29  ;;  %v324_v29 = vadd.f32 %v2765_v9, %v289_v6 }
  0x2a   : > { %2628 = vmatpush.msra.mxu1 %v2451_v30  ;;  %2629 = vmatpush.msra.mxu2 %v2451_v30  ;;  %400 = vst [vmem:[#allocation2 + $0xe0] sm:$0xff] %v2686_v2  ;;  %v3000_v6 = vadd.f32 %v2765_v9, %v292_v50  ;;  %v258_v50 = vld [vmem:[%s2752_s8 + $0xa0] sm:$0xff] }
  0x2b   : > { %747 = vmatmul.f32.vlgmr.msra.gmra.mxu1 %v2828_v31  ;;  %401 = vst [vmem:[#allocation2 + $0xe8] sm:$0x3] %v2686_v2  ;;  %2630 = vmatpush.msra.mxu3 %v2451_v30  ;;  %v356_v48 = vmax.f32 %v324_v29, 0.0 }
  0x2c   : > { %402 = vst [vmem:[#allocation2 + $0xf0] sm:$0xff] %v2686_v2  ;;  %722 = vmatpush.msra.mxu0 %v2451_v30  ;;  %1063 = vmatpush.msrb.mxu2 %v2482_v32  ;;  %v2494_v30 = vld [vmem:[%s4214_s3 + $0x1d8] sm:$0xff]  ;;  %v2512_v32 = vld [vmem:[%s4214_s3 + $0x268] sm:$0xff]  ;;  %v359_v29 = vmax.f32 %v3000_v6, 0.0 }
  0x2d   : > { %403 = vst [vmem:[#allocation2 + $0xf8] sm:$0xff] %v2686_v2  ;;  %1225 = vmatpush.msrb.mxu3 %v2498_v33  ;;  %820 = vmatpush.msrb.mxu1 %v528_v34  ;;  %v524_v33 = vld [vmem:[%s4214_s3 + $0x58] sm:$0xff]  ;;  %v273_v34 = vmul.f32 %v2759_v8, %v238_v13  ;;  %v2475_v13 = vld [vmem:[%s4214_s3 + $0x140] sm:$0xff] }
  0x2e   : > { %404 = vst [vmem:[#allocation2 + $0x100] sm:$0x3] %v2686_v2  ;;  %1064 = vmatpush.msrb.mxu2 %v2481_v35  ;;  %723 = vmatmul.f32.vlgmr.msra.gmra.mxu0 %v578_v44  ;;  %v348_v35 = vmax.f32 %v316_v10, 0.0  ;;  %v264_v44 = vld [vmem:[%s2752_s8 + $0xd0] sm:$0xff]  ;;  %v275_v10 = vmul.f32 %v2759_v8, %v240_v60 }
  0x2f   : > { %405 = vst [vmem:[#allocation2 + $0x108] sm:$0xff] %v2686_v2  ;;  %1226 = vmatpush.msrb.mxu3 %v2497_v36  ;;  %821 = vmatpush.msrb.mxu1 %v527_v46  ;;  %v325_v36 = vadd.f32 %v2765_v9, %v290_v11  ;;  %v284_v46 = vmul.f32 %v2759_v8, %v249_v24  ;;  %v2473_v60 = vld [vmem:[%s4214_s3 + $0x130] sm:$0xff] }
  0x30   : > { %406 = vst [vmem:[#allocation2 + $0x110] sm:$0xff] %v2686_v2  ;;  %1065 = vmatpush.msrb.mxu2 %v2480_v47  ;;  %1397 = vmatpush.msrb.mxu0 %v2514_v55  ;;  %v291_v47 = vmul.f32 %v2759_v8, %v256_v25  ;;  %v308_v49 = vadd.f32 %v2765_v9, %v273_v34 }
  0x31   : > { %407 = vst [vmem:[#allocation2 + $0x118] sm:$0x3] %v2686_v2  ;;  %1227 = vmatpush.msrb.mxu3 %v2496_v54  ;;  %822 = vmatpush.msrb.mxu1 %v526_v56  ;;  %v357_v52 = vmax.f32 %v325_v36, 0.0  ;;  %v299_v54 = vmul.f32 %v2759_v8, %v264_v44  ;;  %v365_v56 = vmax.f32 %v333_v42, 0.0  ;;  %v319_v61 = vadd.f32 %v2765_v9, %v284_v46  ;;  %v521_v42 = vld [vmem:[%s4214_s3 + $0x40] sm:$0xff] }
  0x32   : > { %408 = vst [vmem:[#allocation2 + $0x120] sm:$0xff] %v2686_v2  ;;  %1066 = vmatpush.msrb.mxu2 %v2479_v57  ;;  %1398 = vmatpush.msrb.mxu0 %v2513_v59  ;;  %v523_v57 = vld [vmem:[%s4214_s3 + $0x50] sm:$0xff]  ;;  %v318_v59 = vadd.f32 %v2765_v9, %v283_v43  ;;  %v2986_v62 = vadd.f32 %v2765_v9, %v291_v47  ;;  %v340_v1 = vmax.f32 %v308_v49, 0.0 }
  0x33   : > { %409 = vst [vmem:[#allocation2 + $0x128] sm:$0xff] %v2686_v2  ;;  %750 = vmatmul.f32.gmra.mxu1 %v2864_v41  ;;  %1228 = vmatpush.msrb.mxu3 %v2495_v58  ;;  %v2476_v58 = vld [vmem:[%s4214_s3 + $0x148] sm:$0xff]  ;;  %v335_v25 = vadd.f32 %v2765_v9, %v300_v63 }
  0x34   : > { %410 = vst [vmem:[#allocation2 + $0x130] sm:$0x3] %v2686_v2  ;;  %823 = vmatpush.msrb.mxu1 %v525_v16  ;;  %1067 = vmatpush.msrb.mxu2 %v2478_v17  ;;  %v276_v16 = vmul.f32 %v2759_v8, %v241_v0  ;;  %v350_v20 = vmax.f32 %v318_v59, 0.0  ;;  %v358_v24 = vmax.f32 %v2986_v62, 0.0  ;;  %v293_v62 = vmul.f32 %v2759_v8, %v258_v50 }
  0x35   : > { %411 = vst [vmem:[#allocation2 + $0x138] sm:$0xff] %v2686_v2  ;;  %1229 = vmatpush.msrb.mxu3 %v2494_v30  ;;  %1399 = vmatpush.msrb.mxu0 %v2512_v32  ;;  %v310_v30 = vadd.f32 %v2765_v9, %v275_v10  ;;  %v367_v49 = vmax.f32 %v335_v25, 0.0 }
  0x36   : > { %412 = vst [vmem:[#allocation2 + $0x140] sm:$0xff] %v2686_v2  ;;  %726 = vmatmul.f32.gmra.mxu0 %v582_v23  ;;  %824 = vmatpush.msrb.mxu1 %v524_v33  ;;  %v351_v23 = vmax.f32 %v319_v61, 0.0  ;;  %v311_v36 = vadd.f32 %v2765_v9, %v276_v16  ;;  %v328_v25 = vadd.f32 %v2765_v9, %v293_v62 }
  0x37   : > { %4275 = vst [vmem:[#allocation4_spill] sm:$0xff] %v2864_v41  ;;  %1068 = vmatpush.msrb.mxu2 %v2477_v37  ;;  %1230 = vmatpush.msrb.mxu3 %v2493_v38  ;;  %v250_v37 = vld [vmem:[%s2752_s8 + $0x60] sm:$0xff]  ;;  %v251_v38 = vld [vmem:[%s2752_s8 + $0x68] sm:$0xff]  ;;  %v342_v53 = vmax.f32 %v310_v30, 0.0 }
  0x38   : > { %413 = vst [vmem:[#allocation2 + $0x148] sm:$0x3] %v2686_v2  ;;  %1400 = vmatpush.msrb.mxu0 %v2511_v39  ;;  %825 = vmatpush.msrb.mxu1 %v523_v57  ;;  %v285_v43 = vmul.f32 %v2759_v8, %v250_v37  ;;  %v286_v44 = vmul.f32 %v2759_v8, %v251_v38  ;;  %v2508_v57 = vld [vmem:[%s4214_s3 + $0x248] sm:$0xff]  ;;  %v343_v59 = vmax.f32 %v311_v36, 0.0  ;;  %v360_v50 = vmax.f32 %v328_v25, 0.0 }
  0x39   : > { %414 = vst [vmem:[#allocation2 + $0x150] sm:$0xff] %v2686_v2  ;;  %1069 = vmatpush.msrb.mxu2 %v2476_v58  ;;  %1231 = vmatpush.msrb.mxu3 %v2492_v3  ;;  %v520_v58 = vld [vmem:[%s4214_s3 + $0x38] sm:$0xff]  ;;  %v2489_v3 = vld [vmem:[%s4214_s3 + $0x1b0] sm:$0xff]  ;;  %v267_v36 = vld [vmem:[%s2752_s8 + $0xe8] sm:$0xff] }
  0x3a   : > { %415 = vst [vmem:[#allocation2 + $0x158] sm:$0xff] %v2686_v2  ;;  %1401 = vmatpush.msrb.mxu0 %v2510_v4  ;;  %826 = vmatpush.msrb.mxu1 %v522_v5  ;;  %v321_v61 = vadd.f32 %v2765_v9, %v286_v44  ;;  %v2507_v4 = vld [vmem:[%s4214_s3 + $0x240] sm:$0xff] }
  0x3b   : > { %416 = vst [vmem:[#allocation2 + $0x160] sm:$0x3] %v2686_v2  ;;  %1070 = vmatpush.msrb.mxu2 %v2475_v13  ;;  %1232 = vmatpush.msrb.mxu3 %v2491_v14 }
  0x3c   : > { %417 = vst [vmem:[#allocation2 + $0x168] sm:$0xff] %v2686_v2  ;;  %1402 = vmatpush.msrb.mxu0 %v2509_v19  ;;  %827 = vmatpush.msrb.mxu1 %v521_v42  ;;  %v266_v19 = vld [vmem:[%s2752_s8 + $0xe0] sm:$0xff]  ;;  %v302_v42 = vmul.f32 %v2759_v8, %v267_v36  ;;  %v2504_v36 = vld [vmem:[%s4214_s3 + $0x228] sm:$0xff] }
  0x3d   : > { %418 = vst [vmem:[#allocation2 + $0x170] sm:$0xff] %v2686_v2 }
  0x3e   : > { %419 = vst [vmem:[#allocation2 + $0x178] sm:$0x3] %v2686_v2  ;;  %1403 = vmatpush.msrb.mxu0 %v2508_v57  ;;  %828 = vmatpush.msrb.mxu1 %v520_v58  ;;  %v2487_v58 = vld [vmem:[%s4214_s3 + $0x1a0] sm:$0xff] }
  0x3f   : > { %420 = vst [vmem:[#allocation2 + $0x180] sm:$0xff] %v2686_v2 }
  0x40   : > { %421 = vst [vmem:[#allocation2 + $0x188] sm:$0xff] %v2686_v2  ;;  %1404 = vmatpush.msrb.mxu0 %v2507_v4 }
  0x41   : > { %422 = vst [vmem:[#allocation2 + $0x190] sm:$0x3] %v2686_v2 }
  0x42   : > { %425 = vst [vmem:[#allocation2 + $0x1a8] sm:$0x3] %v2686_v2  ;;  %v332_v2 = vadd.f32 %v2765_v9, %v297_v18 }
  0x43   : > { %441 = vst [vmem:[#allocation2 + $0xc1] sm:$0xff] %v354_v15  ;;  %v334_v15 = vadd.f32 %v2765_v9, %v299_v54  ;;  %v320_v54 = vadd.f32 %v2765_v9, %v285_v43 }
  0x44   : > { %442 = vst [vmem:[#allocation2 + $0xc9] sm:$0xff] %v355_v21  ;;  %v364_v55 = vmax.f32 %v332_v2, 0.0 }
  0x45   : > { %449 = vst [vmem:[#allocation2 + $0x121] sm:$0xff] %v362_v27  ;;  %v352_v13 = vmax.f32 %v320_v54, 0.0 }
  0x46   : > { %450 = vst [vmem:[#allocation2 + $0x129] sm:$0xff] %v363_v28 }
  0x47   : > { %435 = vst [vmem:[#allocation2 + $0x79] sm:$0xff] %v348_v35  ;;  %v366_v35 = vmax.f32 %v334_v15, 0.0 }
  0x48   : > { %436 = vst [vmem:[#allocation2 + $0x81] sm:$0xff] %v349_v45 }
  0x49   : > { %443 = vst [vmem:[#allocation2 + $0xd9] sm:$0xff] %v356_v48  ;;  %v2474_v48 = vld [vmem:[%s4214_s3 + $0x138] sm:$0xff] }
  0x4a   : > { %v3003_v11 = vld [vmem:[#allocation2 + $0xc0] sm:$0xff]  ;;  %444 = vst [vmem:[#allocation2 + $0xe1] sm:$0xff] %v357_v52  ;;  %1071 = vmatpush.msrb.mxu2 %v2474_v48  ;;  %v2490_v52 = vld [vmem:[%s4214_s3 + $0x1b8] sm:$0xff]  ;;  %v518_v48 = vld [vmem:[%s4214_s3 + $0x28] sm:$0xff] }
  0x4b   : > { %v3013_v17 = vld [vmem:[#allocation2 + $0xc8] sm:$0xff]  ;;  %v618_v18 = vrot.slane %v3003_v11, 1  ;;  %451 = vst [vmem:[#allocation2 + $0x139] sm:$0xff] %v364_v55  ;;  %v3024_v28 = vld [vmem:[#allocation2 + $0xd0] sm:$0x3]  ;;  %1233 = vmatpush.msrb.mxu3 %v2490_v52 }
  0x4c   : > { %v619_v21 = vrot.slane %v3013_v17, 1  ;;  %v495_v22 = vld [vmem:[#allocation2 + $0x120] sm:$0xff]  ;;  %452 = vst [vmem:[#allocation2 + $0x141] sm:$0xff] %v365_v56  ;;  %v621_v46 = vrot.slane %v3024_v28, 1  ;;  %1072 = vmatpush.msrb.mxu2 %v2473_v60 }
  0x4d   : > { %v3022_v26 = vld [vmem:[#allocation2 + $0x128] sm:$0xff]  ;;  %v638_v27 = vrot.slane %v495_v22, 1  ;;  %427 = vst [vmem:[#allocation2 + $0x19] sm:$0xff] %v340_v1  ;;  %v497_v39 = vld [vmem:[#allocation2 + $0x130] sm:$0x3]  ;;  %1234 = vmatpush.msrb.mxu3 %v2489_v3 }
  0x4e   : > { %v3029_v32 = vsel %vm577_vm0, %v618_v18, %v619_v21  ;;  %v639_v33 = vrot.slane %v3022_v26, 1  ;;  %v3032_v34 = vld [vmem:[#allocation2 + $0x78] sm:$0xff]  ;;  %428 = vst [vmem:[#allocation2 + $0x21] sm:$0xff] %v341_v12  ;;  %v641_v55 = vrot.slane %v497_v39, 1  ;;  %v3078_v63 = vsel %vm577_vm0, %v619_v21, %v621_v46  ;;  %v259_v18 = vld [vmem:[%s2752_s8 + $0xa8] sm:$0xff]  ;;  %v519_v22 = vld [vmem:[%s4214_s3 + $0x30] sm:$0xff] }
  0x4f   : > { %4276 = vst [vmem:[#allocation5_spill] sm:$0xff] %v3029_v32  ;;  %771 = vmatmul.f32.vlgmr.msra.gmra.mxu2 %v3029_v32  ;;  %v3038_v40 = vld [vmem:[#allocation2 + $0x80] sm:$0xff]  ;;  %v603_v2 = vrot.slane %v3032_v34, 1  ;;  %v3056_v51 = vld [vmem:[#allocation2 + $0x88] sm:$0x3]  ;;  %v301_v26 = vmul.f32 %v2759_v8, %v266_v19  ;;  %829 = vmatpush.msrb.mxu1 %v519_v22  ;;  %v2470_v19 = vld [vmem:[%s4214_s3 + $0x118] sm:$0xff] }
  0x50   : > { %437 = vst [vmem:[#allocation2 + $0x91] sm:$0xff] %v350_v20  ;;  %v3047_v45 = vsel %vm577_vm0, %v638_v27, %v639_v33  ;;  %v604_v47 = vrot.slane %v3038_v40, 1  ;;  %v606_v0 = vrot.slane %v3056_v51, 1  ;;  %v3089_v5 = vld [vmem:[#allocation2 + $0xd8] sm:$0xff]  ;;  %v3097_v14 = vsel %vm577_vm0, %v639_v33, %v641_v55  ;;  %v2488_v39 = vld [vmem:[%s4214_s3 + $0x1a8] sm:$0xff] }
  0x51   : > { %4277 = vst [vmem:[#allocation6_spill] sm:$0xff] %v3047_v45  ;;  %795 = vmatmul.f32.vlgmr.msra.gmra.mxu3 %v3047_v45  ;;  %v3091_v6 = vld [vmem:[#allocation2 + $0xe0] sm:$0xff]  ;;  %v623_v27 = vrot.slane %v3089_v5, 1  ;;  %v336_v52 = vadd.f32 %v2765_v9, %v301_v26  ;;  %830 = vmatpush.msrb.mxu1 %v518_v48  ;;  %v3163_v60 = vld [vmem:[#allocation2 + $0xe8] sm:$0x3]  ;;  %v2485_v48 = vld [vmem:[%s4214_s3 + $0x190] sm:$0xff] }
  0x52   : > { %438 = vst [vmem:[#allocation2 + $0x99] sm:$0xff] %v351_v23  ;;  %v3063_v56 = vsel %vm577_vm0, %v603_v2, %v604_v47  ;;  %v498_v15 = vld [vmem:[#allocation2 + $0x138] sm:$0xff]  ;;  %v353_v23 = vmax.f32 %v321_v61, 0.0  ;;  %v3116_v30 = vsel %vm577_vm0, %v604_v47, %v606_v0  ;;  %1235 = vmatpush.msrb.mxu3 %v2488_v39  ;;  %v626_v25 = vrot.slane %v3163_v60, 1 }
  0x53   : > { %445 = vst [vmem:[#allocation2 + $0xf1] sm:$0xff] %v358_v24  ;;  %753 = vmatmul.f32.gmra.mxu1 %v3063_v56  ;;  %v3103_v20 = vld [vmem:[#allocation2 + $0x140] sm:$0xff]  ;;  %v294_v24 = vmul.f32 %v2759_v8, %v259_v18  ;;  %v643_v43 = vrot.slane %v498_v15, 1  ;;  %v2506_v47 = vld [vmem:[%s4214_s3 + $0x238] sm:$0xff]  ;;  %v500_v61 = vld [vmem:[#allocation2 + $0x148] sm:$0x3] }
  0x54   : > { %4278 = vst [vmem:[#allocation7_spill] sm:$0xff] %v3063_v56  ;;  %v3081_v1 = vld [vmem:[#allocation2 + $0x18] sm:$0xff]  ;;  %v644_v44 = vrot.slane %v3103_v20, 1  ;;  %1405 = vmatpush.msrb.mxu0 %v2506_v47  ;;  %1236 = vmatpush.msrb.mxu3 %v2487_v58  ;;  %v517_v18 = vld [vmem:[%s4214_s3 + $0x20] sm:$0xff]  ;;  %v368_v22 = vmax.f32 %v336_v52, 0.0  ;;  %v2469_v47 = vld [vmem:[%s4214_s3 + $0x110] sm:$0xff] }
  0x55   : > { %446 = vst [vmem:[#allocation2 + $0xf9] sm:$0xff] %v359_v29  ;;  %v3093_v10 = vld [vmem:[#allocation2 + $0x20] sm:$0xff]  ;;  %v583_v12 = vrot.slane %v3081_v1, 1  ;;  %v3105_v21 = vld [vmem:[#allocation2 + $0x28] sm:$0x3]  ;;  %v624_v29 = vrot.slane %v3091_v6, 1  ;;  %v329_v2 = vadd.f32 %v2765_v9, %v294_v24  ;;  %831 = vmatpush.msrb.mxu1 %v517_v18 }
  0x56   : > { %453 = vst [vmem:[#allocation2 + $0x151] sm:$0xff] %v366_v35  ;;  %v584_v16 = vrot.slane %v3093_v10, 1  ;;  %v2472_v35 = vld [vmem:[%s4214_s3 + $0x128] sm:$0xff]  ;;  %v586_v46 = vrot.slane %v3105_v21, 1  ;;  %v3168_v0 = vsel %vm577_vm0, %v643_v43, %v644_v44  ;;  %v516_v39 = vld [vmem:[%s4214_s3 + $0x18] sm:$0xff] }
  0x57   : > { %4279 = vst [vmem:[#allocation8_spill] sm:$0xff] %v3078_v63  ;;  %774 = vmatmul.f32.gmra.mxu2 %v3078_v63  ;;  %v3127_v37 = vld [vmem:[#allocation2 + $0x90] sm:$0xff]  ;;  %v3153_v54 = vsel %vm577_vm0, %v623_v27, %v624_v29  ;;  %v361_v62 = vmax.f32 %v329_v2, 0.0  ;;  %v3224_v52 = vsel %vm577_vm0, %v624_v29, %v626_v25  ;;  %832 = vmatpush.msrb.mxu1 %v516_v39  ;;  %v2468_v20 = vld [vmem:[%s4214_s3 + $0x108] sm:$0xff]  ;;  %v2483_v39 = vld [vmem:[%s4214_s3 + $0x180] sm:$0xff] }
  0x58   : > { %454 = vst [vmem:[#allocation2 + $0x159] sm:$0xff] %v367_v49  ;;  %v3119_v33 = vsel %vm577_vm0, %v583_v12, %v584_v16  ;;  %1073 = vmatpush.msrb.mxu2 %v2472_v35  ;;  %v2471_v49 = vld [vmem:[%s4214_s3 + $0x120] sm:$0xff]  ;;  %v608_v55 = vrot.slane %v3127_v37, 1  ;;  %v3171_v3 = vsel %vm577_vm0, %v584_v16, %v586_v46  ;;  %v646_v35 = vrot.slane %v500_v61, 1 }
  0x59   : > { %429 = vst [vmem:[#allocation2 + $0x31] sm:$0xff] %v342_v53  ;;  %798 = vmatmul.f32.gmra.mxu3 %v3097_v14  ;;  %729 = vmatmul.f32.gmra.mxu0 %v3119_v33  ;;  %v3129_v38 = vld [vmem:[#allocation2 + $0x98] sm:$0xff]  ;;  %v337_v53 = vadd.f32 %v2765_v9, %v302_v42  ;;  %v242_v12 = vld [vmem:[%s2752_s8 + $0x20] sm:$0xff] }
  0x5a   : > { %4280 = vst [vmem:[#allocation9_spill] sm:$0xff] %v3097_v14  ;;  %v609_v57 = vrot.slane %v3129_v38, 1  ;;  %1074 = vmatpush.msrb.mxu2 %v2471_v49  ;;  %v3194_v27 = vld [vmem:[#allocation2 + $0xa0] sm:$0x3] }
  0x5b   : > { %430 = vst [vmem:[#allocation2 + $0x39] sm:$0xff] %v343_v59  ;;  %756 = vmatmul.f32.gmra.mxu1 %v3116_v30  ;;  %v2505_v59 = vld [vmem:[%s4214_s3 + $0x230] sm:$0xff]  ;;  %v369_v16 = vmax.f32 %v337_v53, 0.0  ;;  %v2503_v49 = vld [vmem:[%s4214_s3 + $0x220] sm:$0xff]  ;;  %v611_v53 = vrot.slane %v3194_v27, 1 }
  0x5c   : > { %4281 = vst [vmem:[#allocation10_spill] sm:$0xff] %v3116_v30  ;;  %1406 = vmatpush.msrb.mxu0 %v2505_v59  ;;  %v3192_v26 = vsel %vm577_vm0, %v608_v55, %v609_v57  ;;  %1075 = vmatpush.msrb.mxu2 %v2470_v19  ;;  %v3227_v55 = vld [vmem:[#allocation2 + $0xf0] sm:$0xff]  ;;  %v3229_v58 = vld [vmem:[#allocation2 + $0xf8] sm:$0xff]  ;;  %v3234_v59 = vsel %vm577_vm0, %v644_v44, %v646_v35 }
  0x5d   : > { %439 = vst [vmem:[#allocation2 + $0xa9] sm:$0xff] %v352_v13  ;;  %v243_v13 = vld [vmem:[%s2752_s8 + $0x28] sm:$0xff]  ;;  %v501_v61 = vld [vmem:[#allocation2 + $0x150] sm:$0xff]  ;;  %v628_v44 = vrot.slane %v3227_v55, 1  ;;  %v629_v18 = vrot.slane %v3229_v58, 1  ;;  %v3255_v19 = vsel %vm577_vm0, %v609_v57, %v611_v53  ;;  %v2502_v35 = vld [vmem:[%s4214_s3 + $0x218] sm:$0xff] }
  0x5e   : > { %440 = vst [vmem:[#allocation2 + $0xb1] sm:$0xff] %v353_v23  ;;  %v277_v23 = vmul.f32 %v2759_v8, %v242_v12  ;;  %v278_v24 = vmul.f32 %v2759_v8, %v243_v13  ;;  %v2486_v8 = vld [vmem:[%s4214_s3 + $0x198] sm:$0xff]  ;;  %1407 = vmatpush.msrb.mxu0 %v2504_v36  ;;  %1076 = vmatpush.msrb.mxu2 %v2469_v47  ;;  %v515_v13 = vld [vmem:[%s4214_s3 + $0x10] sm:$0xff]  ;;  %v2467_v36 = vld [vmem:[%s4214_s3 + $0x100] sm:$0xff] }
  0x5f   : > { %4282 = vst [vmem:[#allocation11_spill] sm:$0xff] %v3153_v54  ;;  %777 = vmatmul.f32.gmra.mxu2 %v3153_v54  ;;  %1237 = vmatpush.msrb.mxu3 %v2486_v8  ;;  %v514_v8 = vld [vmem:[%s4214_s3 + $0x8] sm:$0xff] }
  0x60   : > { %447 = vst [vmem:[#allocation2 + $0x109] sm:$0xff] %v360_v50  ;;  %v3173_v4 = vld [vmem:[#allocation2 + $0x30] sm:$0xff]  ;;  %v312_v2 = vadd.f32 %v2765_v9, %v277_v23  ;;  %v313_v42 = vadd.f32 %v2765_v9, %v278_v24  ;;  %1408 = vmatpush.msrb.mxu0 %v2503_v49  ;;  %833 = vmatpush.msrb.mxu1 %v515_v13  ;;  %v2484_v23 = vld [vmem:[%s4214_s3 + $0x188] sm:$0xff]  ;;  %v648_v24 = vrot.slane %v501_v61, 1  ;;  %v3292_v49 = vld [vmem:[#allocation2 + $0x100] sm:$0x3] }
  0x61   : > { %4283 = vst [vmem:[#allocation12_spill] sm:$0xff] %v3168_v0  ;;  %801 = vmatmul.f32.gmra.mxu3 %v3168_v0  ;;  %732 = vmatmul.f32.gmra.mxu0 %v3171_v3  ;;  %v588_v43 = vrot.slane %v3173_v4, 1  ;;  %v2546_v13 = vld [vmem:[%s4214_s3 + $0x378] sm:$0xff] }
  0x62   : > { %v3178_v15 = vld [vmem:[#allocation2 + $0x38] sm:$0xff]  ;;  %448 = vst [vmem:[#allocation2 + $0x111] sm:$0xff] %v361_v62  ;;  %v344_v9 = vmax.f32 %v312_v2, 0.0  ;;  %v345_v50 = vmax.f32 %v313_v42, 0.0  ;;  %1238 = vmatpush.msrb.mxu3 %v2485_v48  ;;  %v3242_v12 = vld [vmem:[#allocation2 + $0x40] sm:$0x3]  ;;  %1077 = vmatpush.msrb.mxu2 %v2468_v20 }
  0x63   : > { %4284 = vst [vmem:[#allocation13_spill] sm:$0xff] %v3192_v26  ;;  %v589_v46 = vrot.slane %v3178_v15, 1  ;;  %759 = vmatmul.f32.gmra.mxu1 %v3192_v26  ;;  %v3236_v62 = vld [vmem:[#allocation2 + $0x158] sm:$0xff]  ;;  %v591_v57 = vrot.slane %v3242_v12, 1  ;;  %1409 = vmatpush.msrb.mxu0 %v2502_v35  ;;  %v2501_v2 = vld [vmem:[%s4214_s3 + $0x210] sm:$0xff]  ;;  %v513_v42 = vld [vmem:[%s4214_s3] sm:$0xff] }
  0x64   : > { %455 = vst [vmem:[#allocation2 + $0x169] sm:$0xff] %v368_v22  ;;  %v3259_v22 = vld [vmem:[#allocation2 + $0xa8] sm:$0xff]  ;;  %v649_v25 = vrot.slane %v3236_v62, 1  ;;  %1239 = vmatpush.msrb.mxu3 %v2484_v23  ;;  %834 = vmatpush.msrb.mxu1 %v514_v8  ;;  %v631_v20 = vrot.slane %v3292_v49, 1 }
  0x65   : > { %456 = vst [vmem:[#allocation2 + $0x171] sm:$0xff] %v369_v16  ;;  %v3239_v29 = vsel %vm577_vm0, %v588_v43, %v589_v46  ;;  %v3261_v16 = vld [vmem:[#allocation2 + $0xb0] sm:$0xff]  ;;  %v3288_v43 = vsel %vm577_vm0, %v628_v44, %v629_v18  ;;  %v613_v47 = vrot.slane %v3259_v22, 1  ;;  %1078 = vmatpush.msrb.mxu2 %v2467_v36  ;;  %1410 = vmatpush.msrb.mxu0 %v2501_v2  ;;  %v3312_v23 = vld [vmem:[#allocation2 + $0xb8] sm:$0x3] }
  0x66   : > { %4285 = vst [vmem:[#allocation14_spill] sm:$0xff] %v3224_v52  ;;  %v614_v48 = vrot.slane %v3261_v16, 1  ;;  %1240 = vmatpush.msrb.mxu3 %v2483_v39  ;;  %v3298_v53 = vsel %vm577_vm0, %v589_v46, %v591_v57  ;;  %835 = vmatpush.msrb.mxu1 %v513_v42  ;;  %v2500_v46 = vld [vmem:[%s4214_s3 + $0x208] sm:$0xff]  ;;  %v2530_v57 = vld [vmem:[%s4214_s3 + $0x2f8] sm:$0xff]  ;;  %v2499_v39 = vld [vmem:[%s4214_s3 + $0x200] sm:$0xff]  ;;  %v3332_v2 = vsel %vm577_vm0, %v629_v18, %v631_v20  ;;  %v616_v42 = vrot.slane %v3312_v23, 1 }
  0x67   : > { %431 = vst [vmem:[#allocation2 + $0x49] sm:$0xff] %v344_v9  ;;  %780 = vmatmul.f32.gmra.mxu2 %v3224_v52  ;;  %v3295_v9 = vsel %vm577_vm0, %v648_v24, %v649_v25  ;;  %v2562_v24 = vld [vmem:[%s4214_s3 + $0x3f8] sm:$0xff]  ;;  %1411 = vmatpush.msrb.mxu0 %v2500_v46 }
  0x68   : > { %4286 = vst [vmem:[#allocation15_spill] sm:$0xff] %v3234_v59  ;;  %v3310_v44 = vsel %vm577_vm0, %v613_v47, %v614_v48  ;;  %1728 = vmatpush.msra.mxu2 %v2546_v13  ;;  %1900 = vmatpush.msra.mxu3 %v2562_v24  ;;  %v3335_v47 = vld [vmem:[#allocation2 + $0x108] sm:$0xff] }
  0x69   : > { %432 = vst [vmem:[#allocation2 + $0x51] sm:$0xff] %v345_v50  ;;  %804 = vmatmul.f32.gmra.mxu3 %v3234_v59  ;;  %735 = vmatmul.f32.gmra.mxu0 %v3239_v29  ;;  %v503_v50 = vld [vmem:[#allocation2 + $0x160] sm:$0x3] }
  0x6a   : > { %4287 = vst [vmem:[#allocation16_spill] sm:$0xff] %v3255_v19  ;;  %v651_v35 = vrot.slane %v503_v50, 1  ;;  %1566 = vmatpush.msra.mxu1 %v2530_v57  ;;  %1412 = vmatpush.msrb.mxu0 %v2499_v39  ;;  %v3337_v50 = vld [vmem:[#allocation2 + $0x110] sm:$0xff]  ;;  %v633_v57 = vrot.slane %v3335_v47, 1 }
  0x6b   : > { %762 = vmatmul.f32.gmra.mxu1 %v3255_v19  ;;  %4288 = vst [vmem:[#allocation17_spill] sm:$0xff] %v3295_v9  ;;  %v3346_v24 = vld [vmem:[#allocation2 + $0x168] sm:$0xff]  ;;  %v634_v39 = vrot.slane %v3337_v50, 1 }
  0x6c   : > { %4289 = vst [vmem:[#allocation18_spill] sm:$0xff] %v3310_v44  ;;  %v3340_v13 = vsel %vm577_vm0, %v649_v25, %v651_v35  ;;  %v3348_v18 = vld [vmem:[#allocation2 + $0x170] sm:$0xff]  ;;  %v2578_v25 = vld [vmem:[%s4214_s3 + $0x478] sm:$0xff]  ;;  %v653_v35 = vrot.slane %v3346_v24, 1 }
  0x6d   : > { %4290 = vst [vmem:[#allocation19_spill] sm:$0xff] %v3340_v13  ;;  %2069 = vmatpush.msra.mxu0 %v2578_v25  ;;  %v2545_v25 = vld [vmem:[%s4214_s3 + $0x370] sm:$0xff] }
  0x6e   : > { %v3301_v61 = vld [vmem:[#allocation2 + $0x48] sm:$0xff]  ;;  %4291 = vst [vmem:[#allocation20_spill] sm:$0xff] %v3346_v24  ;;  %v3378_v24 = vld [vmem:[#allocation2 + $0x178] sm:$0x3]  ;;  %1729 = vmatpush.msra.mxu2 %v2545_v25 }
  0x6f   : > { %783 = vmatmul.f32.gmra.mxu2 %v3288_v43  ;;  %v593_v8 = vrot.slane %v3301_v61, 1  ;;  %4292 = vst [vmem:[#allocation21_spill] sm:$0xff] %v3348_v18 }
  0x70   : > { %v3303_v62 = vld [vmem:[#allocation2 + $0x50] sm:$0xff]  ;;  %v3350_v20 = vld [vmem:[#allocation2 + $0x58] sm:$0x3] }
  0x71   : > { %807 = vmatmul.f32.gmra.mxu3 %v3295_v9  ;;  %738 = vmatmul.f32.gmra.mxu0 %v3298_v53  ;;  %v594_v36 = vrot.slane %v3303_v62, 1  ;;  %v3355_v9 = vsel %vm577_vm0, %v614_v48, %v616_v42  ;;  %v596_v59 = vrot.slane %v3350_v20, 1  ;;  %v3367_v48 = vsel %vm577_vm0, %v633_v57, %v634_v39  ;;  %v3369_v42 = vld [vmem:[#allocation2 + $0x118] sm:$0x3] }
  0x72   : > { %4293 = vst [vmem:[#allocation22_spill] sm:$0xff] %v3355_v9  ;;  %v656_v57 = vrot.slane %v3378_v24, 1 }
  0x73   : > { %765 = vmatmul.f32.gmra.mxu1 %v3310_v44  ;;  %v3343_v46 = vsel %vm577_vm0, %v593_v8, %v594_v36  ;;  %v654_v8 = vrot.slane %v3348_v18, 1  ;;  %v3375_v0 = vsel %vm577_vm0, %v594_v36, %v596_v59  ;;  %v636_v18 = vrot.slane %v3369_v42, 1  ;;  %v2561_v59 = vld [vmem:[%s4214_s3 + $0x3f0] sm:$0xff] }
  0x74   : > { %v2529_v36 = vld [vmem:[%s4214_s3 + $0x2f0] sm:$0xff]  ;;  %1901 = vmatpush.msra.mxu3 %v2561_v59 }
  0x75   : > { %1567 = vmatpush.msra.mxu1 %v2529_v36  ;;  %v3394_v25 = vsel %vm577_vm0, %v634_v39, %v636_v18  ;;  %v2577_v59 = vld [vmem:[%s4214_s3 + $0x470] sm:$0xff]  ;;  %v2544_v18 = vld [vmem:[%s4214_s3 + $0x368] sm:$0xff]  ;;  %v937_v39 = vrot.slane %v2919_v7, 2  ;;  %v939_v7 = vrot.slane %v3081_v1, 2 }
  0x76   : > { %2070 = vmatpush.msra.mxu0 %v2577_v59  ;;  %1730 = vmatpush.msra.mxu2 %v2544_v18  ;;  %v2527_v59 = vld [vmem:[%s4214_s3 + $0x2e0] sm:$0xff] }
  0x77   : > { %786 = vmatmul.f32.gmra.mxu2 %v3332_v2 }
  0x79   : > { %810 = vmatmul.f32.gmra.mxu3 %v3340_v13  ;;  %741 = vmatmul.f32.gmra.mxu0 %v3343_v46  ;;  %v3372_v13 = vsel %vm577_vm0, %v653_v35, %v654_v8  ;;  %v2642_v35 = vld [vmem:[#allocation2] sm:$0xff] }
  0x7a   : > { %4294 = vst [vmem:[#allocation23_spill] sm:$0xff] %v3372_v13  ;;  %v934_v14 = vrot.slane %v2642_v35, 2 }
  0x7b   : > { %768 = vmatmul.f32.gmra.mxu1 %v3355_v9 }
  0x7c   : > { %v938_v36 = vsel %vm933_vm1, %v934_v14, %v937_v39  ;;  %v945_v39 = vrot.slane %v3178_v15, 2 }
  0x7f   : > { %789 = vmatmul.f32.gmra.mxu2 %v3367_v48 }
  0x81   : > { %813 = vmatmul.f32.gmra.mxu3 %v3372_v13  ;;  %744 = vmatmul.f32.gmra.mxu0 %v3375_v0  ;;  %v3397_v13 = vsel %vm577_vm0, %v654_v8, %v656_v57  ;;  %v2528_v8 = vld [vmem:[%s4214_s3 + $0x2e8] sm:$0xff]  ;;  %v940_v57 = vrot.slane %v3093_v10, 2 }
  0x82   : > { %4295 = vst [vmem:[#allocation24_spill] sm:$0xff] %v3397_v13  ;;  %1568 = vmatpush.msra.mxu1 %v2528_v8 }
  0x83   : > { %836 = vmatmul.f32.vlgmr.msrb.gmra.mxu1 %v2642_v35 }
  0x84   : > { %1569 = vmatpush.msra.mxu1 %v2527_v59  ;;  %v952_v59 = vrot.slane %v3350_v20, 2 }
  0x87   : > { %792 = vmatmul.f32.gmra.mxu2 %v3394_v25 }
  0x89   : > { %816 = vmatmul.f32.gmra.mxu3 %v3397_v13  ;;  %1413 = vmatmul.f32.vlgmr.msrb.gmra.mxu0 %v3119_v33  ;;  %v2560_v33 = vld [vmem:[%s4214_s3 + $0x3e8] sm:$0xff] }
  0x8a   : > { %1902 = vmatpush.msra.mxu3 %v2560_v33  ;;  %v2575_v33 = vld [vmem:[%s4214_s3 + $0x460] sm:$0xff] }
  0x8b   : > { %839 = vmatmul.f32.gmra.mxu1 %v2642_v35  ;;  %v3428_v35 = vsel %vm933_vm1, %v939_v7, %v940_v57  ;;  %v2526_v7 = vld [vmem:[%s4214_s3 + $0x2d8] sm:$0xff] }
  0x8c   : > { %1570 = vmatpush.msra.mxu1 %v2526_v7 }
  0x8f   : > { %1079 = vmatmul.f32.vlgmr.msrb.gmra.mxu2 %v934_v14  ;;  %v942_v14 = vrot.slane %v3105_v21, 2  ;;  %v944_v21 = vrot.slane %v3173_v4, 2 }
  0x91   : > { %1241 = vmatmul.f32.vlgmr.msrb.gmra.mxu3 %v3081_v1  ;;  %1416 = vmatmul.f32.gmra.mxu0 %v3171_v3  ;;  %v2576_v3 = vld [vmem:[%s4214_s3 + $0x468] sm:$0xff]  ;;  %v3445_v18 = vsel %vm933_vm1, %v940_v57, %v942_v14  ;;  %v3457_v8 = vsel %vm933_vm1, %v944_v21, %v945_v39  ;;  %v3495_v21 = vld [vmem:[#allocation2 + $0x60] sm:$0xff] }
  0x92   : > { %2071 = vmatpush.msra.mxu0 %v2576_v3  ;;  %v950_v3 = vrot.slane %v3303_v62, 2  ;;  %4296 = vst [vmem:[#allocation25_spill] sm:$0xff] %v3495_v21 }
  0x93   : > { %842 = vmatmul.f32.gmra.mxu1 %v3081_v1  ;;  %v2543_v1 = vld [vmem:[%s4214_s3 + $0x360] sm:$0xff] }
  0x94   : > { %1731 = vmatpush.msra.mxu2 %v2543_v1  ;;  %2072 = vmatpush.msra.mxu0 %v2575_v33  ;;  %v2574_v1 = vld [vmem:[%s4214_s3 + $0x458] sm:$0xff]  ;;  %v2525_v33 = vld [vmem:[%s4214_s3 + $0x2d0] sm:$0xff]  ;;  %v3509_v20 = vsel %vm933_vm1, %v950_v3, %v952_v59 }
  0x95   : > { %1571 = vmatpush.msra.mxu1 %v2525_v33  ;;  %v2645_v59 = vld [vmem:[#allocation2 + $0x70] sm:$0x3] }
  0x96   : > { %2073 = vmatpush.msra.mxu0 %v2574_v1 }
  0x97   : > { %1082 = vmatmul.f32.gmra.mxu2 %v938_v36  ;;  %v947_v36 = vrot.slane %v3242_v12, 2  ;;  %v949_v12 = vrot.slane %v3301_v61, 2 }
  0x99   : > { %1244 = vmatmul.f32.gmra.mxu3 %v3093_v10  ;;  %1419 = vmatmul.f32.gmra.mxu0 %v3239_v29  ;;  %v3474_v57 = vsel %vm933_vm1, %v945_v39, %v947_v36  ;;  %v3486_v14 = vsel %vm933_vm1, %v949_v12, %v950_v3  ;;  %v954_v36 = vrot.slane %v3495_v21, 2  ;;  %v2573_v12 = vld [vmem:[%s4214_s3 + $0x450] sm:$0xff] }
  0x9a   : > { %2074 = vmatpush.msra.mxu0 %v2573_v12 }
  0x9b   : > { %845 = vmatmul.f32.gmra.mxu1 %v3093_v10  ;;  %v2559_v10 = vld [vmem:[%s4214_s3 + $0x3e0] sm:$0xff] }
  0x9c   : > { %1903 = vmatpush.msra.mxu3 %v2559_v10 }
  0x9f   : > { %1085 = vmatmul.f32.gmra.mxu2 %v3428_v35 }
  0xa1   : > { %1247 = vmatmul.f32.gmra.mxu3 %v3173_v4  ;;  %1422 = vmatmul.f32.gmra.mxu0 %v3298_v53 }
  0xa3   : > { %848 = vmatmul.f32.gmra.mxu1 %v3173_v4  ;;  %v2542_v4 = vld [vmem:[%s4214_s3 + $0x358] sm:$0xff] }
  0xa4   : > { %1732 = vmatpush.msra.mxu2 %v2542_v4 }
  0xa7   : > { %1088 = vmatmul.f32.gmra.mxu2 %v3445_v18 }
  0xa8   : > { %v3488_v10 = vpop.f32.mrf.mxu1 }
  0xa9   : > { %1250 = vmatmul.f32.gmra.mxu3 %v3178_v15  ;;  %1425 = vmatmul.f32.gmra.mxu0 %v3343_v46 }
  0xab   : > { %851 = vmatmul.f32.gmra.mxu1 %v3178_v15  ;;  %v2558_v15 = vld [vmem:[%s4214_s3 + $0x3d8] sm:$0xff]  ;;  %v3502_v39 = vpop.f32.mrf.mxu0 }
  0xac   : > { %1904 = vmatpush.msra.mxu3 %v2558_v15  ;;  %v3515_v15 = vld [vmem:[#allocation2 + $0x68] sm:$0xff] }
  0xad   : > { %4297 = vst [vmem:[#allocation26_spill] sm:$0xff] %v3515_v15  ;;  %v955_v7 = vrot.slane %v3515_v15, 2 }
  0xaf   : > { %1091 = vmatmul.f32.gmra.mxu2 %v3457_v8  ;;  %v3525_v3 = vsel %vm933_vm1, %v954_v36, %v955_v7  ;;  %v2556_v36 = vld [vmem:[%s4214_s3 + $0x3c8] sm:$0xff] }
  0xb0   : > { %v3511_v4 = vpop.f32.mrf.mxu1 }
  0xb1   : > { %1253 = vmatmul.f32.gmra.mxu3 %v3301_v61  ;;  %1428 = vmatmul.f32.gmra.mxu0 %v3375_v0 }
  0xb3   : > { %854 = vmatmul.f32.gmra.mxu1 %v3301_v61  ;;  %v2541_v61 = vld [vmem:[%s4214_s3 + $0x350] sm:$0xff]  ;;  %v3527_v1 = vpop.f32.mrf.mxu0 }
  0xb4   : > { %1733 = vmatpush.msra.mxu2 %v2541_v61  ;;  %v2540_v61 = vld [vmem:[%s4214_s3 + $0x348] sm:$0xff] }
  0xb6   : > { %1734 = vmatpush.msra.mxu2 %v2540_v61 }
  0xb7   : > { %1094 = vmatmul.f32.gmra.mxu2 %v3474_v57 }
  0xb9   : > { %1256 = vmatmul.f32.gmra.mxu3 %v3303_v62  ;;  %1431 = vmatmul.f32.gmra.mxu0 %v2828_v31 }
  0xbb   : > { %857 = vmatmul.f32.gmra.mxu1 %v3303_v62  ;;  %v2557_v62 = vld [vmem:[%s4214_s3 + $0x3d0] sm:$0xff] }
  0xbc   : > { %1905 = vmatpush.msra.mxu3 %v2557_v62  ;;  %v957_v62 = vrot.slane %v2645_v59, 2 }
  0xbe   : > { %1906 = vmatpush.msra.mxu3 %v2556_v36  ;;  %v3549_v61 = vsel %vm933_vm1, %v955_v7, %v957_v62  ;;  %v960_v36 = vrot.slane %v3038_v40, 2  ;;  %v2572_v7 = vld [vmem:[%s4214_s3 + $0x448] sm:$0xff] }
  0xbf   : > { %1097 = vmatmul.f32.gmra.mxu2 %v3486_v14  ;;  %4299 = vst [vmem:[#allocation28_spill] sm:$0xff] %v3549_v61  ;;  %2075 = vmatpush.msra.mxu0 %v2572_v7  ;;  %v2523_v7 = vld [vmem:[%s4214_s3 + $0x2c0] sm:$0xff] }
  0xc1   : > { %1259 = vmatmul.f32.gmra.mxu3 %v3495_v21  ;;  %1434 = vmatmul.f32.gmra.mxu0 %v2864_v41  ;;  %v959_v41 = vrot.slane %v3032_v34, 2 }
  0xc3   : > { %860 = vmatmul.f32.gmra.mxu1 %v3495_v21 }
  0xc7   : > { %1100 = vmatmul.f32.gmra.mxu2 %v3509_v20 }
  0xc9   : > { %1262 = vmatmul.f32.gmra.mxu3 %v3515_v15  ;;  %1437 = vmatmul.f32.gmra.mxu0 %v3063_v56  ;;  %v2524_v56 = vld [vmem:[%s4214_s3 + $0x2c8] sm:$0xff] }
  0xca   : > { %1572 = vmatpush.msra.mxu1 %v2524_v56 }
  0xcb   : > { %863 = vmatmul.f32.gmra.mxu1 %v3515_v15 }
  0xcc   : > { %1573 = vmatpush.msra.mxu1 %v2523_v7 }
  0xcf   : > { %1103 = vmatmul.f32.gmra.mxu2 %v3525_v3 }
  0xd0   : > { %v3533_v33 = vpop.f32.mrf.mxu1 }
  0xd1   : > { %1265 = vmatmul.f32.gmra.mxu3 %v3032_v34  ;;  %1440 = vmatmul.f32.gmra.mxu0 %v3116_v30 }
  0xd2   : > { %v3540_v12 = vpop.f32.mrf.mxu2 }
  0xd3   : > { %866 = vmatmul.f32.gmra.mxu1 %v3032_v34  ;;  %v3569_v34 = vsel %vm933_vm1, %v959_v41, %v960_v36  ;;  %v2555_v41 = vld [vmem:[%s4214_s3 + $0x3c0] sm:$0xff] }
  0xd4   : > { %v3546_v59 = vpop.f32.mrf.mxu3  ;;  %4301 = vst [vmem:[#allocation30_spill] sm:$0xff] %v3569_v34  ;;  %1907 = vmatpush.msra.mxu3 %v2555_v41  ;;  %v965_v41 = vrot.slane %v3129_v38, 2 }
  0xd5   : > { %4298 = vst [vmem:[#allocation27_spill] sm:$0xff] %v3546_v59 }
  0xd6   : > { %v3551_v30 = vpop.f32.mrf.mxu0 }
  0xd7   : > { %1106 = vmatmul.f32.gmra.mxu2 %v3549_v61  ;;  %v962_v61 = vrot.slane %v3056_v51, 2 }
  0xd8   : > { %v3556_v15 = vpop.f32.mrf.mxu1 }
  0xd9   : > { %1268 = vmatmul.f32.gmra.mxu3 %v3038_v40  ;;  %1443 = vmatmul.f32.gmra.mxu0 %v3192_v26  ;;  %v2539_v26 = vld [vmem:[%s4214_s3 + $0x340] sm:$0xff] }
  0xda   : > { %v3563_v62 = vpop.f32.mrf.mxu2  ;;  %1735 = vmatpush.msra.mxu2 %v2539_v26  ;;  %v3594_v26 = vsel %vm933_vm1, %v960_v36, %v962_v61  ;;  %v2571_v61 = vld [vmem:[%s4214_s3 + $0x440] sm:$0xff] }
  0xdb   : > { %869 = vmatmul.f32.gmra.mxu1 %v3038_v40  ;;  %4303 = vst [vmem:[#allocation32_spill] sm:$0xff] %v3594_v26  ;;  %2076 = vmatpush.msra.mxu0 %v2571_v61 }
  0xdc   : > { %v3566_v56 = vpop.f32.mrf.mxu3 }
  0xdd   : > { %4300 = vst [vmem:[#allocation29_spill] sm:$0xff] %v3566_v56  ;;  %v964_v56 = vrot.slane %v3127_v37, 2 }
  0xde   : > { %v3571_v59 = vpop.f32.mrf.mxu0 }
  0xdf   : > { %1109 = vmatmul.f32.gmra.mxu2 %v3569_v34 }
  0xe0   : > { %v3578_v31 = vpop.f32.mrf.mxu1 }
  0xe1   : > { %1271 = vmatmul.f32.gmra.mxu3 %v3127_v37  ;;  %1446 = vmatmul.f32.gmra.mxu0 %v3255_v19 }
  0xe2   : > { %v3585_v40 = vpop.f32.mrf.mxu2 }
  0xe3   : > { %872 = vmatmul.f32.gmra.mxu1 %v3127_v37  ;;  %v3614_v37 = vsel %vm933_vm1, %v964_v56, %v965_v41 }
  0xe4   : > { %v3591_v51 = vpop.f32.mrf.mxu3  ;;  %4305 = vst [vmem:[#allocation34_spill] sm:$0xff] %v3614_v37 }
  0xe5   : > { %4302 = vst [vmem:[#allocation31_spill] sm:$0xff] %v3591_v51 }
  0xe6   : > { %v3596_v19 = vpop.f32.mrf.mxu0 }
  0xe7   : > { %1112 = vmatmul.f32.gmra.mxu2 %v3594_v26  ;;  %v967_v26 = vrot.slane %v3194_v27, 2  ;;  %v2522_v27 = vld [vmem:[%s4214_s3 + $0x2b8] sm:$0xff] }
  0xe8   : > { %v3601_v34 = vpop.f32.mrf.mxu1  ;;  %1574 = vmatpush.msra.mxu1 %v2522_v27 }
  0xe9   : > { %1274 = vmatmul.f32.gmra.mxu3 %v3129_v38  ;;  %1449 = vmatmul.f32.gmra.mxu0 %v3310_v44  ;;  %v2538_v44 = vld [vmem:[%s4214_s3 + $0x338] sm:$0xff] }
  0xea   : > { %v3608_v36 = vpop.f32.mrf.mxu2  ;;  %1736 = vmatpush.msra.mxu2 %v2538_v44  ;;  %v3639_v44 = vsel %vm933_vm1, %v965_v41, %v967_v26  ;;  %v2570_v26 = vld [vmem:[%s4214_s3 + $0x438] sm:$0xff] }
  0xeb   : > { %875 = vmatmul.f32.gmra.mxu1 %v3129_v38  ;;  %v2554_v38 = vld [vmem:[%s4214_s3 + $0x3b8] sm:$0xff]  ;;  %4308 = vst [vmem:[#allocation37_spill] sm:$0xff] %v3639_v44  ;;  %2077 = vmatpush.msra.mxu0 %v2570_v26  ;;  %v2521_v26 = vld [vmem:[%s4214_s3 + $0x2b0] sm:$0xff] }
  0xec   : > { %v3611_v7 = vpop.f32.mrf.mxu3  ;;  %1908 = vmatpush.msra.mxu3 %v2554_v38  ;;  %v970_v38 = vrot.slane %v3261_v16, 2  ;;  %1575 = vmatpush.msra.mxu1 %v2521_v26  ;;  %v2536_v26 = vld [vmem:[%s4214_s3 + $0x328] sm:$0xff] }
  0xed   : > { %4304 = vst [vmem:[#allocation33_spill] sm:$0xff] %v3611_v7  ;;  %v969_v7 = vrot.slane %v3259_v22, 2 }
  0xee   : > { %v3616_v51 = vpop.f32.mrf.mxu0 }
  0xef   : > { %1115 = vmatmul.f32.gmra.mxu2 %v3614_v37 }
  0xf0   : > { %v3623_v21 = vpop.f32.mrf.mxu1 }
  0xf1   : > { %1277 = vmatmul.f32.gmra.mxu3 %v3259_v22  ;;  %1452 = vmatmul.f32.gmra.mxu0 %v3355_v9 }
  0xf2   : > { %v3630_v56 = vpop.f32.mrf.mxu2 }
  0xf3   : > { %4306 = vst [vmem:[#allocation35_spill] sm:$0xff] %v3630_v56  ;;  %878 = vmatmul.f32.gmra.mxu1 %v3259_v22  ;;  %v3659_v22 = vsel %vm933_vm1, %v969_v7, %v970_v38 }
  0xf4   : > { %v3636_v61 = vpop.f32.mrf.mxu3  ;;  %4310 = vst [vmem:[#allocation39_spill] sm:$0xff] %v3659_v22 }
  0xf5   : > { %4307 = vst [vmem:[#allocation36_spill] sm:$0xff] %v3636_v61 }
  0xf6   : > { %v3641_v9 = vpop.f32.mrf.mxu0 }
  0xf7   : > { %1118 = vmatmul.f32.gmra.mxu2 %v3639_v44  ;;  %v972_v44 = vrot.slane %v3312_v23, 2 }
  0xf8   : > { %v3646_v37 = vpop.f32.mrf.mxu1 }
  0xf9   : > { %1280 = vmatmul.f32.gmra.mxu3 %v3261_v16  ;;  %1455 = vmatmul.f32.gmra.mxu0 %v3029_v32  ;;  %v2537_v32 = vld [vmem:[%s4214_s3 + $0x330] sm:$0xff] }
  0xfa   : > { %v3653_v41 = vpop.f32.mrf.mxu2  ;;  %1737 = vmatpush.msra.mxu2 %v2537_v32  ;;  %v3682_v32 = vsel %vm933_vm1, %v970_v38, %v972_v44 }
  0xfb   : > { %881 = vmatmul.f32.gmra.mxu1 %v3261_v16  ;;  %v2553_v16 = vld [vmem:[%s4214_s3 + $0x3b0] sm:$0xff]  ;;  %4313 = vst [vmem:[#allocation42_spill] sm:$0xff] %v3682_v32 }
  0xfc   : > { %v3656_v27 = vpop.f32.mrf.mxu3  ;;  %1909 = vmatpush.msra.mxu3 %v2553_v16  ;;  %1738 = vmatpush.msra.mxu2 %v2536_v26 }
  0xfd   : > { %4309 = vst [vmem:[#allocation38_spill] sm:$0xff] %v3656_v27  ;;  %v974_v27 = vrot.slane %v3003_v11, 2 }
  0xfe   : > { %v3661_v61 = vpop.f32.mrf.mxu0 }
  0xff   : > { %1121 = vmatmul.f32.gmra.mxu2 %v3659_v22  ;;  %v975_v22 = vrot.slane %v3013_v17, 2 }
 0x100   : > { %v837_v56 = vpop.f32.mrf.mxu1 }
 0x101   : > { %1283 = vmatmul.f32.gmra.mxu3 %v3003_v11  ;;  %1458 = vmatmul.f32.gmra.mxu0 %v3078_v63 }
 0x102   : > { %v3673_v7 = vpop.f32.mrf.mxu2 }
 0x103   : > { %4311 = vst [vmem:[#allocation40_spill] sm:$0xff] %v3673_v7  ;;  %884 = vmatmul.f32.gmra.mxu1 %v3003_v11  ;;  %v3698_v11 = vsel %vm933_vm1, %v974_v27, %v975_v22 }
 0x104   : > { %v3679_v23 = vpop.f32.mrf.mxu3  ;;  %4316 = vst [vmem:[#allocation45_spill] sm:$0xff] %v3698_v11 }
 0x105   : > { %4312 = vst [vmem:[#allocation41_spill] sm:$0xff] %v3679_v23  ;;  %v2569_v23 = vld [vmem:[%s4214_s3 + $0x430] sm:$0xff] }
 0x106   : > { %v1414_v63 = vpop.f32.mrf.mxu0  ;;  %2078 = vmatpush.msra.mxu0 %v2569_v23  ;;  %v838_v23 = vadd.f32 %v837_v56, %v3502_v39 }
 0x107   : > { %1124 = vmatmul.f32.gmra.mxu2 %v3682_v32 }
 0x108   : > { %v840_v16 = vpop.f32.mrf.mxu1 }
 0x109   : > { %1286 = vmatmul.f32.gmra.mxu3 %v3013_v17  ;;  %1461 = vmatmul.f32.gmra.mxu0 %v3153_v54  ;;  %v977_v54 = vrot.slane %v3024_v28, 2  ;;  %v2520_v28 = vld [vmem:[%s4214_s3 + $0x2a8] sm:$0xff] }
 0x10a   : > { %v3692_v7 = vpop.f32.mrf.mxu2  ;;  %1576 = vmatpush.msra.mxu1 %v2520_v28 }
 0x10b   : > { %4314 = vst [vmem:[#allocation43_spill] sm:$0xff] %v3692_v7  ;;  %887 = vmatmul.f32.gmra.mxu1 %v3013_v17  ;;  %v2552_v17 = vld [vmem:[%s4214_s3 + $0x3a8] sm:$0xff]  ;;  %v3716_v39 = vsel %vm933_vm1, %v975_v22, %v977_v54  ;;  %v841_v7 = vadd.f32 %v840_v16, %v3527_v1  ;;  %v2535_v16 = vld [vmem:[%s4214_s3 + $0x320] sm:$0xff] }
 0x10c   : > { %v3695_v44 = vpop.f32.mrf.mxu3  ;;  %1910 = vmatpush.msra.mxu3 %v2552_v17  ;;  %v979_v17 = vrot.slane %v3089_v5, 2  ;;  %v2568_v54 = vld [vmem:[%s4214_s3 + $0x428] sm:$0xff]  ;;  %1739 = vmatpush.msra.mxu2 %v2535_v16  ;;  %v985_v16 = vrot.slane %v3229_v58, 2 }
 0x10d   : > { %4315 = vst [vmem:[#allocation44_spill] sm:$0xff] %v3695_v44  ;;  %2079 = vmatpush.msra.mxu0 %v2568_v54 }
 0x10e   : > { %v1417_v38 = vpop.f32.mrf.mxu0 }
 0x10f   : > { %1127 = vmatmul.f32.gmra.mxu2 %v3698_v11 }
 0x110   : > { %v843_v32 = vpop.f32.mrf.mxu1 }
 0x111   : > { %1289 = vmatmul.f32.gmra.mxu3 %v3089_v5  ;;  %1464 = vmatmul.f32.gmra.mxu0 %v3224_v52 }
 0x112   : > { %v1080_v27 = vpop.f32.mrf.mxu2 }
 0x113   : > { %v1176_v44 = vadd.f32 %v1080_v27, %v838_v23  ;;  %890 = vmatmul.f32.gmra.mxu1 %v3089_v5  ;;  %v980_v23 = vrot.slane %v3091_v6, 2 }
 0x114   : > { %v1242_v26 = vpop.f32.mrf.mxu3 }
 0x115   : > { %v1338_v56 = vadd.f32 %v1242_v26, %v1176_v44  ;;  %v3731_v5 = vsel %vm933_vm1, %v979_v17, %v980_v23 }
 0x116   : > { %v1420_v52 = vpop.f32.mrf.mxu0 }
 0x117   : > { %v3718_v11 = vadd.f32 %v1414_v63, %v1338_v56  ;;  %1130 = vmatmul.f32.gmra.mxu2 %v3716_v39  ;;  %v982_v56 = vrot.slane %v3163_v60, 2  ;;  %v2519_v60 = vld [vmem:[%s4214_s3 + $0x2a0] sm:$0xff] }
 0x118   : > { %v846_v27 = vpop.f32.mrf.mxu1  ;;  %1577 = vmatpush.msra.mxu1 %v2519_v60 }
 0x119   : > { %1292 = vmatmul.f32.gmra.mxu3 %v3091_v6  ;;  %1467 = vmatmul.f32.gmra.mxu0 %v3288_v43 }
 0x11a   : > { %v1083_v22 = vpop.f32.mrf.mxu2 }
 0x11b   : > { %v1177_v63 = vadd.f32 %v1083_v22, %v841_v7  ;;  %893 = vmatmul.f32.gmra.mxu1 %v3091_v6  ;;  %v844_v6 = vadd.f32 %v843_v32, %v3551_v30  ;;  %v2551_v7 = vld [vmem:[%s4214_s3 + $0x3a0] sm:$0xff]  ;;  %v3751_v30 = vsel %vm933_vm1, %v980_v23, %v982_v56 }
 0x11c   : > { %v1245_v44 = vpop.f32.mrf.mxu3  ;;  %1911 = vmatpush.msra.mxu3 %v2551_v7  ;;  %v847_v7 = vadd.f32 %v846_v27, %v3571_v59  ;;  %v2567_v23 = vld [vmem:[%s4214_s3 + $0x420] sm:$0xff]  ;;  %v2534_v27 = vld [vmem:[%s4214_s3 + $0x318] sm:$0xff] }
 0x11d   : > { %v1339_v28 = vadd.f32 %v1245_v44, %v1177_v63  ;;  %2080 = vmatpush.msra.mxu0 %v2567_v23  ;;  %1740 = vmatpush.msra.mxu2 %v2534_v27 }
 0x11e   : > { %v1423_v26 = vpop.f32.mrf.mxu0 }
 0x11f   : > { %v3733_v1 = vadd.f32 %v1417_v38, %v1339_v28  ;;  %1133 = vmatmul.f32.gmra.mxu2 %v3731_v5  ;;  %v984_v28 = vrot.slane %v3227_v55, 2 }
 0x120   : > { %v849_v54 = vpop.f32.mrf.mxu1 }
 0x121   : > { %1295 = vmatmul.f32.gmra.mxu3 %v3227_v55  ;;  %1470 = vmatmul.f32.gmra.mxu0 %v3332_v2 }
 0x122   : > { %v1086_v38 = vpop.f32.mrf.mxu2 }
 0x123   : > { %v1178_v17 = vadd.f32 %v1086_v38, %v844_v6  ;;  %896 = vmatmul.f32.gmra.mxu1 %v3227_v55  ;;  %v3766_v55 = vsel %vm933_vm1, %v984_v28, %v985_v16 }
 0x124   : > { %v1248_v22 = vpop.f32.mrf.mxu3 }
 0x125   : > { %v1340_v32 = vadd.f32 %v1248_v22, %v1178_v17  ;;  %v987_v22 = vrot.slane %v3292_v49, 2  ;;  %v2518_v49 = vld [vmem:[%s4214_s3 + $0x298] sm:$0xff] }
 0x126   : > { %v1426_v63 = vpop.f32.mrf.mxu0  ;;  %1578 = vmatpush.msra.mxu1 %v2518_v49  ;;  %v992_v49 = vrot.slane %v3369_v42, 2  ;;  %v2517_v42 = vld [vmem:[%s4214_s3 + $0x290] sm:$0xff] }
 0x127   : > { %v3753_v44 = vadd.f32 %v1420_v52, %v1340_v32  ;;  %1136 = vmatmul.f32.gmra.mxu2 %v3751_v30 }
 0x128   : > { %v852_v6 = vpop.f32.mrf.mxu1  ;;  %1579 = vmatpush.msra.mxu1 %v2517_v42 }
 0x129   : > { %1298 = vmatmul.f32.gmra.mxu3 %v3229_v58  ;;  %1473 = vmatmul.f32.gmra.mxu0 %v3367_v48 }
 0x12a   : > { %v1089_v56 = vpop.f32.mrf.mxu2 }
 0x12b   : > { %v1179_v52 = vadd.f32 %v1089_v56, %v847_v7  ;;  %899 = vmatmul.f32.gmra.mxu1 %v3229_v58  ;;  %v850_v58 = vadd.f32 %v849_v54, %v3596_v19  ;;  %v3786_v19 = vsel %vm933_vm1, %v985_v16, %v987_v22  ;;  %v2566_v16 = vld [vmem:[%s4214_s3 + $0x418] sm:$0xff] }
 0x12c   : > { %v1251_v38 = vpop.f32.mrf.mxu3  ;;  %2081 = vmatpush.msra.mxu0 %v2566_v16 }
 0x12d   : > { %v1341_v17 = vadd.f32 %v1251_v38, %v1179_v52  ;;  %v989_v38 = vrot.slane %v3335_v47, 2 }
 0x12e   : > { %v1429_v60 = vpop.f32.mrf.mxu0 }
 0x12f   : > { %v3768_v59 = vadd.f32 %v1423_v26, %v1341_v17  ;;  %1139 = vmatmul.f32.gmra.mxu2 %v3766_v55  ;;  %v2550_v26 = vld [vmem:[%s4214_s3 + $0x398] sm:$0xff]  ;;  %v990_v17 = vrot.slane %v3337_v50, 2 }
 0x130   : > { %v855_v32 = vpop.f32.mrf.mxu1  ;;  %1912 = vmatpush.msra.mxu3 %v2550_v26 }
 0x131   : > { %1301 = vmatmul.f32.gmra.mxu3 %v3335_v47  ;;  %1476 = vmatmul.f32.gmra.mxu0 %v3394_v25 }
 0x132   : > { %v1092_v28 = vpop.f32.mrf.mxu2 }
 0x133   : > { %v1180_v7 = vadd.f32 %v1092_v28, %v850_v58  ;;  %902 = vmatmul.f32.gmra.mxu1 %v3335_v47  ;;  %v853_v58 = vadd.f32 %v852_v6, %v3616_v51  ;;  %v3801_v47 = vsel %vm933_vm1, %v989_v38, %v990_v17  ;;  %v2533_v6 = vld [vmem:[%s4214_s3 + $0x310] sm:$0xff]  ;;  %v4319_v38 = vld [vmem:[#allocation9_spill] sm:$0xff] }
 0x134   : > { %v1254_v23 = vpop.f32.mrf.mxu3  ;;  %1741 = vmatpush.msra.mxu2 %v2533_v6  ;;  %v3829_v6 = vld [vmem:[#allocation2 + $0x128] sm:$0xff] }
 0x135   : > { %v1342_v54 = vadd.f32 %v1254_v23, %v1180_v7  ;;  %4321 = vst [vmem:[#allocation49_spill] sm:$0xff] %v3829_v6 }
 0x136   : > { %v1432_v56 = vpop.f32.mrf.mxu0 }
 0x137   : > { %v3788_v52 = vadd.f32 %v1426_v63, %v1342_v54  ;;  %1142 = vmatmul.f32.gmra.mxu2 %v3786_v19  ;;  %v3811_v54 = vld [vmem:[#allocation2 + $0x120] sm:$0xff] }
 0x138   : > { %v858_v27 = vpop.f32.mrf.mxu1 }
 0x139   : > { %4317 = vst [vmem:[#allocation46_spill] sm:$0xff] %v3788_v52  ;;  %1304 = vmatmul.f32.gmra.mxu3 %v3337_v50  ;;  %1479 = vmatmul.f32.gmra.mxu0 %v3047_v45  ;;  %v269_v45 = vld [vmem:[%s2752_s8 + $0xf8] sm:$0xff]  ;;  %v3875_v52 = vld [vmem:[#allocation2 + $0x140] sm:$0xff] }
 0x13a   : > { %v1095_v22 = vpop.f32.mrf.mxu2  ;;  %4326 = vst [vmem:[#allocation52_spill] sm:$0xff] %v3875_v52 }
 0x13b   : > { %v1181_v63 = vadd.f32 %v1095_v22, %v853_v58  ;;  %905 = vmatmul.f32.gmra.mxu1 %v3337_v50  ;;  %v856_v50 = vadd.f32 %v855_v32, %v3641_v9  ;;  %v3823_v32 = vsel %vm933_vm1, %v990_v17, %v992_v49  ;;  %v4322_v17 = vld [vmem:[#allocation12_spill] sm:$0xff] }
 0x13c   : > { %v1257_v26 = vpop.f32.mrf.mxu3 }
 0x13d   : > { %v1343_v28 = vadd.f32 %v1257_v26, %v1181_v63 }
 0x13e   : > { %v1435_v7 = vpop.f32.mrf.mxu0 }
 0x13f   : > { %v3803_v51 = vadd.f32 %v1429_v60, %v1343_v28  ;;  %1145 = vmatmul.f32.gmra.mxu2 %v3801_v47  ;;  %v2549_v60 = vld [vmem:[%s4214_s3 + $0x390] sm:$0xff]  ;;  %v994_v28 = vrot.slane %v3811_v54, 2 }
 0x140   : > { %v861_v23 = vpop.f32.mrf.mxu1  ;;  %1913 = vmatpush.msra.mxu3 %v2549_v60 }
 0x141   : > { %4318 = vst [vmem:[#allocation47_spill] sm:$0xff] %v3803_v51  ;;  %1307 = vmatmul.f32.gmra.mxu3 %v3811_v54  ;;  %1482 = vmatmul.f32.gmra.mxu0 %v4319_v38  ;;  %v3849_v38 = vld [vmem:[#allocation2 + $0x138] sm:$0xff] }
 0x142   : > { %v1098_v58 = vpop.f32.mrf.mxu2 }
 0x143   : > { %v1182_v16 = vadd.f32 %v1098_v58, %v856_v50  ;;  %908 = vmatmul.f32.gmra.mxu1 %v3811_v54  ;;  %v995_v50 = vrot.slane %v3829_v6, 2  ;;  %v859_v58 = vadd.f32 %v858_v27, %v3661_v61 }
 0x144   : > { %v1260_v9 = vpop.f32.mrf.mxu3 }
 0x145   : > { %v1344_v22 = vadd.f32 %v1260_v9, %v1182_v16  ;;  %v3840_v9 = vsel %vm933_vm1, %v994_v28, %v995_v50  ;;  %v4324_v28 = vld [vmem:[#allocation15_spill] sm:$0xff] }
 0x146   : > { %v1438_v63 = vpop.f32.mrf.mxu0 }
 0x147   : > { %v3825_v26 = vadd.f32 %v1432_v56, %v1344_v22  ;;  %1148 = vmatmul.f32.gmra.mxu2 %v3823_v32  ;;  %v2565_v56 = vld [vmem:[%s4214_s3 + $0x410] sm:$0xff] }
 0x148   : > { %v864_v60 = vpop.f32.mrf.mxu1  ;;  %2082 = vmatpush.msra.mxu0 %v2565_v56 }
 0x149   : > { %4320 = vst [vmem:[#allocation48_spill] sm:$0xff] %v3825_v26  ;;  %1310 = vmatmul.f32.gmra.mxu3 %v3829_v6  ;;  %1485 = vmatmul.f32.gmra.mxu0 %v4322_v17  ;;  %v2532_v17 = vld [vmem:[%s4214_s3 + $0x308] sm:$0xff]  ;;  %v2648_v26 = vld [vmem:[#allocation2 + $0x130] sm:$0x3] }
 0x14a   : > { %v1101_v49 = vpop.f32.mrf.mxu2  ;;  %v997_v56 = vrot.slane %v2648_v26, 2  ;;  %1742 = vmatpush.msra.mxu2 %v2532_v17 }
 0x14b   : > { %v1183_v16 = vadd.f32 %v1101_v49, %v859_v58  ;;  %911 = vmatmul.f32.gmra.mxu1 %v3829_v6  ;;  %v862_v49 = vadd.f32 %v861_v23, %v3488_v10  ;;  %v2516_v10 = vld [vmem:[%s4214_s3 + $0x288] sm:$0xff]  ;;  %v2650_v23 = vld [vmem:[%s4212_s1] ss:$0 sm:$0xff] }
 0x14c   : > { %v1263_v42 = vpop.f32.mrf.mxu3  ;;  %1580 = vmatpush.msra.mxu1 %v2516_v10  ;;  %v865_v10 = vadd.f32 %v864_v60, %v3511_v4 }
 0x14d   : > { %v1345_v22 = vadd.f32 %v1263_v42, %v1183_v16  ;;  %v268_v42 = vld [vmem:[%s2752_s8 + $0xf0] sm:$0xff] }
 0x14e   : > { %v1441_v61 = vpop.f32.mrf.mxu0  ;;  %v303_v26 = vmul.f32 %v2650_v23, %v268_v42  ;;  %v999_v42 = vrot.slane %v3849_v38, 2 }
 0x14f   : > { %v3842_v27 = vadd.f32 %v1435_v7, %v1345_v22  ;;  %1151 = vmatmul.f32.gmra.mxu2 %v3840_v9  ;;  %v2548_v7 = vld [vmem:[%s4214_s3 + $0x388] sm:$0xff] }
 0x150   : > { %v867_v58 = vpop.f32.mrf.mxu1  ;;  %1914 = vmatpush.msra.mxu3 %v2548_v7 }
 0x151   : > { %4323 = vst [vmem:[#allocation50_spill] sm:$0xff] %v3842_v27  ;;  %1313 = vmatmul.f32.gmra.mxu3 %v3849_v38  ;;  %1488 = vmatmul.f32.gmra.mxu0 %v4324_v28  ;;  %v3865_v28 = vsel %vm933_vm1, %v995_v50, %v997_v56  ;;  %v1000_v50 = vrot.slane %v3875_v52, 2 }
 0x152   : > { %v1104_v16 = vpop.f32.mrf.mxu2 }
 0x153   : > { %v1184_v22 = vadd.f32 %v1104_v16, %v862_v49  ;;  %914 = vmatmul.f32.gmra.mxu1 %v3849_v38  ;;  %v2651_v49 = vld [vmem:[%s4213_s2] ss:$0 sm:$0xff] }
 0x154   : > { %v1266_v17 = vpop.f32.mrf.mxu3  ;;  %v338_v16 = vadd.f32 %v2651_v49, %v303_v26  ;;  %v4327_v26 = vld [vmem:[#allocation17_spill] sm:$0xff] }
 0x155   : > { %v1346_v7 = vadd.f32 %v1266_v17, %v1184_v22  ;;  %v304_v22 = vmul.f32 %v2650_v23, %v269_v45  ;;  %v3886_v45 = vsel %vm933_vm1, %v999_v42, %v1000_v50  ;;  %v3895_v42 = vld [vmem:[#allocation2 + $0x150] sm:$0xff] }
 0x156   : > { %v1444_v27 = vpop.f32.mrf.mxu0  ;;  %v370_v6 = vmax.f32 %v338_v16, 0.0  ;;  %4329 = vst [vmem:[#allocation54_spill] sm:$0xff] %v3895_v42 }
 0x157   : > { %v3870_v51 = vadd.f32 %v1438_v63, %v1346_v7  ;;  %1154 = vmatmul.f32.gmra.mxu2 %v3865_v28  ;;  %v2564_v63 = vld [vmem:[%s4214_s3 + $0x408] sm:$0xff]  ;;  %v339_v7 = vadd.f32 %v2651_v49, %v304_v22 }
 0x158   : > { %v870_v56 = vpop.f32.mrf.mxu1  ;;  %457 = vst [vmem:[#allocation2 + $0x181] sm:$0xff] %v370_v6  ;;  %2083 = vmatpush.msra.mxu0 %v2564_v63  ;;  %v2531_v6 = vld [vmem:[%s4214_s3 + $0x300] sm:$0xff]  ;;  %v2653_v49 = vld [vmem:[#allocation2 + $0x148] sm:$0x3]  ;;  %v868_v63 = vadd.f32 %v867_v58, %v3533_v33 }
 0x159   : > { %4325 = vst [vmem:[#allocation51_spill] sm:$0xff] %v3870_v51  ;;  %1316 = vmatmul.f32.gmra.mxu3 %v3875_v52  ;;  %1491 = vmatmul.f32.gmra.mxu0 %v4327_v26  ;;  %v371_v4 = vmax.f32 %v339_v7, 0.0  ;;  %v1002_v22 = vrot.slane %v2653_v49, 2  ;;  %v1004_v49 = vrot.slane %v3895_v42, 2 }
 0x15a   : > { %v1107_v17 = vpop.f32.mrf.mxu2  ;;  %1743 = vmatpush.msra.mxu2 %v2531_v6 }
 0x15b   : > { %v1185_v16 = vadd.f32 %v1107_v17, %v865_v10  ;;  %917 = vmatmul.f32.gmra.mxu1 %v3875_v52  ;;  %458 = vst [vmem:[#allocation2 + $0x189] sm:$0xff] %v371_v4  ;;  %v3907_v58 = vsel %vm933_vm1, %v1000_v50, %v1002_v22  ;;  %v4334_v50 = vld [vmem:[#allocation23_spill] sm:$0xff] }
 0x15c   : > { %v1269_v51 = vpop.f32.mrf.mxu3  ;;  %4331 = vst [vmem:[#allocation55_spill] sm:$0xff] %v3907_v58 }
 0x15d   : > { %v1347_v60 = vadd.f32 %v1269_v51, %v1185_v16  ;;  %v4330_v51 = vld [vmem:[#allocation19_spill] sm:$0xff]  ;;  %v2515_v16 = vld [vmem:[%s4214_s3 + $0x280] sm:$0xff] }
 0x15e   : > { %v1447_v23 = vpop.f32.mrf.mxu0  ;;  %1581 = vmatpush.msra.mxu1 %v2515_v16 }
 0x15f   : > { %v3888_v26 = vadd.f32 %v1441_v61, %v1347_v60  ;;  %1157 = vmatmul.f32.gmra.mxu2 %v3886_v45  ;;  %v2547_v61 = vld [vmem:[%s4214_s3 + $0x380] sm:$0xff] }
 0x160   : > { %v873_v10 = vpop.f32.mrf.mxu1  ;;  %1915 = vmatpush.msra.mxu3 %v2547_v61 }
 0x161   : > { %4328 = vst [vmem:[#allocation53_spill] sm:$0xff] %v3888_v26  ;;  %1319 = vmatmul.f32.gmra.mxu3 %v3895_v42  ;;  %1494 = vmatmul.f32.gmra.mxu0 %v4330_v51  ;;  %v871_v51 = vadd.f32 %v870_v56, %v3556_v15 }
 0x162   : > { %v1110_v17 = vpop.f32.mrf.mxu2  ;;  %v3929_v56 = vld [vmem:[#allocation2 + $0x188] sm:$0xff] }
 0x163   : > { %v1186_v7 = vadd.f32 %v1110_v17, %v868_v63  ;;  %920 = vmatmul.f32.gmra.mxu1 %v3895_v42  ;;  %v3913_v63 = vld [vmem:[#allocation2 + $0x158] sm:$0xff] }
 0x164   : > { %v1272_v33 = vpop.f32.mrf.mxu3  ;;  %4333 = vst [vmem:[#allocation57_spill] sm:$0xff] %v3913_v63  ;;  %v1005_v61 = vrot.slane %v3913_v63, 2 }
 0x165   : > { %v1348_v4 = vadd.f32 %v1272_v33, %v1186_v7 }
 0x166   : > { %v1450_v60 = vpop.f32.mrf.mxu0  ;;  %v3924_v33 = vsel %vm933_vm1, %v1004_v49, %v1005_v61 }
 0x167   : > { %v3909_v6 = vadd.f32 %v1444_v27, %v1348_v4  ;;  %1160 = vmatmul.f32.gmra.mxu2 %v3907_v58  ;;  %v2563_v27 = vld [vmem:[%s4214_s3 + $0x400] sm:$0xff]  ;;  %4335 = vst [vmem:[#allocation58_spill] sm:$0xff] %v3924_v33 }
 0x168   : > { %v876_v17 = vpop.f32.mrf.mxu1  ;;  %2084 = vmatpush.msra.mxu0 %v2563_v27  ;;  %v874_v27 = vadd.f32 %v873_v10, %v3578_v31 }
 0x169   : > { %4332 = vst [vmem:[#allocation56_spill] sm:$0xff] %v3909_v6  ;;  %1322 = vmatmul.f32.gmra.mxu3 %v3913_v63  ;;  %1497 = vmatmul.f32.gmra.mxu0 %v4334_v50  ;;  %v2656_v50 = vld [vmem:[#allocation2 + $0x160] sm:$0x3]  ;;  %v877_v58 = vadd.f32 %v876_v17, %v3601_v34  ;;  %v1012_v17 = vrot.slane %v3378_v24, 2 }
 0x16a   : > { %v1113_v22 = vpop.f32.mrf.mxu2  ;;  %v1007_v26 = vrot.slane %v2656_v50, 2 }
 0x16b   : > { %v1187_v7 = vadd.f32 %v1113_v22, %v871_v51  ;;  %923 = vmatmul.f32.gmra.mxu1 %v3913_v63  ;;  %v4337_v51 = vld [vmem:[#allocation20_spill] sm:$0xff]  ;;  %v3933_v22 = vld [vmem:[#allocation2 + $0x180] sm:$0xff] }
 0x16c   : > { %v1275_v16 = vpop.f32.mrf.mxu3  ;;  %v3940_v50 = vsel %vm933_vm1, %v1005_v61, %v1007_v26 }
 0x16d   : > { %v1349_v4 = vadd.f32 %v1275_v16, %v1187_v7  ;;  %v1373_v7 = vrot.slane %v3933_v22, 1 }
 0x16e   : > { %v1453_v6 = vpop.f32.mrf.mxu0 }
 0x16f   : > { %v3926_v15 = vadd.f32 %v1447_v23, %v1349_v4  ;;  %1163 = vmatmul.f32.gmra.mxu2 %v3924_v33  ;;  %v1374_v23 = vrot.slane %v3929_v56, 1  ;;  %v1009_v33 = vrot.slane %v4337_v51, 2 }
 0x170   : > { %v879_v42 = vpop.f32.mrf.mxu1 }
 0x171   : > { %4336 = vst [vmem:[#allocation59_spill] sm:$0xff] %v3926_v15  ;;  %1325 = vmatmul.f32.gmra.mxu3 %v4337_v51  ;;  %1500 = vmatmul.f32.gmra.mxu0 %v3397_v13  ;;  %v3943_v10 = vsel %vm577_vm0, %v1373_v7, %v1374_v23  ;;  %v3948_v13 = vld [vmem:[#allocation2 + $0x190] sm:$0x3] }
 0x172   : > { %v1116_v49 = vpop.f32.mrf.mxu2  ;;  %4338 = vst [vmem:[#allocation20_spill] sm:$0xff] %v3943_v10  ;;  %v1376_v61 = vrot.slane %v3948_v13, 1 }
 0x173   : > { %v1188_v16 = vadd.f32 %v1116_v49, %v874_v27  ;;  %926 = vmatmul.f32.gmra.mxu1 %v4337_v51  ;;  %v4339_v27 = vld [vmem:[#allocation21_spill] sm:$0xff] }
 0x174   : > { %v1278_v4 = vpop.f32.mrf.mxu3  ;;  %v1010_v49 = vrot.slane %v4339_v27, 2 }
 0x175   : > { %v1350_v15 = vadd.f32 %v1278_v4, %v1188_v16  ;;  %v3961_v4 = vsel %vm577_vm0, %v1374_v23, %v1376_v61 }
 0x176   : > { %v1456_v31 = vpop.f32.mrf.mxu0  ;;  %v3958_v7 = vsel %vm933_vm1, %v1009_v33, %v1010_v49  ;;  %v3972_v23 = vsel %vm933_vm1, %v1010_v49, %v1012_v17 }
 0x177   : > { %v3945_v63 = vadd.f32 %v1450_v60, %v1350_v15  ;;  %1166 = vmatmul.f32.gmra.mxu2 %v3940_v50 }
 0x178   : > { %v882_v52 = vpop.f32.mrf.mxu1 }
 0x179   : > { %1328 = vmatmul.f32.gmra.mxu3 %v4339_v27  ;;  %1503 = vmatmul.f32.gmra.mxu0 %v3943_v10 }
 0x17a   : > { %v1119_v26 = vpop.f32.mrf.mxu2 }
 0x17b   : > { %v1189_v60 = vadd.f32 %v1119_v26, %v877_v58  ;;  %929 = vmatmul.f32.gmra.mxu1 %v4339_v27  ;;  %v880_v58 = vadd.f32 %v879_v42, %v3623_v21  ;;  %v883_v21 = vadd.f32 %v882_v52, %v3646_v37 }
 0x17c   : > { %v1281_v15 = vpop.f32.mrf.mxu3 }
 0x17d   : > { %v1351_v51 = vadd.f32 %v1281_v15, %v1189_v60 }
 0x17e   : > { %v1459_v16 = vpop.f32.mrf.mxu0 }
 0x17f   : > { %v3963_v34 = vadd.f32 %v1453_v6, %v1351_v51  ;;  %1169 = vmatmul.f32.gmra.mxu2 %v3958_v7 }
 0x180   : > { %v885_v10 = vpop.f32.mrf.mxu1 }
 0x181   : > { %1331 = vmatmul.f32.gmra.mxu3 %v3933_v22  ;;  %1506 = vmatmul.f32.gmra.mxu0 %v3961_v4 }
 0x182   : > { %v1122_v33 = vpop.f32.mrf.mxu2 }
 0x183   : > { %v1190_v27 = vadd.f32 %v1122_v33, %v880_v58  ;;  %1582 = vmatmul.f32.vlgmr.msra.gmra.mxu1 %v3428_v35  ;;  %v886_v33 = vadd.f32 %v885_v10, %v3540_v12 }
 0x184   : > { %v1284_v26 = vpop.f32.mrf.mxu3 }
 0x185   : > { %v1352_v6 = vadd.f32 %v1284_v26, %v1190_v27 }
 0x186   : > { %v1462_v61 = vpop.f32.mrf.mxu0 }
 0x187   : > { %v3974_v60 = vadd.f32 %v1456_v31, %v1352_v6  ;;  %1172 = vmatmul.f32.gmra.mxu2 %v3972_v23  ;;  %v2657_v31 = vld [vmem:[#allocation2 + $0x30] sm:$0xff] }
 0x188   : > { %v888_v24 = vpop.f32.mrf.mxu1 }
 0x189   : > { %1334 = vmatmul.f32.gmra.mxu3 %v3929_v56  ;;  %2085 = vmatmul.f32.vlgmr.msra.gmra.mxu0 %v3457_v8 }
 0x18a   : > { %v1125_v42 = vpop.f32.mrf.mxu2 }
 0x18b   : > { %v1191_v15 = vadd.f32 %v1125_v42, %v883_v21  ;;  %1585 = vmatmul.f32.gmra.mxu1 %v3445_v18  ;;  %v889_v42 = vadd.f32 %v888_v24, %v3563_v62 }
 0x18c   : > { %v1287_v35 = vpop.f32.mrf.mxu3 }
 0x18d   : > { %v1353_v49 = vadd.f32 %v1287_v35, %v1191_v15 }
 0x18e   : > { %v1465_v51 = vpop.f32.mrf.mxu0 }
 0x18f   : > { %v3981_v17 = vadd.f32 %v1459_v16, %v1353_v49  ;;  %1744 = vmatmul.f32.vlgmr.msra.gmra.mxu2 %v2657_v31  ;;  %v2658_v16 = vld [vmem:[#allocation2 + $0x38] sm:$0xff] }
 0x190   : > { %v891_v58 = vpop.f32.mrf.mxu1 }
 0x191   : > { %1916 = vmatmul.f32.vlgmr.msra.gmra.mxu3 %v3239_v29  ;;  %2088 = vmatmul.f32.gmra.mxu0 %v3474_v57  ;;  %v892_v31 = vadd.f32 %v891_v58, %v3585_v40 }
 0x192   : > { %v1128_v37 = vpop.f32.mrf.mxu2 }
 0x193   : > { %v1192_v52 = vadd.f32 %v1128_v37, %v886_v33  ;;  %1588 = vmatmul.f32.gmra.mxu1 %v3457_v8 }
 0x194   : > { %v1290_v27 = vpop.f32.mrf.mxu3 }
 0x195   : > { %v1354_v18 = vadd.f32 %v1290_v27, %v1192_v52 }
 0x196   : > { %v1468_v26 = vpop.f32.mrf.mxu0 }
 0x197   : > { %v3987_v6 = vadd.f32 %v1462_v61, %v1354_v18  ;;  %1747 = vmatmul.f32.gmra.mxu2 %v2658_v16  ;;  %v2659_v61 = vld [vmem:[#allocation2 + $0x48] sm:$0xff] }
 0x198   : > { %v894_v21 = vpop.f32.mrf.mxu1 }
 0x199   : > { %1919 = vmatmul.f32.gmra.mxu3 %v3298_v53  ;;  %2091 = vmatmul.f32.gmra.mxu0 %v3486_v14  ;;  %v895_v27 = vadd.f32 %v894_v21, %v3608_v36  ;;  %v4343_v36 = vld [vmem:[#allocation28_spill] sm:$0xff] }
 0x19a   : > { %v1131_v29 = vpop.f32.mrf.mxu2 }
 0x19b   : > { %v1193_v12 = vadd.f32 %v1131_v29, %v889_v42  ;;  %1591 = vmatmul.f32.gmra.mxu1 %v3474_v57  ;;  %v4341_v29 = vld [vmem:[#allocation35_spill] sm:$0xff] }
 0x19c   : > { %v1293_v10 = vpop.f32.mrf.mxu3 }
 0x19d   : > { %v1355_v8 = vadd.f32 %v1293_v10, %v1193_v12  ;;  %v4342_v10 = vld [vmem:[#allocation3_spill] sm:$0xff] }
 0x19e   : > { %v1471_v15 = vpop.f32.mrf.mxu0 }
 0x19f   : > { %v3993_v35 = vadd.f32 %v1465_v51, %v1355_v8  ;;  %1750 = vmatmul.f32.gmra.mxu2 %v2659_v61  ;;  %v2660_v51 = vld [vmem:[#allocation2 + $0x50] sm:$0xff] }
 0x1a0   : > { %v897_v49 = vpop.f32.mrf.mxu1 }
 0x1a1   : > { %1922 = vmatmul.f32.gmra.mxu3 %v3343_v46  ;;  %2094 = vmatmul.f32.gmra.mxu0 %v3509_v20  ;;  %v898_v12 = vadd.f32 %v897_v49, %v4341_v29  ;;  %v4346_v49 = vld [vmem:[#allocation30_spill] sm:$0xff]  ;;  %v4348_v29 = vld [vmem:[#allocation7_spill] sm:$0xff] }
 0x1a2   : > { %v1134_v53 = vpop.f32.mrf.mxu2 }
 0x1a3   : > { %v1194_v62 = vadd.f32 %v1134_v53, %v892_v31  ;;  %1594 = vmatmul.f32.gmra.mxu1 %v3486_v14 }
 0x1a4   : > { %v1296_v24 = vpop.f32.mrf.mxu3 }
 0x1a5   : > { %v1356_v57 = vadd.f32 %v1296_v24, %v1194_v62  ;;  %v4345_v24 = vld [vmem:[#allocation4_spill] sm:$0xff] }
 0x1a6   : > { %v1474_v33 = vpop.f32.mrf.mxu0 }
 0x1a7   : > { %v3999_v37 = vadd.f32 %v1468_v26, %v1356_v57  ;;  %1753 = vmatmul.f32.gmra.mxu2 %v2660_v51  ;;  %v4340_v26 = vld [vmem:[#allocation25_spill] sm:$0xff] }
 0x1a8   : > { %v900_v52 = vpop.f32.mrf.mxu1 }
 0x1a9   : > { %1925 = vmatmul.f32.gmra.mxu3 %v3375_v0  ;;  %2097 = vmatmul.f32.gmra.mxu0 %v3525_v3  ;;  %v901_v62 = vadd.f32 %v900_v52, %v3653_v41  ;;  %v4349_v41 = vld [vmem:[#allocation32_spill] sm:$0xff] }
 0x1aa   : > { %v1137_v46 = vpop.f32.mrf.mxu2 }
 0x1ab   : > { %v1195_v40 = vadd.f32 %v1137_v46, %v895_v27  ;;  %1597 = vmatmul.f32.gmra.mxu1 %v3509_v20 }
 0x1ac   : > { %v1299_v58 = vpop.f32.mrf.mxu3 }
 0x1ad   : > { %v1357_v14 = vadd.f32 %v1299_v58, %v1195_v40 }
 0x1ae   : > { %v1477_v18 = vpop.f32.mrf.mxu0 }
 0x1af   : > { %v4005_v16 = vadd.f32 %v1471_v15, %v1357_v14  ;;  %1756 = vmatmul.f32.gmra.mxu2 %v4340_v26  ;;  %v4344_v15 = vld [vmem:[#allocation26_spill] sm:$0xff]  ;;  %v4347_v14 = vld [vmem:[#allocation40_spill] sm:$0xff] }
 0x1b0   : > { %v903_v42 = vpop.f32.mrf.mxu1 }
 0x1b1   : > { %1928 = vmatmul.f32.gmra.mxu3 %v4342_v10  ;;  %2100 = vmatmul.f32.gmra.mxu0 %v4343_v36  ;;  %v904_v26 = vadd.f32 %v903_v42, %v4347_v14  ;;  %v4352_v42 = vld [vmem:[#allocation34_spill] sm:$0xff]  ;;  %v4353_v14 = vld [vmem:[#allocation27_spill] sm:$0xff] }
 0x1b2   : > { %v1140_v0 = vpop.f32.mrf.mxu2 }
 0x1b3   : > { %v1196_v21 = vadd.f32 %v1140_v0, %v898_v12  ;;  %1600 = vmatmul.f32.gmra.mxu1 %v3525_v3 }
 0x1b4   : > { %v1302_v8 = vpop.f32.mrf.mxu3 }
 0x1b5   : > { %v1358_v20 = vadd.f32 %v1302_v8, %v1196_v21 }
 0x1b6   : > { %v1480_v61 = vpop.f32.mrf.mxu0 }
 0x1b7   : > { %v4012_v31 = vadd.f32 %v1474_v33, %v1358_v20  ;;  %1759 = vmatmul.f32.gmra.mxu2 %v4344_v15  ;;  %v2661_v33 = vld [vmem:[#allocation2 + $0x78] sm:$0xff]  ;;  %v4350_v20 = vld [vmem:[#allocation43_spill] sm:$0xff] }
 0x1b8   : > { %v906_v53 = vpop.f32.mrf.mxu1 }
 0x1b9   : > { %1931 = vmatmul.f32.gmra.mxu3 %v4345_v24  ;;  %2103 = vmatmul.f32.gmra.mxu0 %v4346_v49  ;;  %v907_v15 = vadd.f32 %v906_v53, %v4350_v20  ;;  %v4355_v53 = vld [vmem:[#allocation37_spill] sm:$0xff] }
 0x1ba   : > { %v1143_v57 = vpop.f32.mrf.mxu2 }
 0x1bb   : > { %v1197_v51 = vadd.f32 %v1143_v57, %v901_v62  ;;  %1603 = vmatmul.f32.gmra.mxu1 %v4343_v36  ;;  %v4351_v62 = vld [vmem:[#allocation10_spill] sm:$0xff] }
 0x1bc   : > { %v1305_v27 = vpop.f32.mrf.mxu3 }
 0x1bd   : > { %v1359_v3 = vadd.f32 %v1305_v27, %v1197_v51 }
 0x1be   : > { %v1483_v46 = vpop.f32.mrf.mxu0 }
 0x1bf   : > { %v4019_v40 = vadd.f32 %v1477_v18, %v1359_v3  ;;  %1762 = vmatmul.f32.gmra.mxu2 %v2661_v33  ;;  %v2662_v18 = vld [vmem:[#allocation2 + $0x80] sm:$0xff] }
 0x1c0   : > { %v909_v58 = vpop.f32.mrf.mxu1 }
 0x1c1   : > { %1934 = vmatmul.f32.gmra.mxu3 %v4348_v29  ;;  %2106 = vmatmul.f32.gmra.mxu0 %v4349_v41  ;;  %v4354_v29 = vld [vmem:[#allocation13_spill] sm:$0xff] }
 0x1c2   : > { %v1146_v52 = vpop.f32.mrf.mxu2 }
 0x1c3   : > { %v1198_v12 = vadd.f32 %v1146_v52, %v904_v26  ;;  %1606 = vmatmul.f32.gmra.mxu1 %v4346_v49  ;;  %v910_v26 = vadd.f32 %v909_v58, %v4353_v14  ;;  %v4358_v58 = vld [vmem:[#allocation39_spill] sm:$0xff] }
 0x1c4   : > { %v1308_v10 = vpop.f32.mrf.mxu3 }
 0x1c5   : > { %v1360_v36 = vadd.f32 %v1308_v10, %v1198_v12 }
 0x1c6   : > { %v1486_v0 = vpop.f32.mrf.mxu0 }
 0x1c7   : > { %v4025_v21 = vadd.f32 %v1480_v61, %v1360_v36  ;;  %1765 = vmatmul.f32.gmra.mxu2 %v2662_v18  ;;  %v2663_v61 = vld [vmem:[#allocation2 + $0x90] sm:$0xff] }
 0x1c8   : > { %v912_v8 = vpop.f32.mrf.mxu1 }
 0x1c9   : > { %1937 = vmatmul.f32.gmra.mxu3 %v4351_v62  ;;  %2109 = vmatmul.f32.gmra.mxu0 %v4352_v42 }
 0x1ca   : > { %v1149_v24 = vpop.f32.mrf.mxu2 }
 0x1cb   : > { %v1199_v57 = vadd.f32 %v1149_v24, %v907_v15  ;;  %1609 = vmatmul.f32.gmra.mxu1 %v4349_v41  ;;  %v4356_v15 = vld [vmem:[#allocation29_spill] sm:$0xff]  ;;  %v4357_v24 = vld [vmem:[#allocation16_spill] sm:$0xff] }
 0x1cc   : > { %v1311_v51 = vpop.f32.mrf.mxu3  ;;  %v913_v62 = vadd.f32 %v912_v8, %v4356_v15  ;;  %v4361_v8 = vld [vmem:[#allocation42_spill] sm:$0xff] }
 0x1cd   : > { %v1361_v49 = vadd.f32 %v1311_v51, %v1199_v57 }
 0x1ce   : > { %v1489_v27 = vpop.f32.mrf.mxu0 }
 0x1cf   : > { %v4031_v3 = vadd.f32 %v1483_v46, %v1361_v49  ;;  %1768 = vmatmul.f32.gmra.mxu2 %v2663_v61  ;;  %v2664_v46 = vld [vmem:[#allocation2 + $0x98] sm:$0xff] }
 0x1d0   : > { %v915_v33 = vpop.f32.mrf.mxu1 }
 0x1d1   : > { %1940 = vmatmul.f32.gmra.mxu3 %v4354_v29  ;;  %2112 = vmatmul.f32.gmra.mxu0 %v4355_v53  ;;  %v4359_v29 = vld [vmem:[#allocation31_spill] sm:$0xff] }
 0x1d2   : > { %v1152_v52 = vpop.f32.mrf.mxu2 }
 0x1d3   : > { %v1200_v12 = vadd.f32 %v1152_v52, %v910_v26  ;;  %1612 = vmatmul.f32.gmra.mxu1 %v4352_v42  ;;  %v916_v52 = vadd.f32 %v915_v33, %v4359_v29  ;;  %v4364_v33 = vld [vmem:[#allocation45_spill] sm:$0xff] }
 0x1d4   : > { %v1314_v10 = vpop.f32.mrf.mxu3 }
 0x1d5   : > { %v1362_v41 = vadd.f32 %v1314_v10, %v1200_v12  ;;  %v4360_v12 = vld [vmem:[#allocation18_spill] sm:$0xff] }
 0x1d6   : > { %v1492_v36 = vpop.f32.mrf.mxu0 }
 0x1d7   : > { %v4037_v18 = vadd.f32 %v1486_v0, %v1362_v41  ;;  %1771 = vmatmul.f32.gmra.mxu2 %v2664_v46  ;;  %v2665_v0 = vld [vmem:[#allocation2 + $0xa8] sm:$0xff] }
 0x1d8   : > { %v918_v20 = vpop.f32.mrf.mxu1 }
 0x1d9   : > { %1943 = vmatmul.f32.gmra.mxu3 %v4357_v24  ;;  %2115 = vmatmul.f32.gmra.mxu0 %v4358_v58 }
 0x1da   : > { %v1155_v57 = vpop.f32.mrf.mxu2 }
 0x1db   : > { %v1201_v51 = vadd.f32 %v1155_v57, %v913_v62  ;;  %1615 = vmatmul.f32.gmra.mxu1 %v4355_v53  ;;  %v4362_v57 = vld [vmem:[#allocation33_spill] sm:$0xff] }
 0x1dc   : > { %v1317_v49 = vpop.f32.mrf.mxu3 }
 0x1dd   : > { %v1363_v42 = vadd.f32 %v1317_v49, %v1201_v51  ;;  %v919_v51 = vadd.f32 %v918_v20, %v4362_v57  ;;  %v4363_v49 = vld [vmem:[#allocation22_spill] sm:$0xff] }
 0x1de   : > { %v1495_v61 = vpop.f32.mrf.mxu0 }
 0x1df   : > { %v4043_v14 = vadd.f32 %v1489_v27, %v1363_v42  ;;  %1774 = vmatmul.f32.gmra.mxu2 %v2665_v0  ;;  %v2666_v27 = vld [vmem:[#allocation2 + $0xb0] sm:$0xff] }
 0x1e0   : > { %v921_v26 = vpop.f32.mrf.mxu1 }
 0x1e1   : > { %1946 = vmatmul.f32.gmra.mxu3 %v4360_v12  ;;  %2118 = vmatmul.f32.gmra.mxu0 %v4361_v8 }
 0x1e2   : > { %v1158_v10 = vpop.f32.mrf.mxu2 }
 0x1e3   : > { %v1202_v41 = vadd.f32 %v1158_v10, %v916_v52  ;;  %1618 = vmatmul.f32.gmra.mxu1 %v4358_v58 }
 0x1e4   : > { %v1320_v46 = vpop.f32.mrf.mxu3 }
 0x1e5   : > { %v1364_v53 = vadd.f32 %v1320_v46, %v1202_v41  ;;  %v4365_v41 = vld [vmem:[#allocation36_spill] sm:$0xff] }
 0x1e6   : > { %v1498_v15 = vpop.f32.mrf.mxu0  ;;  %v922_v46 = vadd.f32 %v921_v26, %v4365_v41 }
 0x1e7   : > { %v4049_v62 = vadd.f32 %v1492_v36, %v1364_v53  ;;  %1777 = vmatmul.f32.gmra.mxu2 %v2666_v27  ;;  %v2667_v36 = vld [vmem:[#allocation2 + $0xc0] sm:$0xff] }
 0x1e8   : > { %v924_v24 = vpop.f32.mrf.mxu1  ;;  %v4366_v53 = vld [vmem:[#allocation5_spill] sm:$0xff] }
 0x1e9   : > { %1949 = vmatmul.f32.gmra.mxu3 %v4363_v49  ;;  %2121 = vmatmul.f32.gmra.mxu0 %v4364_v33 }
 0x1ea   : > { %v1161_v42 = vpop.f32.mrf.mxu2 }
 0x1eb   : > { %v1203_v0 = vadd.f32 %v1161_v42, %v919_v51  ;;  %1621 = vmatmul.f32.gmra.mxu1 %v4361_v8 }
 0x1ec   : > { %v1323_v29 = vpop.f32.mrf.mxu3 }
 0x1ed   : > { %v1365_v58 = vadd.f32 %v1323_v29, %v1203_v0  ;;  %v4367_v0 = vld [vmem:[#allocation38_spill] sm:$0xff] }
 0x1ee   : > { %v1501_v52 = vpop.f32.mrf.mxu0  ;;  %v925_v29 = vadd.f32 %v924_v24, %v4367_v0 }
 0x1ef   : > { %v4055_v12 = vadd.f32 %v1495_v61, %v1365_v58  ;;  %1780 = vmatmul.f32.gmra.mxu2 %v2667_v36  ;;  %v2668_v61 = vld [vmem:[#allocation2 + $0xc8] sm:$0xff]  ;;  %v4368_v58 = vld [vmem:[#allocation8_spill] sm:$0xff] }
 0x1f0   : > { %v927_v10 = vpop.f32.mrf.mxu1 }
 0x1f1   : > { %1952 = vmatmul.f32.gmra.mxu3 %v4366_v53  ;;  %2124 = vmatmul.f32.gmra.mxu0 %v3716_v39 }
 0x1f2   : > { %v1164_v20 = vpop.f32.mrf.mxu2 }
 0x1f3   : > { %v1204_v27 = vadd.f32 %v1164_v20, %v922_v46  ;;  %1624 = vmatmul.f32.gmra.mxu1 %v4364_v33 }
 0x1f4   : > { %v1326_v57 = vpop.f32.mrf.mxu3 }
 0x1f5   : > { %v1366_v8 = vadd.f32 %v1326_v57, %v1204_v27  ;;  %v4369_v27 = vld [vmem:[#allocation41_spill] sm:$0xff] }
 0x1f6   : > { %v1504_v51 = vpop.f32.mrf.mxu0  ;;  %v928_v57 = vadd.f32 %v927_v10, %v4369_v27 }
 0x1f7   : > { %v4061_v49 = vadd.f32 %v1498_v15, %v1366_v8  ;;  %1783 = vmatmul.f32.gmra.mxu2 %v2668_v61  ;;  %v2669_v15 = vld [vmem:[#allocation2 + $0xd8] sm:$0xff]  ;;  %v4370_v8 = vld [vmem:[#allocation11_spill] sm:$0xff] }
 0x1f8   : > { %v930_v42 = vpop.f32.mrf.mxu1 }
 0x1f9   : > { %1955 = vmatmul.f32.gmra.mxu3 %v4368_v58  ;;  %2127 = vmatmul.f32.gmra.mxu0 %v3731_v5 }
 0x1fa   : > { %v1167_v26 = vpop.f32.mrf.mxu2 }
 0x1fb   : > { %v1205_v36 = vadd.f32 %v1167_v26, %v925_v29  ;;  %1627 = vmatmul.f32.gmra.mxu1 %v3716_v39 }
 0x1fc   : > { %v1329_v41 = vpop.f32.mrf.mxu3 }
 0x1fd   : > { %v1367_v33 = vadd.f32 %v1329_v41, %v1205_v36  ;;  %v4371_v36 = vld [vmem:[#allocation44_spill] sm:$0xff] }
 0x1fe   : > { %v1507_v46 = vpop.f32.mrf.mxu0  ;;  %v931_v41 = vadd.f32 %v930_v42, %v4371_v36 }
 0x1ff   : > { %v4067_v53 = vadd.f32 %v1501_v52, %v1367_v33  ;;  %1786 = vmatmul.f32.gmra.mxu2 %v2669_v15  ;;  %v2670_v52 = vld [vmem:[#allocation2 + $0xe0] sm:$0xff]  ;;  %v4372_v33 = vld [vmem:[#allocation14_spill] sm:$0xff] }
 0x200   : > { %v1583_v20 = vpop.f32.mrf.mxu1 }
 0x201   : > { %1958 = vmatmul.f32.gmra.mxu3 %v4370_v8  ;;  %2130 = vmatmul.f32.gmra.mxu0 %v3751_v30 }
 0x202   : > { %v1170_v24 = vpop.f32.mrf.mxu2 }
 0x203   : > { %v1206_v61 = vadd.f32 %v1170_v24, %v928_v57  ;;  %1630 = vmatmul.f32.gmra.mxu1 %v3731_v5 }
 0x204   : > { %v1332_v0 = vpop.f32.mrf.mxu3 }
 0x205   : > { %v1368_v39 = vadd.f32 %v1332_v0, %v1206_v61  ;;  %v1679_v61 = vadd.f32 %v1583_v20, %v3718_v11  ;;  %v2672_v11 = vld [vmem:[#allocation2 + $0xf8] sm:$0xff] }
 0x206   : > { %v2086_v29 = vpop.f32.mrf.mxu0 }
 0x207   : > { %v4073_v58 = vadd.f32 %v1504_v51, %v1368_v39  ;;  %1789 = vmatmul.f32.gmra.mxu2 %v2670_v52  ;;  %v2671_v51 = vld [vmem:[#allocation2 + $0xf0] sm:$0xff] }
 0x208   : > { %v1586_v26 = vpop.f32.mrf.mxu1 }
 0x209   : > { %1961 = vmatmul.f32.gmra.mxu3 %v4372_v33  ;;  %2133 = vmatmul.f32.gmra.mxu0 %v3766_v55  ;;  %v1680_v20 = vadd.f32 %v1586_v26, %v3733_v1 }
 0x20a   : > { %v1173_v10 = vpop.f32.mrf.mxu2 }
 0x20b   : > { %v1207_v15 = vadd.f32 %v1173_v10, %v931_v41  ;;  %1633 = vmatmul.f32.gmra.mxu1 %v3751_v30 }
 0x20c   : > { %v1335_v5 = vpop.f32.mrf.mxu3 }
 0x20d   : > { %v1369_v27 = vadd.f32 %v1335_v5, %v1207_v15 }
 0x20e   : > { %v2089_v57 = vpop.f32.mrf.mxu0 }
 0x20f   : > { %v4079_v8 = vadd.f32 %v1507_v46, %v1369_v27  ;;  %1792 = vmatmul.f32.gmra.mxu2 %v2671_v51 }
 0x210   : > { %v1589_v24 = vpop.f32.mrf.mxu1 }
 0x211   : > { %1964 = vmatmul.f32.gmra.mxu3 %v3288_v43  ;;  %2136 = vmatmul.f32.gmra.mxu0 %v3786_v19  ;;  %v1681_v5 = vadd.f32 %v1589_v24, %v3753_v44  ;;  %v2674_v44 = vld [vmem:[#allocation2 + $0x110] sm:$0xff] }
 0x212   : > { %v1745_v42 = vpop.f32.mrf.mxu2 }
 0x213   : > { %v1841_v0 = vadd.f32 %v1745_v42, %v1679_v61  ;;  %1636 = vmatmul.f32.gmra.mxu1 %v3766_v55 }
 0x214   : > { %v1917_v30 = vpop.f32.mrf.mxu3 }
 0x215   : > { %v2013_v39 = vadd.f32 %v1917_v30, %v1841_v0 }
 0x216   : > { %v2092_v46 = vpop.f32.mrf.mxu0 }
 0x217   : > { %v2182_v52 = vadd.f32 %v2086_v29, %v2013_v39  ;;  %1795 = vmatmul.f32.gmra.mxu2 %v2672_v11  ;;  %v2673_v29 = vld [vmem:[#allocation2 + $0x108] sm:$0xff] }
 0x218   : > { %v1592_v43 = vpop.f32.mrf.mxu1 }
 0x219   : > { %2323 = vst [vmem:[%s4090_s25] sm:$0xff] %v2182_v52  ;;  %1967 = vmatmul.f32.gmra.mxu3 %v3332_v2  ;;  %2139 = vmatmul.f32.gmra.mxu0 %v3801_v47  ;;  %v2251_v1 = vmul.f32 %v2182_v52, %v2182_v52  ;;  %v1682_v39 = vadd.f32 %v1592_v43, %v3768_v59  ;;  %v4373_v43 = vld [vmem:[#allocation46_spill] sm:$0xff] }
 0x21a   : > { %v1748_v55 = vpop.f32.mrf.mxu2 }
 0x21b   : > { %v1842_v36 = vadd.f32 %v1748_v55, %v1680_v20  ;;  %1639 = vmatmul.f32.gmra.mxu1 %v3786_v19 }
 0x21c   : > { %v1920_v41 = vpop.f32.mrf.mxu3 }
 0x21d   : > { %v2014_v33 = vadd.f32 %v1920_v41, %v1842_v36 }
 0x21e   : > { %v2095_v10 = vpop.f32.mrf.mxu0 }
 0x21f   : > { %v2183_v15 = vadd.f32 %v2089_v57, %v2014_v33  ;;  %1798 = vmatmul.f32.gmra.mxu2 %v2673_v29 }
 0x220   : > { %v1595_v27 = vpop.f32.mrf.mxu1 }
 0x221   : > { %v2214_v26 = vadd.f32 %v2183_v15, %v2182_v52  ;;  %v2252_v51 = vmul.f32 %v2183_v15, %v2183_v15  ;;  %2324 = vst [vmem:[%s4090_s25 + $0x8] sm:$0xff] %v2183_v15  ;;  %1970 = vmatmul.f32.gmra.mxu3 %v3367_v48  ;;  %2142 = vmatmul.f32.gmra.mxu0 %v3823_v32 }
 0x222   : > { %v1751_v2 = vpop.f32.mrf.mxu2  ;;  %v1683_v33 = vadd.f32 %v1595_v27, %v4373_v43  ;;  %v4380_v43 = vld [vmem:[#allocation55_spill] sm:$0xff] }
 0x223   : > { %v2283_v19 = vadd.f32 %v2252_v51, %v2251_v1  ;;  %v1843_v61 = vadd.f32 %v1751_v2, %v1681_v5  ;;  %1642 = vmatmul.f32.gmra.mxu1 %v3801_v47  ;;  %v4375_v2 = vld [vmem:[#allocation49_spill] sm:$0xff] }
 0x224   : > { %v1923_v57 = vpop.f32.mrf.mxu3 }
 0x225   : > { %v2015_v42 = vadd.f32 %v1923_v57, %v1843_v61 }
 0x226   : > { %v2098_v0 = vpop.f32.mrf.mxu0 }
 0x227   : > { %v2184_v30 = vadd.f32 %v2092_v46, %v2015_v42  ;;  %1801 = vmatmul.f32.gmra.mxu2 %v2674_v44 }
 0x228   : > { %v1598_v24 = vpop.f32.mrf.mxu1 }
 0x229   : > { %v2215_v52 = vadd.f32 %v2214_v26, %v2184_v30  ;;  %v2253_v11 = vmul.f32 %v2184_v30, %v2184_v30  ;;  %2325 = vst [vmem:[%s4090_s25 + $0x10] sm:$0xff] %v2184_v30  ;;  %1973 = vmatmul.f32.gmra.mxu3 %v3394_v25  ;;  %2145 = vmatmul.f32.gmra.mxu0 %v3840_v9  ;;  %v4374_v25 = vld [vmem:[#allocation6_spill] sm:$0xff]  ;;  %v4377_v30 = vld [vmem:[#allocation9_spill] sm:$0xff] }
 0x22a   : > { %v1754_v48 = vpop.f32.mrf.mxu2 }
 0x22b   : > { %v2284_v20 = vadd.f32 %v2283_v19, %v2253_v11  ;;  %v1844_v47 = vadd.f32 %v1754_v48, %v1682_v39  ;;  %1645 = vmatmul.f32.gmra.mxu1 %v3823_v32  ;;  %v4376_v19 = vld [vmem:[#allocation47_spill] sm:$0xff] }
 0x22c   : > { %v1926_v55 = vpop.f32.mrf.mxu3  ;;  %v1684_v61 = vadd.f32 %v1598_v24, %v4376_v19 }
 0x22d   : > { %v2016_v46 = vadd.f32 %v1926_v55, %v1844_v47 }
 0x22e   : > { %v2101_v36 = vpop.f32.mrf.mxu0 }
 0x22f   : > { %v2185_v41 = vadd.f32 %v2095_v10, %v2016_v46  ;;  %1804 = vmatmul.f32.gmra.mxu2 %v3811_v54 }
 0x230   : > { %v1601_v59 = vpop.f32.mrf.mxu1 }
 0x231   : > { %v2216_v15 = vadd.f32 %v2215_v52, %v2185_v41  ;;  %v2254_v29 = vmul.f32 %v2185_v41, %v2185_v41  ;;  %2326 = vst [vmem:[%s4090_s25 + $0x18] sm:$0xff] %v2185_v41  ;;  %1976 = vmatmul.f32.gmra.mxu3 %v4374_v25  ;;  %2148 = vmatmul.f32.gmra.mxu0 %v3865_v28  ;;  %v4379_v41 = vld [vmem:[#allocation12_spill] sm:$0xff] }
 0x232   : > { %v1757_v5 = vpop.f32.mrf.mxu2 }
 0x233   : > { %v2285_v1 = vadd.f32 %v2284_v20, %v2254_v29  ;;  %v1845_v32 = vadd.f32 %v1757_v5, %v1683_v33  ;;  %1648 = vmatmul.f32.gmra.mxu1 %v3840_v9  ;;  %v4378_v20 = vld [vmem:[#allocation48_spill] sm:$0xff] }
 0x234   : > { %v1929_v26 = vpop.f32.mrf.mxu3  ;;  %v1685_v47 = vadd.f32 %v1601_v59, %v4378_v20  ;;  %v4381_v5 = vld [vmem:[#allocation52_spill] sm:$0xff] }
 0x235   : > { %v2017_v10 = vadd.f32 %v1929_v26, %v1845_v32 }
 0x236   : > { %v2104_v51 = vpop.f32.mrf.mxu0 }
 0x237   : > { %v2186_v54 = vadd.f32 %v2098_v0, %v2017_v10  ;;  %1807 = vmatmul.f32.gmra.mxu2 %v4375_v2  ;;  %v4384_v2 = vld [vmem:[#allocation58_spill] sm:$0xff] }
 0x238   : > { %v1604_v27 = vpop.f32.mrf.mxu1 }
 0x239   : > { %v2217_v57 = vadd.f32 %v2216_v15, %v2186_v54  ;;  %v2255_v42 = vmul.f32 %v2186_v54, %v2186_v54  ;;  %2327 = vst [vmem:[%s4090_s25 + $0x20] sm:$0xff] %v2186_v54  ;;  %1979 = vmatmul.f32.gmra.mxu3 %v4377_v30  ;;  %2151 = vmatmul.f32.gmra.mxu0 %v3886_v45  ;;  %v4383_v54 = vld [vmem:[#allocation15_spill] sm:$0xff] }
 0x23a   : > { %v1760_v44 = vpop.f32.mrf.mxu2 }
 0x23b   : > { %v2286_v39 = vadd.f32 %v2285_v1, %v2255_v42  ;;  %v1846_v9 = vadd.f32 %v1760_v44, %v1684_v61  ;;  %1651 = vmatmul.f32.gmra.mxu1 %v3865_v28  ;;  %v4382_v1 = vld [vmem:[#allocation50_spill] sm:$0xff] }
 0x23c   : > { %v1932_v52 = vpop.f32.mrf.mxu3  ;;  %v1686_v32 = vadd.f32 %v1604_v27, %v4382_v1  ;;  %v4385_v44 = vld [vmem:[#allocation54_spill] sm:$0xff] }
 0x23d   : > { %v2018_v0 = vadd.f32 %v1932_v52, %v1846_v9 }
 0x23e   : > { %v2107_v11 = vpop.f32.mrf.mxu0 }
 0x23f   : > { %v2187_v48 = vadd.f32 %v2101_v36, %v2018_v0  ;;  %1810 = vmatmul.f32.gmra.mxu2 %v3849_v38 }
 0x240   : > { %v1607_v24 = vpop.f32.mrf.mxu1 }
 0x241   : > { %v2218_v55 = vadd.f32 %v2217_v57, %v2187_v48  ;;  %v2256_v46 = vmul.f32 %v2187_v48, %v2187_v48  ;;  %2328 = vst [vmem:[%s4090_s25 + $0x28] sm:$0xff] %v2187_v48  ;;  %1982 = vmatmul.f32.gmra.mxu3 %v4379_v41  ;;  %2154 = vmatmul.f32.gmra.mxu0 %v4380_v43  ;;  %v4387_v48 = vld [vmem:[#allocation17_spill] sm:$0xff] }
 0x242   : > { %v1763_v33 = vpop.f32.mrf.mxu2 }
 0x243   : > { %v2287_v15 = vadd.f32 %v2286_v39, %v2256_v46  ;;  %v1847_v28 = vadd.f32 %v1763_v33, %v1685_v47  ;;  %1654 = vmatmul.f32.gmra.mxu1 %v3886_v45  ;;  %v4386_v39 = vld [vmem:[#allocation51_spill] sm:$0xff]  ;;  %v4388_v33 = vld [vmem:[#allocation57_spill] sm:$0xff] }
 0x244   : > { %v1935_v29 = vpop.f32.mrf.mxu3  ;;  %v1687_v9 = vadd.f32 %v1607_v24, %v4386_v39 }
 0x245   : > { %v2019_v36 = vadd.f32 %v1935_v29, %v1847_v28 }
 0x246   : > { %v2110_v25 = vpop.f32.mrf.mxu0 }
 0x247   : > { %v2188_v38 = vadd.f32 %v2104_v51, %v2019_v36  ;;  %1813 = vmatmul.f32.gmra.mxu2 %v4381_v5 }
 0x248   : > { %v1610_v59 = vpop.f32.mrf.mxu1 }
 0x249   : > { %v2219_v26 = vadd.f32 %v2218_v55, %v2188_v38  ;;  %v2257_v10 = vmul.f32 %v2188_v38, %v2188_v38  ;;  %2329 = vst [vmem:[%s4090_s25 + $0x30] sm:$0xff] %v2188_v38  ;;  %1985 = vmatmul.f32.gmra.mxu3 %v4383_v54  ;;  %2157 = vmatmul.f32.gmra.mxu0 %v4384_v2  ;;  %v4390_v38 = vld [vmem:[#allocation19_spill] sm:$0xff] }
 0x24a   : > { %v1766_v19 = vpop.f32.mrf.mxu2 }
 0x24b   : > { %v2288_v61 = vadd.f32 %v2287_v15, %v2257_v10  ;;  %v1848_v45 = vadd.f32 %v1766_v19, %v1686_v32  ;;  %1657 = vmatmul.f32.gmra.mxu1 %v4380_v43  ;;  %v4389_v15 = vld [vmem:[#allocation53_spill] sm:$0xff]  ;;  %v4391_v19 = vld [vmem:[#allocation56_spill] sm:$0xff] }
 0x24c   : > { %v1938_v57 = vpop.f32.mrf.mxu3  ;;  %v1688_v28 = vadd.f32 %v1610_v59, %v4389_v15 }
 0x24d   : > { %v2020_v51 = vadd.f32 %v1938_v57, %v1848_v45 }
 0x24e   : > { %v2113_v42 = vpop.f32.mrf.mxu0 }
 0x24f   : > { %v2189_v30 = vadd.f32 %v2107_v11, %v2020_v51  ;;  %1816 = vmatmul.f32.gmra.mxu2 %v4385_v44  ;;  %v4392_v51 = vld [vmem:[#allocation23_spill] sm:$0xff]  ;;  %v1542_v44 = vrot.slane %v3933_v22, 2 }
 0x250   : > { %v1613_v27 = vpop.f32.mrf.mxu1 }
 0x251   : > { %v2220_v52 = vadd.f32 %v2219_v26, %v2189_v30  ;;  %v2258_v0 = vmul.f32 %v2189_v30, %v2189_v30  ;;  %2330 = vst [vmem:[%s4090_s25 + $0x38] sm:$0xff] %v2189_v30  ;;  %1988 = vmatmul.f32.gmra.mxu3 %v4387_v48  ;;  %2160 = vmatmul.f32.gmra.mxu0 %v3940_v50 }
 0x252   : > { %v1769_v20 = vpop.f32.mrf.mxu2 }
 0x253   : > { %v2289_v47 = vadd.f32 %v2288_v61, %v2258_v0  ;;  %v1849_v55 = vadd.f32 %v1769_v20, %v1687_v9  ;;  %1660 = vmatmul.f32.gmra.mxu1 %v4384_v2  ;;  %v2675_v2 = vld [vmem:[#allocation2 + $0x168] sm:$0xff]  ;;  %v1689_v61 = vadd.f32 %v1613_v27, %v4391_v19  ;;  %v2676_v20 = vld [vmem:[#allocation2 + $0x170] sm:$0xff] }
 0x254   : > { %v1941_v46 = vpop.f32.mrf.mxu3 }
 0x255   : > { %v2021_v11 = vadd.f32 %v1941_v46, %v1849_v55  ;;  %v4393_v55 = vld [vmem:[#allocation59_spill] sm:$0xff] }
 0x256   : > { %v2116_v41 = vpop.f32.mrf.mxu0 }
 0x257   : > { %v2190_v43 = vadd.f32 %v2110_v25, %v2021_v11  ;;  %1819 = vmatmul.f32.gmra.mxu2 %v4388_v33  ;;  %v4394_v33 = vld [vmem:[#allocation24_spill] sm:$0xff] }
 0x258   : > { %v1616_v24 = vpop.f32.mrf.mxu1 }
 0x259   : > { %v2221_v29 = vadd.f32 %v2220_v52, %v2190_v43  ;;  %v2259_v36 = vmul.f32 %v2190_v43, %v2190_v43  ;;  %2331 = vst [vmem:[%s4090_s25 + $0x40] sm:$0xff] %v2190_v43  ;;  %1991 = vmatmul.f32.gmra.mxu3 %v4390_v38  ;;  %2163 = vmatmul.f32.gmra.mxu0 %v3958_v7 }
 0x25a   : > { %v1772_v5 = vpop.f32.mrf.mxu2  ;;  %v1690_v46 = vadd.f32 %v1616_v24, %v4393_v55 }
 0x25b   : > { %v2290_v1 = vadd.f32 %v2289_v47, %v2259_v36  ;;  %v1850_v32 = vadd.f32 %v1772_v5, %v1688_v28  ;;  %1663 = vmatmul.f32.gmra.mxu1 %v3940_v50  ;;  %v1543_v50 = vrot.slane %v3929_v56, 2 }
 0x25c   : > { %v1944_v26 = vpop.f32.mrf.mxu3 }
 0x25d   : > { %v2022_v25 = vadd.f32 %v1944_v26, %v1850_v32  ;;  %v1544_v0 = vsel %vm933_vm1, %v1542_v44, %v1543_v50  ;;  %v512_v44 = vld [vmem:[#allocation2 + $0x1a8] sm:$0x3] }
 0x25e   : > { %v2119_v10 = vpop.f32.mrf.mxu0 }
 0x25f   : > { %v2191_v54 = vadd.f32 %v2113_v42, %v2022_v25  ;;  %1822 = vmatmul.f32.gmra.mxu2 %v2675_v2 }
 0x260   : > { %v1619_v59 = vpop.f32.mrf.mxu1 }
 0x261   : > { %v2222_v45 = vadd.f32 %v2221_v29, %v2191_v54  ;;  %v2260_v57 = vmul.f32 %v2191_v54, %v2191_v54  ;;  %2332 = vst [vmem:[%s4090_s25 + $0x48] sm:$0xff] %v2191_v54  ;;  %1994 = vmatmul.f32.gmra.mxu3 %v4392_v51  ;;  %2166 = vmatmul.f32.gmra.mxu0 %v3972_v23  ;;  %v4395_v54 = vld [vmem:[#allocation20_spill] sm:$0xff] }
 0x262   : > { %v1775_v30 = vpop.f32.mrf.mxu2  ;;  %v1691_v32 = vadd.f32 %v1619_v59, %v3945_v63 }
 0x263   : > { %v2291_v39 = vadd.f32 %v2290_v1, %v2260_v57  ;;  %v1851_v42 = vadd.f32 %v1775_v30, %v1689_v61  ;;  %1666 = vmatmul.f32.gmra.mxu1 %v3958_v7  ;;  %v1545_v7 = vrot.slane %v3948_v13, 2 }
 0x264   : > { %v1947_v9 = vpop.f32.mrf.mxu3 }
 0x265   : > { %v2023_v52 = vadd.f32 %v1947_v9, %v1851_v42  ;;  %v1546_v5 = vsel %vm933_vm1, %v1543_v50, %v1545_v7  ;;  %v2048_v42 = vrot.slane %v512_v44, 2 }
 0x266   : > { %v2122_v27 = vpop.f32.mrf.mxu0 }
 0x267   : > { %v2192_v48 = vadd.f32 %v2116_v41, %v2023_v52  ;;  %1825 = vmatmul.f32.gmra.mxu2 %v2676_v20 }
 0x268   : > { %v1622_v47 = vpop.f32.mrf.mxu1 }
 0x269   : > { %v2223_v11 = vadd.f32 %v2222_v45, %v2192_v48  ;;  %v2261_v43 = vmul.f32 %v2192_v48, %v2192_v48  ;;  %2333 = vst [vmem:[%s4090_s25 + $0x50] sm:$0xff] %v2192_v48  ;;  %1997 = vmatmul.f32.gmra.mxu3 %v4394_v33  ;;  %2169 = vmatmul.f32.gmra.mxu0 %v1544_v0 }
 0x26a   : > { %v1778_v15 = vpop.f32.mrf.mxu2  ;;  %v1692_v59 = vadd.f32 %v1622_v47, %v3963_v34 }
 0x26b   : > { %v2292_v28 = vadd.f32 %v2291_v39, %v2261_v43  ;;  %v1852_v29 = vadd.f32 %v1778_v15, %v1690_v46  ;;  %1669 = vmatmul.f32.gmra.mxu1 %v3972_v23  ;;  %v2677_v23 = vld [vmem:[#allocation2] sm:$0xff] }
 0x26c   : > { %v1950_v41 = vpop.f32.mrf.mxu3  ;;  %v2045_v2 = vrot.slane %v2677_v23, 2  ;;  %v1876_v39 = vrot.slane %v2677_v23, 1 }
 0x26d   : > { %v2024_v36 = vadd.f32 %v1950_v41, %v1852_v29 }
 0x26e   : > { %v2125_v38 = vpop.f32.mrf.mxu0  ;;  %v2049_v48 = vsel %vm933_vm1, %v2045_v2, %v2048_v42 }
 0x26f   : > { %v2193_v24 = vadd.f32 %v2119_v10, %v2024_v36  ;;  %1828 = vmatmul.f32.gmra.mxu2 %v3933_v22 }
 0x270   : > { %v1625_v1 = vpop.f32.mrf.mxu1 }
 0x271   : > { %v2224_v26 = vadd.f32 %v2223_v11, %v2193_v24  ;;  %v2262_v25 = vmul.f32 %v2193_v24, %v2193_v24  ;;  %2334 = vst [vmem:[%s4090_s25 + $0x58] sm:$0xff] %v2193_v24  ;;  %2000 = vmatmul.f32.gmra.mxu3 %v4395_v54  ;;  %2172 = vmatmul.f32.gmra.mxu0 %v1546_v5  ;;  %v1879_v11 = vrot.slane %v512_v44, 1 }
 0x272   : > { %v1781_v13 = vpop.f32.mrf.mxu2  ;;  %v1693_v47 = vadd.f32 %v1625_v1, %v3974_v60 }
 0x273   : > { %v2293_v19 = vadd.f32 %v2292_v28, %v2262_v25  ;;  %v1853_v61 = vadd.f32 %v1781_v13, %v1691_v32  ;;  %1672 = vmatmul.f32.gmra.mxu1 %v1544_v0  ;;  %v1880_v28 = vsel %vm577_vm0, %v1876_v39, %v1879_v11 }
 0x274   : > { %v1953_v45 = vpop.f32.mrf.mxu3 }
 0x275   : > { %v2025_v10 = vadd.f32 %v1953_v45, %v1853_v61 }
 0x276   : > { %v2128_v57 = vpop.f32.mrf.mxu0 }
 0x277   : > { %v2194_v22 = vadd.f32 %v2122_v27, %v2025_v10  ;;  %1831 = vmatmul.f32.gmra.mxu2 %v3929_v56 }
 0x278   : > { %v1628_v63 = vpop.f32.mrf.mxu1 }
 0x279   : > { %v2225_v51 = vadd.f32 %v2224_v26, %v2194_v22  ;;  %v2263_v30 = vmul.f32 %v2194_v22, %v2194_v22  ;;  %2335 = vst [vmem:[%s4090_s25 + $0x60] sm:$0xff] %v2194_v22  ;;  %2003 = vmatmul.f32.gmra.mxu3 %v3961_v4  ;;  %2175 = vmatmul.f32.gmra.mxu0 %v2045_v2 }
 0x27a   : > { %v1784_v50 = vpop.f32.mrf.mxu2  ;;  %v1694_v60 = vadd.f32 %v1628_v63, %v3981_v17 }
 0x27b   : > { %v2294_v9 = vadd.f32 %v2293_v19, %v2263_v30  ;;  %v1854_v52 = vadd.f32 %v1784_v50, %v1692_v59  ;;  %1675 = vmatmul.f32.gmra.mxu1 %v1546_v5 }
 0x27c   : > { %v1956_v27 = vpop.f32.mrf.mxu3 }
 0x27d   : > { %v2026_v0 = vadd.f32 %v1956_v27, %v1854_v52 }
 0x27e   : > { %v2131_v56 = vpop.f32.mrf.mxu0 }
 0x27f   : > { %v2195_v34 = vadd.f32 %v2125_v38, %v2026_v0  ;;  %1834 = vmatmul.f32.gmra.mxu2 %v2677_v23 }
 0x280   : > { %v1631_v20 = vpop.f32.mrf.mxu1 }
 0x281   : > { %v2226_v4 = vadd.f32 %v2225_v51, %v2195_v34  ;;  %v2264_v55 = vmul.f32 %v2195_v34, %v2195_v34  ;;  %2336 = vst [vmem:[%s4090_s25 + $0x68] sm:$0xff] %v2195_v34  ;;  %2006 = vmatmul.f32.gmra.mxu3 %v1876_v39  ;;  %2178 = vmatmul.f32.gmra.mxu0 %v2049_v48 }
 0x282   : > { %v1787_v46 = vpop.f32.mrf.mxu2  ;;  %v1695_v19 = vadd.f32 %v1631_v20, %v3987_v6 }
 0x283   : > { %v2295_v43 = vadd.f32 %v2294_v9, %v2264_v55  ;;  %v1855_v33 = vadd.f32 %v1787_v46, %v1693_v47 }
 0x284   : > { %v1959_v15 = vpop.f32.mrf.mxu3 }
 0x285   : > { %v2027_v7 = vadd.f32 %v1959_v15, %v1855_v33 }
 0x286   : > { %v2134_v29 = vpop.f32.mrf.mxu0 }
 0x287   : > { %v2196_v41 = vadd.f32 %v2128_v57, %v2027_v7  ;;  %1837 = vmatmul.f32.gmra.mxu2 %v2677_v23 }
 0x288   : > { %v1634_v36 = vpop.f32.mrf.mxu1 }
 0x289   : > { %v2227_v38 = vadd.f32 %v2226_v4, %v2196_v41  ;;  %v2265_v5 = vmul.f32 %v2196_v41, %v2196_v41  ;;  %2337 = vst [vmem:[%s4090_s25 + $0x70] sm:$0xff] %v2196_v41  ;;  %2009 = vmatmul.f32.gmra.mxu3 %v1880_v28  ;;  %v1696_v30 = vadd.f32 %v1634_v36, %v3993_v35 }
 0x28a   : > { %v1790_v24 = vpop.f32.mrf.mxu2 }
 0x28b   : > { %v2296_v1 = vadd.f32 %v2295_v43, %v2265_v5  ;;  %v1856_v32 = vadd.f32 %v1790_v24, %v1694_v60 }
 0x28c   : > { %v1962_v26 = vpop.f32.mrf.mxu3 }
 0x28d   : > { %v2028_v25 = vadd.f32 %v1962_v26, %v1856_v32 }
 0x28e   : > { %v2137_v54 = vpop.f32.mrf.mxu0 }
 0x28f   : > { %v2197_v13 = vadd.f32 %v2131_v56, %v2028_v25 }
 0x290   : > { %v1637_v2 = vpop.f32.mrf.mxu1 }
 0x291   : > { %v2228_v23 = vadd.f32 %v2227_v38, %v2197_v13  ;;  %v2266_v61 = vmul.f32 %v2197_v13, %v2197_v13  ;;  %2338 = vst [vmem:[%s4090_s25 + $0x78] sm:$0xff] %v2197_v13  ;;  %v1697_v48 = vadd.f32 %v1637_v2, %v3999_v37 }
 0x292   : > { %v1793_v17 = vpop.f32.mrf.mxu2 }
 0x293   : > { %v2297_v45 = vadd.f32 %v2296_v1, %v2266_v61  ;;  %v1857_v10 = vadd.f32 %v1793_v17, %v1695_v19 }
 0x294   : > { %v1965_v57 = vpop.f32.mrf.mxu3 }
 0x295   : > { %v2029_v22 = vadd.f32 %v1965_v57, %v1857_v10 }
 0x296   : > { %v2140_v63 = vpop.f32.mrf.mxu0 }
 0x297   : > { %v2198_v59 = vadd.f32 %v2134_v29, %v2029_v22 }
 0x298   : > { %v1640_v51 = vpop.f32.mrf.mxu1 }
 0x299   : > { %v2229_v44 = vadd.f32 %v2228_v23, %v2198_v59  ;;  %v2267_v50 = vmul.f32 %v2198_v59, %v2198_v59  ;;  %2339 = vst [vmem:[%s4090_s25 + $0x80] sm:$0xff] %v2198_v59  ;;  %v1698_v15 = vadd.f32 %v1640_v51, %v4005_v16 }
 0x29a   : > { %v1796_v39 = vpop.f32.mrf.mxu2 }
 0x29b   : > { %v2298_v42 = vadd.f32 %v2297_v45, %v2267_v50  ;;  %v1858_v6 = vadd.f32 %v1796_v39, %v1696_v30 }
 0x29c   : > { %v1968_v9 = vpop.f32.mrf.mxu3 }
 0x29d   : > { %v2030_v52 = vadd.f32 %v1968_v9, %v1858_v6 }
 0x29e   : > { %v2143_v27 = vpop.f32.mrf.mxu0 }
 0x29f   : > { %v2199_v0 = vadd.f32 %v2137_v54, %v2030_v52 }
 0x2a0   : > { %v1643_v56 = vpop.f32.mrf.mxu1 }
 0x2a1   : > { %v2230_v34 = vadd.f32 %v2229_v44, %v2199_v0  ;;  %v2268_v20 = vmul.f32 %v2199_v0, %v2199_v0  ;;  %2340 = vst [vmem:[%s4090_s25 + $0x88] sm:$0xff] %v2199_v0  ;;  %v1699_v1 = vadd.f32 %v1643_v56, %v4012_v31 }
 0x2a2   : > { %v1799_v47 = vpop.f32.mrf.mxu2 }
 0x2a3   : > { %v2299_v4 = vadd.f32 %v2298_v42, %v2268_v20  ;;  %v1859_v35 = vadd.f32 %v1799_v47, %v1697_v48 }
 0x2a4   : > { %v1971_v55 = vpop.f32.mrf.mxu3 }
 0x2a5   : > { %v2031_v46 = vadd.f32 %v1971_v55, %v1859_v35 }
 0x2a6   : > { %v2146_v11 = vpop.f32.mrf.mxu0 }
 0x2a7   : > { %v2200_v43 = vadd.f32 %v2140_v63, %v2031_v46 }
 0x2a8   : > { %v1646_v33 = vpop.f32.mrf.mxu1 }
 0x2a9   : > { %v2231_v7 = vadd.f32 %v2230_v34, %v2200_v43  ;;  %v2269_v28 = vmul.f32 %v2200_v43, %v2200_v43  ;;  %2341 = vst [vmem:[%s4090_s25 + $0x90] sm:$0xff] %v2200_v43  ;;  %v1700_v17 = vadd.f32 %v1646_v33, %v4019_v40 }
 0x2aa   : > { %v1802_v29 = vpop.f32.mrf.mxu2 }
 0x2ab   : > { %v2300_v41 = vadd.f32 %v2299_v4, %v2269_v28  ;;  %v1860_v37 = vadd.f32 %v1802_v29, %v1698_v15 }
 0x2ac   : > { %v1974_v36 = vpop.f32.mrf.mxu3 }
 0x2ad   : > { %v2032_v60 = vadd.f32 %v1974_v36, %v1860_v37 }
 0x2ae   : > { %v2149_v38 = vpop.f32.mrf.mxu0 }
 0x2af   : > { %v2201_v5 = vadd.f32 %v2143_v27, %v2032_v60 }
 0x2b0   : > { %v1649_v24 = vpop.f32.mrf.mxu1 }
 0x2b1   : > { %v2232_v32 = vadd.f32 %v2231_v7, %v2201_v5  ;;  %v2270_v26 = vmul.f32 %v2201_v5, %v2201_v5  ;;  %2342 = vst [vmem:[%s4090_s25 + $0x98] sm:$0xff] %v2201_v5  ;;  %v1701_v50 = vadd.f32 %v1649_v24, %v4025_v21 }
 0x2b2   : > { %v1805_v25 = vpop.f32.mrf.mxu2 }
 0x2b3   : > { %v2301_v54 = vadd.f32 %v2300_v41, %v2270_v26  ;;  %v1861_v16 = vadd.f32 %v1805_v25, %v1699_v1 }
 0x2b4   : > { %v1977_v13 = vpop.f32.mrf.mxu3 }
 0x2b5   : > { %v2033_v2 = vadd.f32 %v1977_v13, %v1861_v16 }
 0x2b6   : > { %v2152_v19 = vpop.f32.mrf.mxu0 }
 0x2b7   : > { %v2202_v23 = vadd.f32 %v2146_v11, %v2033_v2 }
 0x2b8   : > { %v1652_v61 = vpop.f32.mrf.mxu1 }
 0x2b9   : > { %v2233_v45 = vadd.f32 %v2232_v32, %v2202_v23  ;;  %v2271_v10 = vmul.f32 %v2202_v23, %v2202_v23  ;;  %2343 = vst [vmem:[%s4090_s25 + $0xa0] sm:$0xff] %v2202_v23  ;;  %v1702_v48 = vadd.f32 %v1652_v61, %v4031_v3 }
 0x2ba   : > { %v1808_v57 = vpop.f32.mrf.mxu2 }
 0x2bb   : > { %v2302_v22 = vadd.f32 %v2301_v54, %v2271_v10  ;;  %v1862_v31 = vadd.f32 %v1808_v57, %v1700_v17 }
 0x2bc   : > { %v1980_v63 = vpop.f32.mrf.mxu3 }
 0x2bd   : > { %v2034_v59 = vadd.f32 %v1980_v63, %v1862_v31 }
 0x2be   : > { %v2155_v51 = vpop.f32.mrf.mxu0 }
 0x2bf   : > { %v2203_v30 = vadd.f32 %v2149_v38, %v2034_v59 }
 0x2c0   : > { %v1655_v44 = vpop.f32.mrf.mxu1 }
 0x2c1   : > { %v2234_v39 = vadd.f32 %v2233_v45, %v2203_v30  ;;  %v2272_v42 = vmul.f32 %v2203_v30, %v2203_v30  ;;  %2344 = vst [vmem:[%s4090_s25 + $0xa8] sm:$0xff] %v2203_v30  ;;  %v1703_v33 = vadd.f32 %v1655_v44, %v4037_v18 }
 0x2c2   : > { %v1811_v6 = vpop.f32.mrf.mxu2 }
 0x2c3   : > { %v2303_v9 = vadd.f32 %v2302_v22, %v2272_v42  ;;  %v1863_v40 = vadd.f32 %v1811_v6, %v1701_v50 }
 0x2c4   : > { %v1983_v52 = vpop.f32.mrf.mxu3 }
 0x2c5   : > { %v2035_v27 = vadd.f32 %v1983_v52, %v1863_v40 }
 0x2c6   : > { %v2158_v0 = vpop.f32.mrf.mxu0 }
 0x2c7   : > { %v2204_v56 = vadd.f32 %v2152_v19, %v2035_v27 }
 0x2c8   : > { %v1658_v4 = vpop.f32.mrf.mxu1 }
 0x2c9   : > { %v2235_v34 = vadd.f32 %v2234_v39, %v2204_v56  ;;  %v2273_v20 = vmul.f32 %v2204_v56, %v2204_v56  ;;  %2345 = vst [vmem:[%s4090_s25 + $0xb0] sm:$0xff] %v2204_v56  ;;  %v1704_v38 = vadd.f32 %v1658_v4, %v4043_v14 }
 0x2ca   : > { %v1814_v47 = vpop.f32.mrf.mxu2 }
 0x2cb   : > { %v2304_v35 = vadd.f32 %v2303_v9, %v2273_v20  ;;  %v1864_v21 = vadd.f32 %v1814_v47, %v1702_v48 }
 0x2cc   : > { %v1986_v55 = vpop.f32.mrf.mxu3 }
 0x2cd   : > { %v2036_v46 = vadd.f32 %v1986_v55, %v1864_v21 }
 0x2ce   : > { %v2161_v43 = vpop.f32.mrf.mxu0 }
 0x2cf   : > { %v2205_v11 = vadd.f32 %v2155_v51, %v2036_v46 }
 0x2d0   : > { %v1661_v37 = vpop.f32.mrf.mxu1 }
 0x2d1   : > { %v2236_v15 = vadd.f32 %v2235_v34, %v2205_v11  ;;  %v2274_v7 = vmul.f32 %v2205_v11, %v2205_v11  ;;  %2346 = vst [vmem:[%s4090_s25 + $0xb8] sm:$0xff] %v2205_v11  ;;  %v1705_v2 = vadd.f32 %v1661_v37, %v4049_v62 }
 0x2d2   : > { %v1817_v28 = vpop.f32.mrf.mxu2 }
 0x2d3   : > { %v2305_v29 = vadd.f32 %v2304_v35, %v2274_v7  ;;  %v1865_v3 = vadd.f32 %v1817_v28, %v1703_v33 }
 0x2d4   : > { %v1989_v41 = vpop.f32.mrf.mxu3 }
 0x2d5   : > { %v2037_v36 = vadd.f32 %v1989_v41, %v1865_v3 }
 0x2d6   : > { %v2164_v32 = vpop.f32.mrf.mxu0 }
 0x2d7   : > { %v2206_v60 = vadd.f32 %v2158_v0, %v2037_v36 }
 0x2d8   : > { %v1664_v16 = vpop.f32.mrf.mxu1 }
 0x2d9   : > { %v2237_v5 = vadd.f32 %v2236_v15, %v2206_v60  ;;  %v2275_v24 = vmul.f32 %v2206_v60, %v2206_v60  ;;  %2347 = vst [vmem:[%s4090_s25 + $0xc0] sm:$0xff] %v2206_v60  ;;  %v1706_v63 = vadd.f32 %v1664_v16, %v4055_v12 }
 0x2da   : > { %v1820_v1 = vpop.f32.mrf.mxu2 }
 0x2db   : > { %v2306_v26 = vadd.f32 %v2305_v29, %v2275_v24  ;;  %v1866_v18 = vadd.f32 %v1820_v1, %v1704_v38 }
 0x2dc   : > { %v1992_v25 = vpop.f32.mrf.mxu3 }
 0x2dd   : > { %v2038_v54 = vadd.f32 %v1992_v25, %v1866_v18 }
 0x2de   : > { %v2167_v10 = vpop.f32.mrf.mxu0 }
 0x2df   : > { %v2207_v13 = vadd.f32 %v2161_v43, %v2038_v54 }
 0x2e0   : > { %v1667_v31 = vpop.f32.mrf.mxu1 }
 0x2e1   : > { %v2238_v19 = vadd.f32 %v2237_v5, %v2207_v13  ;;  %v2276_v23 = vmul.f32 %v2207_v13, %v2207_v13  ;;  %2348 = vst [vmem:[%s4090_s25 + $0xc8] sm:$0xff] %v2207_v13  ;;  %v1707_v9 = vadd.f32 %v1667_v31, %v4061_v49 }
 0x2e2   : > { %v1823_v61 = vpop.f32.mrf.mxu2 }
 0x2e3   : > { %v2307_v17 = vadd.f32 %v2306_v26, %v2276_v23  ;;  %v1867_v14 = vadd.f32 %v1823_v61, %v1705_v2 }
 0x2e4   : > { %v1995_v45 = vpop.f32.mrf.mxu3 }
 0x2e5   : > { %v2039_v57 = vadd.f32 %v1995_v45, %v1867_v14 }
 0x2e6   : > { %v2170_v42 = vpop.f32.mrf.mxu0 }
 0x2e7   : > { %v2208_v22 = vadd.f32 %v2164_v32, %v2039_v57 }
 0x2e8   : > { %v1670_v0 = vpop.f32.mrf.mxu1 }
 0x2e9   : > { %v2239_v59 = vadd.f32 %v2238_v19, %v2208_v22  ;;  %v2277_v51 = vmul.f32 %v2208_v22, %v2208_v22  ;;  %2349 = vst [vmem:[%s4090_s25 + $0xd0] sm:$0xff] %v2208_v22  ;;  %v1708_v4 = vadd.f32 %v1670_v0, %v4067_v53 }
 0x2ea   : > { %v1826_v30 = vpop.f32.mrf.mxu2 }
 0x2eb   : > { %v2308_v44 = vadd.f32 %v2307_v17, %v2277_v51  ;;  %v1868_v62 = vadd.f32 %v1826_v30, %v1706_v63 }
 0x2ec   : > { %v1998_v50 = vpop.f32.mrf.mxu3 }
 0x2ed   : > { %v2040_v39 = vadd.f32 %v1998_v50, %v1868_v62 }
 0x2ee   : > { %v2173_v47 = vpop.f32.mrf.mxu0 }
 0x2ef   : > { %v2209_v6 = vadd.f32 %v2167_v10, %v2040_v39 }
 0x2f0   : > { %v1673_v11 = vpop.f32.mrf.mxu1 }
 0x2f1   : > { %v2240_v40 = vadd.f32 %v2239_v59, %v2209_v6  ;;  %v2278_v52 = vmul.f32 %v2209_v6, %v2209_v6  ;;  %2350 = vst [vmem:[%s4090_s25 + $0xd8] sm:$0xff] %v2209_v6  ;;  %v1709_v7 = vadd.f32 %v1673_v11, %v4073_v58 }
 0x2f2   : > { %v1829_v27 = vpop.f32.mrf.mxu2 }
 0x2f3   : > { %v2309_v56 = vadd.f32 %v2308_v44, %v2278_v52  ;;  %v1869_v12 = vadd.f32 %v1829_v27, %v1707_v9 }
 0x2f4   : > { %v2001_v48 = vpop.f32.mrf.mxu3 }
 0x2f5   : > { %v2041_v34 = vadd.f32 %v2001_v48, %v1869_v12 }
 0x2f6   : > { %v2176_v41 = vpop.f32.mrf.mxu0 }
 0x2f7   : > { %v2210_v20 = vadd.f32 %v2170_v42, %v2041_v34 }
 0x2f8   : > { %v1676_v38 = vpop.f32.mrf.mxu1 }
 0x2f9   : > { %v2241_v35 = vadd.f32 %v2240_v40, %v2210_v20  ;;  %v2279_v21 = vmul.f32 %v2210_v20, %v2210_v20  ;;  %2351 = vst [vmem:[%s4090_s25 + $0xe0] sm:$0xff] %v2210_v20  ;;  %v1710_v24 = vadd.f32 %v1676_v38, %v4079_v8 }
 0x2fa   : > { %v1832_v55 = vpop.f32.mrf.mxu2 }
 0x2fb   : > { %v2310_v46 = vadd.f32 %v2309_v56, %v2279_v21  ;;  %v1870_v49 = vadd.f32 %v1832_v55, %v1708_v4 }
 0x2fc   : > { %v2004_v43 = vpop.f32.mrf.mxu3 }
 0x2fd   : > { %v2042_v33 = vadd.f32 %v2004_v43, %v1870_v49 }
 0x2fe   : > { %v2179_v54 = vpop.f32.mrf.mxu0 }
 0x2ff   : > { %v2211_v15 = vadd.f32 %v2173_v47, %v2042_v33 }
 0x301   : > { %v2242_v28 = vadd.f32 %v2241_v35, %v2211_v15  ;;  %v2280_v29 = vmul.f32 %v2211_v15, %v2211_v15  ;;  %2352 = vst [vmem:[%s4090_s25 + $0xe8] sm:$0xff] %v2211_v15 }
 0x302   : > { %v1835_v3 = vpop.f32.mrf.mxu2 }
 0x303   : > { %v2311_v37 = vadd.f32 %v2310_v46, %v2280_v29  ;;  %v1871_v53 = vadd.f32 %v1835_v3, %v1709_v7 }
 0x304   : > { %v2007_v36 = vpop.f32.mrf.mxu3 }
 0x305   : > { %v2043_v60 = vadd.f32 %v2007_v36, %v1871_v53 }
 0x307   : > { %v2212_v5 = vadd.f32 %v2176_v41, %v2043_v60 }
 0x309   : > { %v2243_v1 = vadd.f32 %v2242_v28, %v2212_v5  ;;  %v2281_v32 = vmul.f32 %v2212_v5, %v2212_v5  ;;  %2353 = vst [vmem:[%s4090_s25 + $0xf0] sm:$0xff] %v2212_v5 }
 0x30a   : > { %v1838_v26 = vpop.f32.mrf.mxu2 }
 0x30b   : > { %v2312_v18 = vadd.f32 %v2311_v37, %v2281_v32  ;;  %v1872_v58 = vadd.f32 %v1838_v26, %v1710_v24 }
 0x30c   : > { %v2010_v25 = vpop.f32.mrf.mxu3 }
 0x30d   : > { %v2044_v16 = vadd.f32 %v2010_v25, %v1872_v58 }
 0x30f   : > { %v2213_v13 = vadd.f32 %v2179_v54, %v2044_v16 }
 0x311   : > { %v2244_v2 = vadd.f32 %v2243_v1, %v2213_v13  ;;  %v2282_v19 = vmul.f32 %v2213_v13, %v2213_v13  ;;  %2354 = vst [vmem:[%s4090_s25 + $0xf8] sm:$0xff] %v2213_v13 }
 0x313   : > { %v2245_v23 = vrot.slane %v2244_v2, 4  ;;  %v2313_v61 = vadd.f32 %v2312_v18, %v2282_v19 }
 0x315   : > { %v2246_v17 = vadd.f32 %v2245_v23, %v2244_v2  ;;  %v2314_v14 = vrot.slane %v2313_v61, 4 }
 0x317   : > { %v2247_v45 = vrot.slane %v2246_v17, 2  ;;  %v2315_v8 = vadd.f32 %v2314_v14, %v2313_v61 }
 0x319   : > { %v2248_v10 = vadd.f32 %v2247_v45, %v2246_v17  ;;  %v2316_v57 = vrot.slane %v2315_v8, 2 }
 0x31b   : > { %v2249_v22 = vrot.slane %v2248_v10, 1  ;;  %v2317_v31 = vadd.f32 %v2316_v57, %v2315_v8 }
 0x31d   : > { %v2318_v63 = vrot.slane %v2317_v31, 1  ;;  %v2250_v59 = vadd.f32 %v2249_v22, %v2248_v10 }
 0x31f   : > { %v2319_v51 = vadd.f32 %v2318_v63, %v2317_v31 }
 0x321   : > { %v2321_v30 = vsel %vm2320_vm2, %v2250_v59, %v2319_v51 }
 0x322   : > { %2322 = vst [vmem:[%s235_s29] sm:$0x3] %v2321_v30 }
 0x323 PF: > { %s16_s18 = sadd.s32 1, %s2684_s18  }
 0x324   : > { %p13_p4 = scmp.ge.s32.totalorder %s16_s18, 4  }
 0x326   :  { %15 = sbr.rel (!%p13_p4) target bundleno = 1 (0x1), region = 87 }

</bundles_post_ra>
